<compile_context>
chip_gen: v6e
topology: v6e:2x2x1
jax: 0.10.0
libtpu: 0.0.40
codegen_flags: <defaults>
</compile_context>

<pallas_src>
import functools

import jax
import jax.numpy as jnp
from jax.experimental import pallas as pl
from jax.experimental.pallas import tpu as pltpu

_GATE_PAD = 128   # each GRU gate padded to one full 128-lane block
_ROW_PAD = 8      # per-step batch rows padded to a full 8-sublane tile


def _row(t, bp):
    """t*bp as an aligned row offset (alignment hint when t is a traced index)."""
    r = t * bp
    return r if isinstance(r, int) else pl.multiple_of(r, bp)


# -----------------------------------------------------------------------------
# Fused TEMP_DAE kernel: hoisted encoder x-projection + software-pipelined
# encoder/decoder GRU recurrences, all inside one pallas_call (no grid).
# PyTorch GRU equations / gate order (r, z, n):
#   r = sigmoid(W_ir x + b_ir + W_hr h + b_hr)
#   z = sigmoid(W_iz x + b_iz + W_hz h + b_hz)
#   n = tanh  (W_in x + b_in + r * (W_hn h + b_hn))
#   h' = (1 - z) * n + z * h
# -----------------------------------------------------------------------------
def _temp_dae_kernel(x_ref,
                     wie_ref, whe_ref, bie_ref, bhne_ref,     # encoder (packed/padded)
                     wid_ref, whd_ref, bid_ref, bhnd_ref,     # decoder (packed/padded)
                     out_ref,
                     gie_scr,
                     *, T, BP, G):
    f32 = jnp.float32

    # ---- hoisted encoder input-path projection: one big MXU matmul, off the serial path
    gie_scr[...] = (jnp.dot(x_ref[...], wie_ref[...], preferred_element_type=f32)
                    + bie_ref[...])

    # ---- hoist weight loads / bias broadcasts out of the (fully unrolled) time loop
    w_he = whe_ref[...]
    w_hd = whd_ref[...]
    w_id = wid_ref[...]
    cdt = w_he.dtype                                    # bf16 (MXU-native) or f32
    b_hne = jnp.broadcast_to(bhne_ref[...], (BP, G))    # n-gate-only hidden-path bias
    b_hnd = jnp.broadcast_to(bhnd_ref[...], (BP, G))
    b_id = jnp.broadcast_to(bid_ref[...], (BP, 3 * G))  # decoder folded input-path bias

    def gru_cell(gi, gh, b_hn, h_prev):
        # Gate slices are 128-lane aligned (G = 128) -> exact vreg boundaries.
        r = jax.nn.sigmoid(gi[:, 0 * G:1 * G] + gh[:, 0 * G:1 * G])
        z = jax.nn.sigmoid(gi[:, 1 * G:2 * G] + gh[:, 1 * G:2 * G])
        n = jnp.tanh(gi[:, 2 * G:3 * G] + r * (gh[:, 2 * G:3 * G] + b_hn))
        return (1.0 - z) * n + z * h_prev

    def enc_step(t, h_e):
        gi = gie_scr[pl.ds(_row(t, BP), BP), :]                         # aligned (8, 3G)
        gh = jnp.dot(h_e.astype(cdt), w_he, preferred_element_type=f32)
        return gru_cell(gi, gh, b_hne, h_e)

    def dec_step(t, h_e_in, h_d):
        # Decoder x-path projection: depends only on the previous iteration's encoder
        # output, so it is off the decoder's serial chain and its MXU latency hides.
        gi = jnp.dot(h_e_in.astype(cdt), w_id, preferred_element_type=f32) + b_id
        gh = jnp.dot(h_d.astype(cdt), w_hd, preferred_element_type=f32)
        h_new = gru_cell(gi, gh, b_hnd, h_d)
        out_ref[pl.ds(_row(t, BP), BP), :] = h_new       # lane-dense, (8,128)-aligned store
        return h_new

    # ---- software-pipelined recurrence: encoder step i || decoder step i-1 ----
    h0 = jnp.zeros((BP, G), f32)
    h_e0 = enc_step(0, h0)                                              # prologue

    def body(i, carry):
        h_e_prev, h_d_prev = carry
        h_e_new = enc_step(i, h_e_prev)                   # chain A (independent of B)
        h_d_new = dec_step(i - 1, h_e_prev, h_d_prev)     # chain B (independent of A)
        return (h_e_new, h_d_new)

    h_e_last, h_d_last = jax.lax.fori_loop(1, T, body, (h_e0, h0), unroll=True)
    dec_step(T - 1, h_e_last, h_d_last)                                 # epilogue


# -----------------------------------------------------------------------------
# Parameter packing: PyTorch-layout GRU params -> lane-aligned, gate-padded arrays
# -----------------------------------------------------------------------------
def _pack_gru(w_ih, w_hh, b_ih, b_hh, in_pad, G, compute_dtype):
    w_ih = jnp.asarray(w_ih, jnp.float32)   # (3H, Din)
    w_hh = jnp.asarray(w_hh, jnp.float32)   # (3H, H)
    b_ih = jnp.asarray(b_ih, jnp.float32)   # (3H,)
    b_hh = jnp.asarray(b_hh, jnp.float32)   # (3H,)
    H = w_hh.shape[1]
    Din = w_ih.shape[1]
    assert H <= G and Din <= in_pad

    wi = jnp.zeros((in_pad, 3 * G), jnp.float32)
    wh = jnp.zeros((G, 3 * G), jnp.float32)
    bi = jnp.zeros((1, 3 * G), jnp.float32)
    bn = jnp.zeros((1, G), jnp.float32)
    for g in range(3):  # PyTorch gate order: r, z, n
        wi = wi.at[:Din, g * G:g * G + H].set(w_ih[g * H:(g + 1) * H, :].T)
        wh = wh.at[:H, g * G:g * G + H].set(w_hh[g * H:(g + 1) * H, :].T)
    # Fold b_ih + b_hh for r and z into the hoisted input-path bias; keep b_hn on the
    # hidden path because n = tanh(i_n + b_in + r * (W_hn h + b_hn)).
    bi = bi.at[0, 0 * G:0 * G + H].set(b_ih[0 * H:1 * H] + b_hh[0 * H:1 * H])
    bi = bi.at[0, 1 * G:1 * G + H].set(b_ih[1 * H:2 * H] + b_hh[1 * H:2 * H])
    bi = bi.at[0, 2 * G:2 * G + H].set(b_ih[2 * H:3 * H])
    bn = bn.at[0, :H].set(b_hh[2 * H:3 * H])
    return dict(w_ih=wi.astype(compute_dtype), w_hh=wh.astype(compute_dtype),
                b_ih=bi, b_hn=bn)


def init_gru_params(key, input_size, hidden_size):
    """PyTorch-style U(-1/sqrt(H), 1/sqrt(H)) init, PyTorch weight layout."""
    k = 1.0 / jnp.sqrt(hidden_size)
    k1, k2, k3, k4 = jax.random.split(key, 4)
    return dict(
        w_ih=jax.random.uniform(k1, (3 * hidden_size, input_size), jnp.float32, -k, k),
        w_hh=jax.random.uniform(k2, (3 * hidden_size, hidden_size), jnp.float32, -k, k),
        b_ih=jax.random.uniform(k3, (3 * hidden_size,), jnp.float32, -k, k),
        b_hh=jax.random.uniform(k4, (3 * hidden_size,), jnp.float32, -k, k),
    )


def init_temp_dae_params(key, input_size, size_latent=32):
    ke, kd = jax.random.split(key)
    return dict(
        encoder=init_gru_params(ke, input_size, size_latent),
        decoder=init_gru_params(kd, size_latent, input_size),
    )


def pack_temp_dae_params(params, G=_GATE_PAD, compute_dtype=jnp.bfloat16):
    enc, dec = params["encoder"], params["decoder"]
    input_size = enc["w_ih"].shape[1]
    return dict(
        encoder=_pack_gru(enc["w_ih"], enc["w_hh"], enc["b_ih"], enc["b_hh"],
                          in_pad=input_size, G=G, compute_dtype=compute_dtype),
        # decoder consumes the gate-padded encoder hidden (width G)
        decoder=_pack_gru(dec["w_ih"], dec["w_hh"], dec["b_ih"], dec["b_hh"],
                          in_pad=G, G=G, compute_dtype=compute_dtype),
    )


# -----------------------------------------------------------------------------
# TEMP_DAE forward (GRU branch) — single fused pallas_call
# -----------------------------------------------------------------------------
@jax.jit
def temp_dae_forward(packed, x_btd, s=None):
    """x_btd: (B, T, input_size) batch-first. `s` is ignored in the GRU branch
    (the static MLP only feeds the LSTM branch in the original module)."""
    del s
    B, T, D = x_btd.shape
    enc, dec = packed["encoder"], packed["decoder"]
    G = enc["w_hh"].shape[0]
    cdt = enc["w_hh"].dtype
    BP = -(-B // _ROW_PAD) * _ROW_PAD          # batch rows padded to 8-sublane tiles

    # time-major + batch-pad flatten: row index = t*BP + b (tiny ops, fused under jit).
    # TODO(synk): for large B*T, accept time-major input directly to skip this permute.
    x_tbd = jnp.transpose(x_btd.astype(cdt), (1, 0, 2))               # (T, B, D)
    x2d = jnp.pad(x_tbd, ((0, 0), (0, BP - B), (0, 0))).reshape(T * BP, D)

    kernel = functools.partial(_temp_dae_kernel, T=T, BP=BP, G=G)
    out2d = pl.pallas_call(
        kernel,
        # lane-dense (T*BP, 128) output: decoder hidden written straight to out_ref.
        out_shape=jax.ShapeDtypeStruct((T * BP, G), jnp.float32),
        scratch_shapes=[
            pltpu.VMEM((T * BP, 3 * G), jnp.float32),   # hoisted encoder x-projection
        ],
        # NOTE(v7x): total VMEM here is ~0.2 MiB — far below the 32 MiB scoped limit.
        # For much larger T*B, chunk the hoisted projection over time and/or add a
        # leading "parallel" grid axis over batch chunks to use both v7x TensorCores.
    )(x2d,
      enc["w_ih"], enc["w_hh"], enc["b_ih"], enc["b_hn"],
      dec["w_ih"], dec["w_hh"], dec["b_ih"], dec["b_hn"])

    out = out2d.reshape(T, BP, G)[:, :B, :D]        # drop batch-row / gate-lane padding
    return jnp.transpose(out, (1, 0, 2))            # back to (B, T, D)


# -----------------------------------------------------------------------------
# Pure-JAX reference (lax.scan, raw PyTorch-layout f32 params) for correctness check
# -----------------------------------------------------------------------------
def _gru_ref(x_tbd, p):
    H = p["w_hh"].shape[1]
    wi, wh, bi, bh = p["w_ih"].T, p["w_hh"].T, p["b_ih"], p["b_hh"]

    def step(h, x_t):
        gi = x_t @ wi + bi
        gh = h @ wh + bh
        r = jax.nn.sigmoid(gi[:, :H] + gh[:, :H])
        z = jax.nn.sigmoid(gi[:, H:2 * H] + gh[:, H:2 * H])
        n = jnp.tanh(gi[:, 2 * H:] + r * gh[:, 2 * H:])
        h_new = (1 - z) * n + z * h
        return h_new, h_new

    h0 = jnp.zeros((x_tbd.shape[1], H), jnp.float32)
    _, ys = jax.lax.scan(step, h0, x_tbd)
    return ys


def temp_dae_ref(params, x_btd):
    x_tbd = jnp.transpose(x_btd, (1, 0, 2)).astype(jnp.float32)
    enc = _gru_ref(x_tbd, params["encoder"])
    dec = _gru_ref(enc, params["decoder"])
    return jnp.transpose(dec, (1, 0, 2))


if __name__ == "__main__":
    B, T, D, LATENT = 2, 8, 16, 32
    key = jax.random.PRNGKey(0)
    kx, ks, kp = jax.random.split(key, 3)

    x = jax.random.normal(kx, (B, T, D), jnp.float32)    # sequence input (batch_first)
    s = jax.random.normal(ks, (B, 1, 2), jnp.float32)    # static features (unused, GRU branch)
    params = init_temp_dae_params(kp, D, LATENT)

    ref = jax.block_until_ready(temp_dae_ref(params, x))

    # f32-weight kernel: tight check vs the f32 reference.
    packed_f32 = pack_temp_dae_params(params, compute_dtype=jnp.float32)
    out_f32 = jax.block_until_ready(temp_dae_forward(packed_f32, x, s))
    assert out_f32.shape == (B, T, D), out_f32.shape
    assert jnp.allclose(out_f32, ref, atol=1e-4, rtol=1e-4), "f32 kernel mismatch vs reference"

    # bf16-weight kernel (MXU-native operands, f32 accumulation): looser tolerance.
    packed_bf16 = pack_temp_dae_params(params, compute_dtype=jnp.bfloat16)
    out_bf16 = jax.block_until_ready(temp_dae_forward(packed_bf16, x, s))
    assert out_bf16.shape == (B, T, D), out_bf16.shape
    assert jnp.allclose(out_bf16, ref, atol=3e-2, rtol=3e-2), "bf16 kernel mismatch vs reference"

    print("KERNEL_OK")
</pallas_src>

<mosaic_0001>
module attributes {stable_mosaic.version = 11 : i64} {
  func.func @_temp_dae_kernel(%arg0: memref<64x16xf32, #tpu.memory_space<vmem>>, %arg1: memref<16x384xf32, #tpu.memory_space<vmem>>, %arg2: memref<128x384xf32, #tpu.memory_space<vmem>>, %arg3: memref<1x384xf32, #tpu.memory_space<vmem>>, %arg4: memref<1x128xf32, #tpu.memory_space<vmem>>, %arg5: memref<128x384xf32, #tpu.memory_space<vmem>>, %arg6: memref<128x384xf32, #tpu.memory_space<vmem>>, %arg7: memref<1x384xf32, #tpu.memory_space<vmem>>, %arg8: memref<1x128xf32, #tpu.memory_space<vmem>>, %arg9: memref<64x128xf32, #tpu.memory_space<vmem>>, %arg10: memref<64x384xf32, #tpu.memory_space<vmem>>) attributes {dimension_semantics = [], scalar_prefetch = 0 : i64, scratch_operands = 1 : i64, tpu.core_type = #tpu.core_type<tc>} {
    %c0 = arith.constant 0 : index
    %c0_0 = arith.constant 0 : index
    %0 = vector.load %arg0[%c0, %c0_0] : memref<64x16xf32, #tpu.memory_space<vmem>>, vector<64x16xf32>
    %c0_1 = arith.constant 0 : index
    %c0_2 = arith.constant 0 : index
    %1 = vector.load %arg1[%c0_1, %c0_2] : memref<16x384xf32, #tpu.memory_space<vmem>>, vector<16x384xf32>
    %cst = arith.constant dense<0.000000e+00> : vector<64x384xf32>
    %2 = tpu.matmul %0, %1, %cst {dimension_numbers = #tpu.dot_dimension_numbers<[1], [0], [0], [1], [0, 0, 1, 1], [], []>} : vector<64x16xf32>, vector<16x384xf32>, vector<64x384xf32> -> vector<64x384xf32>
    %c0_3 = arith.constant 0 : index
    %c0_4 = arith.constant 0 : index
    %3 = vector.load %arg3[%c0_3, %c0_4] : memref<1x384xf32, #tpu.memory_space<vmem>>, vector<1x384xf32>
    %4 = vector.broadcast %3 : vector<1x384xf32> to vector<64x384xf32>
    %5 = arith.addf %2, %4 : vector<64x384xf32>
    %c0_5 = arith.constant 0 : index
    %c0_6 = arith.constant 0 : index
    %6 = vector.load %arg10[%c0_5, %c0_6] : memref<64x384xf32, #tpu.memory_space<vmem>>, vector<64x384xf32>
    tpu.vector_store %arg10[%c0_5, %c0_6], %5 {strides = array<i32>} : memref<64x384xf32, #tpu.memory_space<vmem>>, vector<64x384xf32>,
    %c0_7 = arith.constant 0 : index
    %c0_8 = arith.constant 0 : index
    %7 = vector.load %arg2[%c0_7, %c0_8] : memref<128x384xf32, #tpu.memory_space<vmem>>, vector<128x384xf32>
    %c0_9 = arith.constant 0 : index
    %c0_10 = arith.constant 0 : index
    %8 = vector.load %arg6[%c0_9, %c0_10] : memref<128x384xf32, #tpu.memory_space<vmem>>, vector<128x384xf32>
    %c0_11 = arith.constant 0 : index
    %c0_12 = arith.constant 0 : index
    %9 = vector.load %arg5[%c0_11, %c0_12] : memref<128x384xf32, #tpu.memory_space<vmem>>, vector<128x384xf32>
    %c0_13 = arith.constant 0 : index
    %c0_14 = arith.constant 0 : index
    %10 = vector.load %arg4[%c0_13, %c0_14] : memref<1x128xf32, #tpu.memory_space<vmem>>, vector<1x128xf32>
    %11 = vector.shape_cast %10 : vector<1x128xf32> to vector<1x128xf32>
    %12 = vector.broadcast %11 : vector<1x128xf32> to vector<8x128xf32>
    %c0_15 = arith.constant 0 : index
    %c0_16 = arith.constant 0 : index
    %13 = vector.load %arg8[%c0_15, %c0_16] : memref<1x128xf32, #tpu.memory_space<vmem>>, vector<1x128xf32>
    %14 = vector.shape_cast %13 : vector<1x128xf32> to vector<1x128xf32>
    %15 = vector.broadcast %14 : vector<1x128xf32> to vector<8x128xf32>
    %c0_17 = arith.constant 0 : index
    %c0_18 = arith.constant 0 : index
    %16 = vector.load %arg7[%c0_17, %c0_18] : memref<1x384xf32, #tpu.memory_space<vmem>>, vector<1x384xf32>
    %17 = vector.shape_cast %16 : vector<1x384xf32> to vector<1x384xf32>
    %18 = vector.broadcast %17 : vector<1x384xf32> to vector<8x384xf32>
    %cst_19 = arith.constant 0.000000e+00 : f32
    %19 = vector.broadcast %cst_19 : f32 to vector<8x128xf32>
    %c0_20 = arith.constant 0 : index
    %c0_21 = arith.constant 0 : index
    %20 = vector.load %arg10[%c0_20, %c0_21] : memref<64x384xf32, #tpu.memory_space<vmem>>, vector<8x384xf32>
    %cst_22 = arith.constant dense<0.000000e+00> : vector<8x384xf32>
    %21 = tpu.matmul %19, %7, %cst_22 {dimension_numbers = #tpu.dot_dimension_numbers<[1], [0], [0], [1], [0, 0, 1, 1], [], []>} : vector<8x128xf32>, vector<128x384xf32>, vector<8x384xf32> -> vector<8x384xf32>
    %22 = vector.extract_strided_slice %20 {offsets = [0, 0], sizes = [8, 128], strides = [1, 1]} : vector<8x384xf32> to vector<8x128xf32>
    %23 = vector.extract_strided_slice %21 {offsets = [0, 0], sizes = [8, 128], strides = [1, 1]} : vector<8x384xf32> to vector<8x128xf32>
    %24 = arith.addf %22, %23 : vector<8x128xf32>
    %25 = arith.negf %24 : vector<8x128xf32>
    %26 = math.exp %25 : vector<8x128xf32>
    %cst_23 = arith.constant 1.000000e+00 : f32
    %27 = vector.broadcast %cst_23 : f32 to vector<8x128xf32>
    %28 = arith.addf %27, %26 : vector<8x128xf32>
    %29 = arith.divf %27, %28 : vector<8x128xf32>
    %30 = vector.extract_strided_slice %20 {offsets = [0, 128], sizes = [8, 128], strides = [1, 1]} : vector<8x384xf32> to vector<8x128xf32>
    %31 = vector.extract_strided_slice %21 {offsets = [0, 128], sizes = [8, 128], strides = [1, 1]} : vector<8x384xf32> to vector<8x128xf32>
    %32 = arith.addf %30, %31 : vector<8x128xf32>
    %33 = arith.negf %32 : vector<8x128xf32>
    %34 = math.exp %33 : vector<8x128xf32>
    %cst_24 = arith.constant 1.000000e+00 : f32
    %35 = vector.broadcast %cst_24 : f32 to vector<8x128xf32>
    %36 = arith.addf %35, %34 : vector<8x128xf32>
    %37 = arith.divf %35, %36 : vector<8x128xf32>
    %38 = vector.extract_strided_slice %20 {offsets = [0, 256], sizes = [8, 128], strides = [1, 1]} : vector<8x384xf32> to vector<8x128xf32>
    %39 = vector.extract_strided_slice %21 {offsets = [0, 256], sizes = [8, 128], strides = [1, 1]} : vector<8x384xf32> to vector<8x128xf32>
    %40 = arith.addf %39, %12 : vector<8x128xf32>
    %41 = arith.mulf %29, %40 : vector<8x128xf32>
    %42 = arith.addf %38, %41 : vector<8x128xf32>
    %43 = math.tanh %42 : vector<8x128xf32>
    %cst_25 = arith.constant 1.000000e+00 : f32
    %44 = vector.broadcast %cst_25 : f32 to vector<8x128xf32>
    %45 = arith.subf %44, %37 : vector<8x128xf32>
    %46 = arith.mulf %45, %43 : vector<8x128xf32>
    %47 = arith.mulf %37, %19 : vector<8x128xf32>
    %48 = arith.addf %46, %47 : vector<8x128xf32>
    %c1_i32 = arith.constant 1 : i32
    %c8_i32 = arith.constant 8 : i32
    %49 = arith.muli %c1_i32, %c8_i32 : i32
    %50 = tpu.assume_multiple %49, 8 : i32
    %51 = arith.index_cast %50 : i32 to index
    %c0_26 = arith.constant 0 : index
    %52 = vector.load %arg10[%51, %c0_26] : memref<64x384xf32, #tpu.memory_space<vmem>>, vector<8x384xf32>
    %cst_27 = arith.constant dense<0.000000e+00> : vector<8x384xf32>
    %53 = tpu.matmul %48, %7, %cst_27 {dimension_numbers = #tpu.dot_dimension_numbers<[1], [0], [0], [1], [0, 0, 1, 1], [], []>} : vector<8x128xf32>, vector<128x384xf32>, vector<8x384xf32> -> vector<8x384xf32>
    %54 = vector.extract_strided_slice %52 {offsets = [0, 0], sizes = [8, 128], strides = [1, 1]} : vector<8x384xf32> to vector<8x128xf32>
    %55 = vector.extract_strided_slice %53 {offsets = [0, 0], sizes = [8, 128], strides = [1, 1]} : vector<8x384xf32> to vector<8x128xf32>
    %56 = arith.addf %54, %55 : vector<8x128xf32>
    %57 = arith.negf %56 : vector<8x128xf32>
    %58 = math.exp %57 : vector<8x128xf32>
    %cst_28 = arith.constant 1.000000e+00 : f32
    %59 = vector.broadcast %cst_28 : f32 to vector<8x128xf32>
    %60 = arith.addf %59, %58 : vector<8x128xf32>
    %61 = arith.divf %59, %60 : vector<8x128xf32>
    %62 = vector.extract_strided_slice %52 {offsets = [0, 128], sizes = [8, 128], strides = [1, 1]} : vector<8x384xf32> to vector<8x128xf32>
    %63 = vector.extract_strided_slice %53 {offsets = [0, 128], sizes = [8, 128], strides = [1, 1]} : vector<8x384xf32> to vector<8x128xf32>
    %64 = arith.addf %62, %63 : vector<8x128xf32>
    %65 = arith.negf %64 : vector<8x128xf32>
    %66 = math.exp %65 : vector<8x128xf32>
    %cst_29 = arith.constant 1.000000e+00 : f32
    %67 = vector.broadcast %cst_29 : f32 to vector<8x128xf32>
    %68 = arith.addf %67, %66 : vector<8x128xf32>
    %69 = arith.divf %67, %68 : vector<8x128xf32>
    %70 = vector.extract_strided_slice %52 {offsets = [0, 256], sizes = [8, 128], strides = [1, 1]} : vector<8x384xf32> to vector<8x128xf32>
    %71 = vector.extract_strided_slice %53 {offsets = [0, 256], sizes = [8, 128], strides = [1, 1]} : vector<8x384xf32> to vector<8x128xf32>
    %72 = arith.addf %71, %12 : vector<8x128xf32>
    %73 = arith.mulf %61, %72 : vector<8x128xf32>
    %74 = arith.addf %70, %73 : vector<8x128xf32>
    %75 = math.tanh %74 : vector<8x128xf32>
    %cst_30 = arith.constant 1.000000e+00 : f32
    %76 = vector.broadcast %cst_30 : f32 to vector<8x128xf32>
    %77 = arith.subf %76, %69 : vector<8x128xf32>
    %78 = arith.mulf %77, %75 : vector<8x128xf32>
    %79 = arith.mulf %69, %48 : vector<8x128xf32>
    %80 = arith.addf %78, %79 : vector<8x128xf32>
    %c1_i32_31 = arith.constant 1 : i32
    %81 = arith.subi %c1_i32, %c1_i32_31 : i32
    %cst_32 = arith.constant dense<0.000000e+00> : vector<8x384xf32>
    %82 = tpu.matmul %48, %9, %cst_32 {dimension_numbers = #tpu.dot_dimension_numbers<[1], [0], [0], [1], [0, 0, 1, 1], [], []>} : vector<8x128xf32>, vector<128x384xf32>, vector<8x384xf32> -> vector<8x384xf32>
    %83 = arith.addf %82, %18 : vector<8x384xf32>
    %cst_33 = arith.constant dense<0.000000e+00> : vector<8x384xf32>
    %84 = tpu.matmul %19, %8, %cst_33 {dimension_numbers = #tpu.dot_dimension_numbers<[1], [0], [0], [1], [0, 0, 1, 1], [], []>} : vector<8x128xf32>, vector<128x384xf32>, vector<8x384xf32> -> vector<8x384xf32>
    %85 = vector.extract_strided_slice %83 {offsets = [0, 0], sizes = [8, 128], strides = [1, 1]} : vector<8x384xf32> to vector<8x128xf32>
    %86 = vector.extract_strided_slice %84 {offsets = [0, 0], sizes = [8, 128], strides = [1, 1]} : vector<8x384xf32> to vector<8x128xf32>
    %87 = arith.addf %85, %86 : vector<8x128xf32>
    %88 = arith.negf %87 : vector<8x128xf32>
    %89 = math.exp %88 : vector<8x128xf32>
    %cst_34 = arith.constant 1.000000e+00 : f32
    %90 = vector.broadcast %cst_34 : f32 to vector<8x128xf32>
    %91 = arith.addf %90, %89 : vector<8x128xf32>
    %92 = arith.divf %90, %91 : vector<8x128xf32>
    %93 = vector.extract_strided_slice %83 {offsets = [0, 128], sizes = [8, 128], strides = [1, 1]} : vector<8x384xf32> to vector<8x128xf32>
    %94 = vector.extract_strided_slice %84 {offsets = [0, 128], sizes = [8, 128], strides = [1, 1]} : vector<8x384xf32> to vector<8x128xf32>
    %95 = arith.addf %93, %94 : vector<8x128xf32>
    %96 = arith.negf %95 : vector<8x128xf32>
    %97 = math.exp %96 : vector<8x128xf32>
    %cst_35 = arith.constant 1.000000e+00 : f32
    %98 = vector.broadcast %cst_35 : f32 to vector<8x128xf32>
    %99 = arith.addf %98, %97 : vector<8x128xf32>
    %100 = arith.divf %98, %99 : vector<8x128xf32>
    %101 = vector.extract_strided_slice %83 {offsets = [0, 256], sizes = [8, 128], strides = [1, 1]} : vector<8x384xf32> to vector<8x128xf32>
    %102 = vector.extract_strided_slice %84 {offsets = [0, 256], sizes = [8, 128], strides = [1, 1]} : vector<8x384xf32> to vector<8x128xf32>
    %103 = arith.addf %102, %15 : vector<8x128xf32>
    %104 = arith.mulf %92, %103 : vector<8x128xf32>
    %105 = arith.addf %101, %104 : vector<8x128xf32>
    %106 = math.tanh %105 : vector<8x128xf32>
    %cst_36 = arith.constant 1.000000e+00 : f32
    %107 = vector.broadcast %cst_36 : f32 to vector<8x128xf32>
    %108 = arith.subf %107, %100 : vector<8x128xf32>
    %109 = arith.mulf %108, %106 : vector<8x128xf32>
    %110 = arith.mulf %100, %19 : vector<8x128xf32>
    %111 = arith.addf %109, %110 : vector<8x128xf32>
    %c8_i32_37 = arith.constant 8 : i32
    %112 = arith.muli %81, %c8_i32_37 : i32
    %113 = tpu.assume_multiple %112, 8 : i32
    %114 = arith.index_cast %113 : i32 to index
    %c0_38 = arith.constant 0 : index
    %115 = vector.load %arg9[%114, %c0_38] : memref<64x128xf32, #tpu.memory_space<vmem>>, vector<8x128xf32>
    tpu.vector_store %arg9[%114, %c0_38], %111 {strides = array<i32>} : memref<64x128xf32, #tpu.memory_space<vmem>>, vector<8x128xf32>,
    %c2_i32 = arith.constant 2 : i32
    %c8_i32_39 = arith.constant 8 : i32
    %116 = arith.muli %c2_i32, %c8_i32_39 : i32
    %117 = tpu.assume_multiple %116, 8 : i32
    %118 = arith.index_cast %117 : i32 to index
    %c0_40 = arith.constant 0 : index
    %119 = vector.load %arg10[%118, %c0_40] : memref<64x384xf32, #tpu.memory_space<vmem>>, vector<8x384xf32>
    %cst_41 = arith.constant dense<0.000000e+00> : vector<8x384xf32>
    %120 = tpu.matmul %80, %7, %cst_41 {dimension_numbers = #tpu.dot_dimension_numbers<[1], [0], [0], [1], [0, 0, 1, 1], [], []>} : vector<8x128xf32>, vector<128x384xf32>, vector<8x384xf32> -> vector<8x384xf32>
    %121 = vector.extract_strided_slice %119 {offsets = [0, 0], sizes = [8, 128], strides = [1, 1]} : vector<8x384xf32> to vector<8x128xf32>
    %122 = vector.extract_strided_slice %120 {offsets = [0, 0], sizes = [8, 128], strides = [1, 1]} : vector<8x384xf32> to vector<8x128xf32>
    %123 = arith.addf %121, %122 : vector<8x128xf32>
    %124 = arith.negf %123 : vector<8x128xf32>
    %125 = math.exp %124 : vector<8x128xf32>
    %cst_42 = arith.constant 1.000000e+00 : f32
    %126 = vector.broadcast %cst_42 : f32 to vector<8x128xf32>
    %127 = arith.addf %126, %125 : vector<8x128xf32>
    %128 = arith.divf %126, %127 : vector<8x128xf32>
    %129 = vector.extract_strided_slice %119 {offsets = [0, 128], sizes = [8, 128], strides = [1, 1]} : vector<8x384xf32> to vector<8x128xf32>
    %130 = vector.extract_strided_slice %120 {offsets = [0, 128], sizes = [8, 128], strides = [1, 1]} : vector<8x384xf32> to vector<8x128xf32>
    %131 = arith.addf %129, %130 : vector<8x128xf32>
    %132 = arith.negf %131 : vector<8x128xf32>
    %133 = math.exp %132 : vector<8x128xf32>
    %cst_43 = arith.constant 1.000000e+00 : f32
    %134 = vector.broadcast %cst_43 : f32 to vector<8x128xf32>
    %135 = arith.addf %134, %133 : vector<8x128xf32>
    %136 = arith.divf %134, %135 : vector<8x128xf32>
    %137 = vector.extract_strided_slice %119 {offsets = [0, 256], sizes = [8, 128], strides = [1, 1]} : vector<8x384xf32> to vector<8x128xf32>
    %138 = vector.extract_strided_slice %120 {offsets = [0, 256], sizes = [8, 128], strides = [1, 1]} : vector<8x384xf32> to vector<8x128xf32>
    %139 = arith.addf %138, %12 : vector<8x128xf32>
    %140 = arith.mulf %128, %139 : vector<8x128xf32>
    %141 = arith.addf %137, %140 : vector<8x128xf32>
    %142 = math.tanh %141 : vector<8x128xf32>
    %cst_44 = arith.constant 1.000000e+00 : f32
    %143 = vector.broadcast %cst_44 : f32 to vector<8x128xf32>
    %144 = arith.subf %143, %136 : vector<8x128xf32>
    %145 = arith.mulf %144, %142 : vector<8x128xf32>
    %146 = arith.mulf %136, %80 : vector<8x128xf32>
    %147 = arith.addf %145, %146 : vector<8x128xf32>
    %c1_i32_45 = arith.constant 1 : i32
    %148 = arith.subi %c2_i32, %c1_i32_45 : i32
    %cst_46 = arith.constant dense<0.000000e+00> : vector<8x384xf32>
    %149 = tpu.matmul %80, %9, %cst_46 {dimension_numbers = #tpu.dot_dimension_numbers<[1], [0], [0], [1], [0, 0, 1, 1], [], []>} : vector<8x128xf32>, vector<128x384xf32>, vector<8x384xf32> -> vector<8x384xf32>
    %150 = arith.addf %149, %18 : vector<8x384xf32>
    %cst_47 = arith.constant dense<0.000000e+00> : vector<8x384xf32>
    %151 = tpu.matmul %111, %8, %cst_47 {dimension_numbers = #tpu.dot_dimension_numbers<[1], [0], [0], [1], [0, 0, 1, 1], [], []>} : vector<8x128xf32>, vector<128x384xf32>, vector<8x384xf32> -> vector<8x384xf32>
    %152 = vector.extract_strided_slice %150 {offsets = [0, 0], sizes = [8, 128], strides = [1, 1]} : vector<8x384xf32> to vector<8x128xf32>
    %153 = vector.extract_strided_slice %151 {offsets = [0, 0], sizes = [8, 128], strides = [1, 1]} : vector<8x384xf32> to vector<8x128xf32>
    %154 = arith.addf %152, %153 : vector<8x128xf32>
    %155 = arith.negf %154 : vector<8x128xf32>
    %156 = math.exp %155 : vector<8x128xf32>
    %cst_48 = arith.constant 1.000000e+00 : f32
    %157 = vector.broadcast %cst_48 : f32 to vector<8x128xf32>
    %158 = arith.addf %157, %156 : vector<8x128xf32>
    %159 = arith.divf %157, %158 : vector<8x128xf32>
    %160 = vector.extract_strided_slice %150 {offsets = [0, 128], sizes = [8, 128], strides = [1, 1]} : vector<8x384xf32> to vector<8x128xf32>
    %161 = vector.extract_strided_slice %151 {offsets = [0, 128], sizes = [8, 128], strides = [1, 1]} : vector<8x384xf32> to vector<8x128xf32>
    %162 = arith.addf %160, %161 : vector<8x128xf32>
    %163 = arith.negf %162 : vector<8x128xf32>
    %164 = math.exp %163 : vector<8x128xf32>
    %cst_49 = arith.constant 1.000000e+00 : f32
    %165 = vector.broadcast %cst_49 : f32 to vector<8x128xf32>
    %166 = arith.addf %165, %164 : vector<8x128xf32>
    %167 = arith.divf %165, %166 : vector<8x128xf32>
    %168 = vector.extract_strided_slice %150 {offsets = [0, 256], sizes = [8, 128], strides = [1, 1]} : vector<8x384xf32> to vector<8x128xf32>
    %169 = vector.extract_strided_slice %151 {offsets = [0, 256], sizes = [8, 128], strides = [1, 1]} : vector<8x384xf32> to vector<8x128xf32>
    %170 = arith.addf %169, %15 : vector<8x128xf32>
    %171 = arith.mulf %159, %170 : vector<8x128xf32>
    %172 = arith.addf %168, %171 : vector<8x128xf32>
    %173 = math.tanh %172 : vector<8x128xf32>
    %cst_50 = arith.constant 1.000000e+00 : f32
    %174 = vector.broadcast %cst_50 : f32 to vector<8x128xf32>
    %175 = arith.subf %174, %167 : vector<8x128xf32>
    %176 = arith.mulf %175, %173 : vector<8x128xf32>
    %177 = arith.mulf %167, %111 : vector<8x128xf32>
    %178 = arith.addf %176, %177 : vector<8x128xf32>
    %c8_i32_51 = arith.constant 8 : i32
    %179 = arith.muli %148, %c8_i32_51 : i32
    %180 = tpu.assume_multiple %179, 8 : i32
    %181 = arith.index_cast %180 : i32 to index
    %c0_52 = arith.constant 0 : index
    %182 = vector.load %arg9[%181, %c0_52] : memref<64x128xf32, #tpu.memory_space<vmem>>, vector<8x128xf32>
    tpu.vector_store %arg9[%181, %c0_52], %178 {strides = array<i32>} : memref<64x128xf32, #tpu.memory_space<vmem>>, vector<8x128xf32>,
    %c3_i32 = arith.constant 3 : i32
    %c8_i32_53 = arith.constant 8 : i32
    %183 = arith.muli %c3_i32, %c8_i32_53 : i32
    %184 = tpu.assume_multiple %183, 8 : i32
    %185 = arith.index_cast %184 : i32 to index
    %c0_54 = arith.constant 0 : index
    %186 = vector.load %arg10[%185, %c0_54] : memref<64x384xf32, #tpu.memory_space<vmem>>, vector<8x384xf32>
    %cst_55 = arith.constant dense<0.000000e+00> : vector<8x384xf32>
    %187 = tpu.matmul %147, %7, %cst_55 {dimension_numbers = #tpu.dot_dimension_numbers<[1], [0], [0], [1], [0, 0, 1, 1], [], []>} : vector<8x128xf32>, vector<128x384xf32>, vector<8x384xf32> -> vector<8x384xf32>
    %188 = vector.extract_strided_slice %186 {offsets = [0, 0], sizes = [8, 128], strides = [1, 1]} : vector<8x384xf32> to vector<8x128xf32>
    %189 = vector.extract_strided_slice %187 {offsets = [0, 0], sizes = [8, 128], strides = [1, 1]} : vector<8x384xf32> to vector<8x128xf32>
    %190 = arith.addf %188, %189 : vector<8x128xf32>
    %191 = arith.negf %190 : vector<8x128xf32>
    %192 = math.exp %191 : vector<8x128xf32>
    %cst_56 = arith.constant 1.000000e+00 : f32
    %193 = vector.broadcast %cst_56 : f32 to vector<8x128xf32>
    %194 = arith.addf %193, %192 : vector<8x128xf32>
    %195 = arith.divf %193, %194 : vector<8x128xf32>
    %196 = vector.extract_strided_slice %186 {offsets = [0, 128], sizes = [8, 128], strides = [1, 1]} : vector<8x384xf32> to vector<8x128xf32>
    %197 = vector.extract_strided_slice %187 {offsets = [0, 128], sizes = [8, 128], strides = [1, 1]} : vector<8x384xf32> to vector<8x128xf32>
    %198 = arith.addf %196, %197 : vector<8x128xf32>
    %199 = arith.negf %198 : vector<8x128xf32>
    %200 = math.exp %199 : vector<8x128xf32>
    %cst_57 = arith.constant 1.000000e+00 : f32
    %201 = vector.broadcast %cst_57 : f32 to vector<8x128xf32>
    %202 = arith.addf %201, %200 : vector<8x128xf32>
    %203 = arith.divf %201, %202 : vector<8x128xf32>
    %204 = vector.extract_strided_slice %186 {offsets = [0, 256], sizes = [8, 128], strides = [1, 1]} : vector<8x384xf32> to vector<8x128xf32>
    %205 = vector.extract_strided_slice %187 {offsets = [0, 256], sizes = [8, 128], strides = [1, 1]} : vector<8x384xf32> to vector<8x128xf32>
    %206 = arith.addf %205, %12 : vector<8x128xf32>
    %207 = arith.mulf %195, %206 : vector<8x128xf32>
    %208 = arith.addf %204, %207 : vector<8x128xf32>
    %209 = math.tanh %208 : vector<8x128xf32>
    %cst_58 = arith.constant 1.000000e+00 : f32
    %210 = vector.broadcast %cst_58 : f32 to vector<8x128xf32>
    %211 = arith.subf %210, %203 : vector<8x128xf32>
    %212 = arith.mulf %211, %209 : vector<8x128xf32>
    %213 = arith.mulf %203, %147 : vector<8x128xf32>
    %214 = arith.addf %212, %213 : vector<8x128xf32>
    %c1_i32_59 = arith.constant 1 : i32
    %215 = arith.subi %c3_i32, %c1_i32_59 : i32
    %cst_60 = arith.constant dense<0.000000e+00> : vector<8x384xf32>
    %216 = tpu.matmul %147, %9, %cst_60 {dimension_numbers = #tpu.dot_dimension_numbers<[1], [0], [0], [1], [0, 0, 1, 1], [], []>} : vector<8x128xf32>, vector<128x384xf32>, vector<8x384xf32> -> vector<8x384xf32>
    %217 = arith.addf %216, %18 : vector<8x384xf32>
    %cst_61 = arith.constant dense<0.000000e+00> : vector<8x384xf32>
    %218 = tpu.matmul %178, %8, %cst_61 {dimension_numbers = #tpu.dot_dimension_numbers<[1], [0], [0], [1], [0, 0, 1, 1], [], []>} : vector<8x128xf32>, vector<128x384xf32>, vector<8x384xf32> -> vector<8x384xf32>
    %219 = vector.extract_strided_slice %217 {offsets = [0, 0], sizes = [8, 128], strides = [1, 1]} : vector<8x384xf32> to vector<8x128xf32>
    %220 = vector.extract_strided_slice %218 {offsets = [0, 0], sizes = [8, 128], strides = [1, 1]} : vector<8x384xf32> to vector<8x128xf32>
    %221 = arith.addf %219, %220 : vector<8x128xf32>
    %222 = arith.negf %221 : vector<8x128xf32>
    %223 = math.exp %222 : vector<8x128xf32>
    %cst_62 = arith.constant 1.000000e+00 : f32
    %224 = vector.broadcast %cst_62 : f32 to vector<8x128xf32>
    %225 = arith.addf %224, %223 : vector<8x128xf32>
    %226 = arith.divf %224, %225 : vector<8x128xf32>
    %227 = vector.extract_strided_slice %217 {offsets = [0, 128], sizes = [8, 128], strides = [1, 1]} : vector<8x384xf32> to vector<8x128xf32>
    %228 = vector.extract_strided_slice %218 {offsets = [0, 128], sizes = [8, 128], strides = [1, 1]} : vector<8x384xf32> to vector<8x128xf32>
    %229 = arith.addf %227, %228 : vector<8x128xf32>
    %230 = arith.negf %229 : vector<8x128xf32>
    %231 = math.exp %230 : vector<8x128xf32>
    %cst_63 = arith.constant 1.000000e+00 : f32
    %232 = vector.broadcast %cst_63 : f32 to vector<8x128xf32>
    %233 = arith.addf %232, %231 : vector<8x128xf32>
    %234 = arith.divf %232, %233 : vector<8x128xf32>
    %235 = vector.extract_strided_slice %217 {offsets = [0, 256], sizes = [8, 128], strides = [1, 1]} : vector<8x384xf32> to vector<8x128xf32>
    %236 = vector.extract_strided_slice %218 {offsets = [0, 256], sizes = [8, 128], strides = [1, 1]} : vector<8x384xf32> to vector<8x128xf32>
    %237 = arith.addf %236, %15 : vector<8x128xf32>
    %238 = arith.mulf %226, %237 : vector<8x128xf32>
    %239 = arith.addf %235, %238 : vector<8x128xf32>
    %240 = math.tanh %239 : vector<8x128xf32>
    %cst_64 = arith.constant 1.000000e+00 : f32
    %241 = vector.broadcast %cst_64 : f32 to vector<8x128xf32>
    %242 = arith.subf %241, %234 : vector<8x128xf32>
    %243 = arith.mulf %242, %240 : vector<8x128xf32>
    %244 = arith.mulf %234, %178 : vector<8x128xf32>
    %245 = arith.addf %243, %244 : vector<8x128xf32>
    %c8_i32_65 = arith.constant 8 : i32
    %246 = arith.muli %215, %c8_i32_65 : i32
    %247 = tpu.assume_multiple %246, 8 : i32
    %248 = arith.index_cast %247 : i32 to index
    %c0_66 = arith.constant 0 : index
    %249 = vector.load %arg9[%248, %c0_66] : memref<64x128xf32, #tpu.memory_space<vmem>>, vector<8x128xf32>
    tpu.vector_store %arg9[%248, %c0_66], %245 {strides = array<i32>} : memref<64x128xf32, #tpu.memory_space<vmem>>, vector<8x128xf32>,
    %c4_i32 = arith.constant 4 : i32
    %c8_i32_67 = arith.constant 8 : i32
    %250 = arith.muli %c4_i32, %c8_i32_67 : i32
    %251 = tpu.assume_multiple %250, 8 : i32
    %252 = arith.index_cast %251 : i32 to index
    %c0_68 = arith.constant 0 : index
    %253 = vector.load %arg10[%252, %c0_68] : memref<64x384xf32, #tpu.memory_space<vmem>>, vector<8x384xf32>
    %cst_69 = arith.constant dense<0.000000e+00> : vector<8x384xf32>
    %254 = tpu.matmul %214, %7, %cst_69 {dimension_numbers = #tpu.dot_dimension_numbers<[1], [0], [0], [1], [0, 0, 1, 1], [], []>} : vector<8x128xf32>, vector<128x384xf32>, vector<8x384xf32> -> vector<8x384xf32>
    %255 = vector.extract_strided_slice %253 {offsets = [0, 0], sizes = [8, 128], strides = [1, 1]} : vector<8x384xf32> to vector<8x128xf32>
    %256 = vector.extract_strided_slice %254 {offsets = [0, 0], sizes = [8, 128], strides = [1, 1]} : vector<8x384xf32> to vector<8x128xf32>
    %257 = arith.addf %255, %256 : vector<8x128xf32>
    %258 = arith.negf %257 : vector<8x128xf32>
    %259 = math.exp %258 : vector<8x128xf32>
    %cst_70 = arith.constant 1.000000e+00 : f32
    %260 = vector.broadcast %cst_70 : f32 to vector<8x128xf32>
    %261 = arith.addf %260, %259 : vector<8x128xf32>
    %262 = arith.divf %260, %261 : vector<8x128xf32>
    %263 = vector.extract_strided_slice %253 {offsets = [0, 128], sizes = [8, 128], strides = [1, 1]} : vector<8x384xf32> to vector<8x128xf32>
    %264 = vector.extract_strided_slice %254 {offsets = [0, 128], sizes = [8, 128], strides = [1, 1]} : vector<8x384xf32> to vector<8x128xf32>
    %265 = arith.addf %263, %264 : vector<8x128xf32>
    %266 = arith.negf %265 : vector<8x128xf32>
    %267 = math.exp %266 : vector<8x128xf32>
    %cst_71 = arith.constant 1.000000e+00 : f32
    %268 = vector.broadcast %cst_71 : f32 to vector<8x128xf32>
    %269 = arith.addf %268, %267 : vector<8x128xf32>
    %270 = arith.divf %268, %269 : vector<8x128xf32>
    %271 = vector.extract_strided_slice %253 {offsets = [0, 256], sizes = [8, 128], strides = [1, 1]} : vector<8x384xf32> to vector<8x128xf32>
    %272 = vector.extract_strided_slice %254 {offsets = [0, 256], sizes = [8, 128], strides = [1, 1]} : vector<8x384xf32> to vector<8x128xf32>
    %273 = arith.addf %272, %12 : vector<8x128xf32>
    %274 = arith.mulf %262, %273 : vector<8x128xf32>
    %275 = arith.addf %271, %274 : vector<8x128xf32>
    %276 = math.tanh %275 : vector<8x128xf32>
    %cst_72 = arith.constant 1.000000e+00 : f32
    %277 = vector.broadcast %cst_72 : f32 to vector<8x128xf32>
    %278 = arith.subf %277, %270 : vector<8x128xf32>
    %279 = arith.mulf %278, %276 : vector<8x128xf32>
    %280 = arith.mulf %270, %214 : vector<8x128xf32>
    %281 = arith.addf %279, %280 : vector<8x128xf32>
    %c1_i32_73 = arith.constant 1 : i32
    %282 = arith.subi %c4_i32, %c1_i32_73 : i32
    %cst_74 = arith.constant dense<0.000000e+00> : vector<8x384xf32>
    %283 = tpu.matmul %214, %9, %cst_74 {dimension_numbers = #tpu.dot_dimension_numbers<[1], [0], [0], [1], [0, 0, 1, 1], [], []>} : vector<8x128xf32>, vector<128x384xf32>, vector<8x384xf32> -> vector<8x384xf32>
    %284 = arith.addf %283, %18 : vector<8x384xf32>
    %cst_75 = arith.constant dense<0.000000e+00> : vector<8x384xf32>
    %285 = tpu.matmul %245, %8, %cst_75 {dimension_numbers = #tpu.dot_dimension_numbers<[1], [0], [0], [1], [0, 0, 1, 1], [], []>} : vector<8x128xf32>, vector<128x384xf32>, vector<8x384xf32> -> vector<8x384xf32>
    %286 = vector.extract_strided_slice %284 {offsets = [0, 0], sizes = [8, 128], strides = [1, 1]} : vector<8x384xf32> to vector<8x128xf32>
    %287 = vector.extract_strided_slice %285 {offsets = [0, 0], sizes = [8, 128], strides = [1, 1]} : vector<8x384xf32> to vector<8x128xf32>
    %288 = arith.addf %286, %287 : vector<8x128xf32>
    %289 = arith.negf %288 : vector<8x128xf32>
    %290 = math.exp %289 : vector<8x128xf32>
    %cst_76 = arith.constant 1.000000e+00 : f32
    %291 = vector.broadcast %cst_76 : f32 to vector<8x128xf32>
    %292 = arith.addf %291, %290 : vector<8x128xf32>
    %293 = arith.divf %291, %292 : vector<8x128xf32>
    %294 = vector.extract_strided_slice %284 {offsets = [0, 128], sizes = [8, 128], strides = [1, 1]} : vector<8x384xf32> to vector<8x128xf32>
    %295 = vector.extract_strided_slice %285 {offsets = [0, 128], sizes = [8, 128], strides = [1, 1]} : vector<8x384xf32> to vector<8x128xf32>
    %296 = arith.addf %294, %295 : vector<8x128xf32>
    %297 = arith.negf %296 : vector<8x128xf32>
    %298 = math.exp %297 : vector<8x128xf32>
    %cst_77 = arith.constant 1.000000e+00 : f32
    %299 = vector.broadcast %cst_77 : f32 to vector<8x128xf32>
    %300 = arith.addf %299, %298 : vector<8x128xf32>
    %301 = arith.divf %299, %300 : vector<8x128xf32>
    %302 = vector.extract_strided_slice %284 {offsets = [0, 256], sizes = [8, 128], strides = [1, 1]} : vector<8x384xf32> to vector<8x128xf32>
    %303 = vector.extract_strided_slice %285 {offsets = [0, 256], sizes = [8, 128], strides = [1, 1]} : vector<8x384xf32> to vector<8x128xf32>
    %304 = arith.addf %303, %15 : vector<8x128xf32>
    %305 = arith.mulf %293, %304 : vector<8x128xf32>
    %306 = arith.addf %302, %305 : vector<8x128xf32>
    %307 = math.tanh %306 : vector<8x128xf32>
    %cst_78 = arith.constant 1.000000e+00 : f32
    %308 = vector.broadcast %cst_78 : f32 to vector<8x128xf32>
    %309 = arith.subf %308, %301 : vector<8x128xf32>
    %310 = arith.mulf %309, %307 : vector<8x128xf32>
    %311 = arith.mulf %301, %245 : vector<8x128xf32>
    %312 = arith.addf %310, %311 : vector<8x128xf32>
    %c8_i32_79 = arith.constant 8 : i32
    %313 = arith.muli %282, %c8_i32_79 : i32
    %314 = tpu.assume_multiple %313, 8 : i32
    %315 = arith.index_cast %314 : i32 to index
    %c0_80 = arith.constant 0 : index
    %316 = vector.load %arg9[%315, %c0_80] : memref<64x128xf32, #tpu.memory_space<vmem>>, vector<8x128xf32>
    tpu.vector_store %arg9[%315, %c0_80], %312 {strides = array<i32>} : memref<64x128xf32, #tpu.memory_space<vmem>>, vector<8x128xf32>,
    %c5_i32 = arith.constant 5 : i32
    %c8_i32_81 = arith.constant 8 : i32
    %317 = arith.muli %c5_i32, %c8_i32_81 : i32
    %318 = tpu.assume_multiple %317, 8 : i32
    %319 = arith.index_cast %318 : i32 to index
    %c0_82 = arith.constant 0 : index
    %320 = vector.load %arg10[%319, %c0_82] : memref<64x384xf32, #tpu.memory_space<vmem>>, vector<8x384xf32>
    %cst_83 = arith.constant dense<0.000000e+00> : vector<8x384xf32>
    %321 = tpu.matmul %281, %7, %cst_83 {dimension_numbers = #tpu.dot_dimension_numbers<[1], [0], [0], [1], [0, 0, 1, 1], [], []>} : vector<8x128xf32>, vector<128x384xf32>, vector<8x384xf32> -> vector<8x384xf32>
    %322 = vector.extract_strided_slice %320 {offsets = [0, 0], sizes = [8, 128], strides = [1, 1]} : vector<8x384xf32> to vector<8x128xf32>
    %323 = vector.extract_strided_slice %321 {offsets = [0, 0], sizes = [8, 128], strides = [1, 1]} : vector<8x384xf32> to vector<8x128xf32>
    %324 = arith.addf %322, %323 : vector<8x128xf32>
    %325 = arith.negf %324 : vector<8x128xf32>
    %326 = math.exp %325 : vector<8x128xf32>
    %cst_84 = arith.constant 1.000000e+00 : f32
    %327 = vector.broadcast %cst_84 : f32 to vector<8x128xf32>
    %328 = arith.addf %327, %326 : vector<8x128xf32>
    %329 = arith.divf %327, %328 : vector<8x128xf32>
    %330 = vector.extract_strided_slice %320 {offsets = [0, 128], sizes = [8, 128], strides = [1, 1]} : vector<8x384xf32> to vector<8x128xf32>
    %331 = vector.extract_strided_slice %321 {offsets = [0, 128], sizes = [8, 128], strides = [1, 1]} : vector<8x384xf32> to vector<8x128xf32>
    %332 = arith.addf %330, %331 : vector<8x128xf32>
    %333 = arith.negf %332 : vector<8x128xf32>
    %334 = math.exp %333 : vector<8x128xf32>
    %cst_85 = arith.constant 1.000000e+00 : f32
    %335 = vector.broadcast %cst_85 : f32 to vector<8x128xf32>
    %336 = arith.addf %335, %334 : vector<8x128xf32>
    %337 = arith.divf %335, %336 : vector<8x128xf32>
    %338 = vector.extract_strided_slice %320 {offsets = [0, 256], sizes = [8, 128], strides = [1, 1]} : vector<8x384xf32> to vector<8x128xf32>
    %339 = vector.extract_strided_slice %321 {offsets = [0, 256], sizes = [8, 128], strides = [1, 1]} : vector<8x384xf32> to vector<8x128xf32>
    %340 = arith.addf %339, %12 : vector<8x128xf32>
    %341 = arith.mulf %329, %340 : vector<8x128xf32>
    %342 = arith.addf %338, %341 : vector<8x128xf32>
    %343 = math.tanh %342 : vector<8x128xf32>
    %cst_86 = arith.constant 1.000000e+00 : f32
    %344 = vector.broadcast %cst_86 : f32 to vector<8x128xf32>
    %345 = arith.subf %344, %337 : vector<8x128xf32>
    %346 = arith.mulf %345, %343 : vector<8x128xf32>
    %347 = arith.mulf %337, %281 : vector<8x128xf32>
    %348 = arith.addf %346, %347 : vector<8x128xf32>
    %c1_i32_87 = arith.constant 1 : i32
    %349 = arith.subi %c5_i32, %c1_i32_87 : i32
    %cst_88 = arith.constant dense<0.000000e+00> : vector<8x384xf32>
    %350 = tpu.matmul %281, %9, %cst_88 {dimension_numbers = #tpu.dot_dimension_numbers<[1], [0], [0], [1], [0, 0, 1, 1], [], []>} : vector<8x128xf32>, vector<128x384xf32>, vector<8x384xf32> -> vector<8x384xf32>
    %351 = arith.addf %350, %18 : vector<8x384xf32>
    %cst_89 = arith.constant dense<0.000000e+00> : vector<8x384xf32>
    %352 = tpu.matmul %312, %8, %cst_89 {dimension_numbers = #tpu.dot_dimension_numbers<[1], [0], [0], [1], [0, 0, 1, 1], [], []>} : vector<8x128xf32>, vector<128x384xf32>, vector<8x384xf32> -> vector<8x384xf32>
    %353 = vector.extract_strided_slice %351 {offsets = [0, 0], sizes = [8, 128], strides = [1, 1]} : vector<8x384xf32> to vector<8x128xf32>
    %354 = vector.extract_strided_slice %352 {offsets = [0, 0], sizes = [8, 128], strides = [1, 1]} : vector<8x384xf32> to vector<8x128xf32>
    %355 = arith.addf %353, %354 : vector<8x128xf32>
    %356 = arith.negf %355 : vector<8x128xf32>
    %357 = math.exp %356 : vector<8x128xf32>
    %cst_90 = arith.constant 1.000000e+00 : f32
    %358 = vector.broadcast %cst_90 : f32 to vector<8x128xf32>
    %359 = arith.addf %358, %357 : vector<8x128xf32>
    %360 = arith.divf %358, %359 : vector<8x128xf32>
    %361 = vector.extract_strided_slice %351 {offsets = [0, 128], sizes = [8, 128], strides = [1, 1]} : vector<8x384xf32> to vector<8x128xf32>
    %362 = vector.extract_strided_slice %352 {offsets = [0, 128], sizes = [8, 128], strides = [1, 1]} : vector<8x384xf32> to vector<8x128xf32>
    %363 = arith.addf %361, %362 : vector<8x128xf32>
    %364 = arith.negf %363 : vector<8x128xf32>
    %365 = math.exp %364 : vector<8x128xf32>
    %cst_91 = arith.constant 1.000000e+00 : f32
    %366 = vector.broadcast %cst_91 : f32 to vector<8x128xf32>
    %367 = arith.addf %366, %365 : vector<8x128xf32>
    %368 = arith.divf %366, %367 : vector<8x128xf32>
    %369 = vector.extract_strided_slice %351 {offsets = [0, 256], sizes = [8, 128], strides = [1, 1]} : vector<8x384xf32> to vector<8x128xf32>
    %370 = vector.extract_strided_slice %352 {offsets = [0, 256], sizes = [8, 128], strides = [1, 1]} : vector<8x384xf32> to vector<8x128xf32>
    %371 = arith.addf %370, %15 : vector<8x128xf32>
    %372 = arith.mulf %360, %371 : vector<8x128xf32>
    %373 = arith.addf %369, %372 : vector<8x128xf32>
    %374 = math.tanh %373 : vector<8x128xf32>
    %cst_92 = arith.constant 1.000000e+00 : f32
    %375 = vector.broadcast %cst_92 : f32 to vector<8x128xf32>
    %376 = arith.subf %375, %368 : vector<8x128xf32>
    %377 = arith.mulf %376, %374 : vector<8x128xf32>
    %378 = arith.mulf %368, %312 : vector<8x128xf32>
    %379 = arith.addf %377, %378 : vector<8x128xf32>
    %c8_i32_93 = arith.constant 8 : i32
    %380 = arith.muli %349, %c8_i32_93 : i32
    %381 = tpu.assume_multiple %380, 8 : i32
    %382 = arith.index_cast %381 : i32 to index
    %c0_94 = arith.constant 0 : index
    %383 = vector.load %arg9[%382, %c0_94] : memref<64x128xf32, #tpu.memory_space<vmem>>, vector<8x128xf32>
    tpu.vector_store %arg9[%382, %c0_94], %379 {strides = array<i32>} : memref<64x128xf32, #tpu.memory_space<vmem>>, vector<8x128xf32>,
    %c6_i32 = arith.constant 6 : i32
    %c8_i32_95 = arith.constant 8 : i32
    %384 = arith.muli %c6_i32, %c8_i32_95 : i32
    %385 = tpu.assume_multiple %384, 8 : i32
    %386 = arith.index_cast %385 : i32 to index
    %c0_96 = arith.constant 0 : index
    %387 = vector.load %arg10[%386, %c0_96] : memref<64x384xf32, #tpu.memory_space<vmem>>, vector<8x384xf32>
    %cst_97 = arith.constant dense<0.000000e+00> : vector<8x384xf32>
    %388 = tpu.matmul %348, %7, %cst_97 {dimension_numbers = #tpu.dot_dimension_numbers<[1], [0], [0], [1], [0, 0, 1, 1], [], []>} : vector<8x128xf32>, vector<128x384xf32>, vector<8x384xf32> -> vector<8x384xf32>
    %389 = vector.extract_strided_slice %387 {offsets = [0, 0], sizes = [8, 128], strides = [1, 1]} : vector<8x384xf32> to vector<8x128xf32>
    %390 = vector.extract_strided_slice %388 {offsets = [0, 0], sizes = [8, 128], strides = [1, 1]} : vector<8x384xf32> to vector<8x128xf32>
    %391 = arith.addf %389, %390 : vector<8x128xf32>
    %392 = arith.negf %391 : vector<8x128xf32>
    %393 = math.exp %392 : vector<8x128xf32>
    %cst_98 = arith.constant 1.000000e+00 : f32
    %394 = vector.broadcast %cst_98 : f32 to vector<8x128xf32>
    %395 = arith.addf %394, %393 : vector<8x128xf32>
    %396 = arith.divf %394, %395 : vector<8x128xf32>
    %397 = vector.extract_strided_slice %387 {offsets = [0, 128], sizes = [8, 128], strides = [1, 1]} : vector<8x384xf32> to vector<8x128xf32>
    %398 = vector.extract_strided_slice %388 {offsets = [0, 128], sizes = [8, 128], strides = [1, 1]} : vector<8x384xf32> to vector<8x128xf32>
    %399 = arith.addf %397, %398 : vector<8x128xf32>
    %400 = arith.negf %399 : vector<8x128xf32>
    %401 = math.exp %400 : vector<8x128xf32>
    %cst_99 = arith.constant 1.000000e+00 : f32
    %402 = vector.broadcast %cst_99 : f32 to vector<8x128xf32>
    %403 = arith.addf %402, %401 : vector<8x128xf32>
    %404 = arith.divf %402, %403 : vector<8x128xf32>
    %405 = vector.extract_strided_slice %387 {offsets = [0, 256], sizes = [8, 128], strides = [1, 1]} : vector<8x384xf32> to vector<8x128xf32>
    %406 = vector.extract_strided_slice %388 {offsets = [0, 256], sizes = [8, 128], strides = [1, 1]} : vector<8x384xf32> to vector<8x128xf32>
    %407 = arith.addf %406, %12 : vector<8x128xf32>
    %408 = arith.mulf %396, %407 : vector<8x128xf32>
    %409 = arith.addf %405, %408 : vector<8x128xf32>
    %410 = math.tanh %409 : vector<8x128xf32>
    %cst_100 = arith.constant 1.000000e+00 : f32
    %411 = vector.broadcast %cst_100 : f32 to vector<8x128xf32>
    %412 = arith.subf %411, %404 : vector<8x128xf32>
    %413 = arith.mulf %412, %410 : vector<8x128xf32>
    %414 = arith.mulf %404, %348 : vector<8x128xf32>
    %415 = arith.addf %413, %414 : vector<8x128xf32>
    %c1_i32_101 = arith.constant 1 : i32
    %416 = arith.subi %c6_i32, %c1_i32_101 : i32
    %cst_102 = arith.constant dense<0.000000e+00> : vector<8x384xf32>
    %417 = tpu.matmul %348, %9, %cst_102 {dimension_numbers = #tpu.dot_dimension_numbers<[1], [0], [0], [1], [0, 0, 1, 1], [], []>} : vector<8x128xf32>, vector<128x384xf32>, vector<8x384xf32> -> vector<8x384xf32>
    %418 = arith.addf %417, %18 : vector<8x384xf32>
    %cst_103 = arith.constant dense<0.000000e+00> : vector<8x384xf32>
    %419 = tpu.matmul %379, %8, %cst_103 {dimension_numbers = #tpu.dot_dimension_numbers<[1], [0], [0], [1], [0, 0, 1, 1], [], []>} : vector<8x128xf32>, vector<128x384xf32>, vector<8x384xf32> -> vector<8x384xf32>
    %420 = vector.extract_strided_slice %418 {offsets = [0, 0], sizes = [8, 128], strides = [1, 1]} : vector<8x384xf32> to vector<8x128xf32>
    %421 = vector.extract_strided_slice %419 {offsets = [0, 0], sizes = [8, 128], strides = [1, 1]} : vector<8x384xf32> to vector<8x128xf32>
    %422 = arith.addf %420, %421 : vector<8x128xf32>
    %423 = arith.negf %422 : vector<8x128xf32>
    %424 = math.exp %423 : vector<8x128xf32>
    %cst_104 = arith.constant 1.000000e+00 : f32
    %425 = vector.broadcast %cst_104 : f32 to vector<8x128xf32>
    %426 = arith.addf %425, %424 : vector<8x128xf32>
    %427 = arith.divf %425, %426 : vector<8x128xf32>
    %428 = vector.extract_strided_slice %418 {offsets = [0, 128], sizes = [8, 128], strides = [1, 1]} : vector<8x384xf32> to vector<8x128xf32>
    %429 = vector.extract_strided_slice %419 {offsets = [0, 128], sizes = [8, 128], strides = [1, 1]} : vector<8x384xf32> to vector<8x128xf32>
    %430 = arith.addf %428, %429 : vector<8x128xf32>
    %431 = arith.negf %430 : vector<8x128xf32>
    %432 = math.exp %431 : vector<8x128xf32>
    %cst_105 = arith.constant 1.000000e+00 : f32
    %433 = vector.broadcast %cst_105 : f32 to vector<8x128xf32>
    %434 = arith.addf %433, %432 : vector<8x128xf32>
    %435 = arith.divf %433, %434 : vector<8x128xf32>
    %436 = vector.extract_strided_slice %418 {offsets = [0, 256], sizes = [8, 128], strides = [1, 1]} : vector<8x384xf32> to vector<8x128xf32>
    %437 = vector.extract_strided_slice %419 {offsets = [0, 256], sizes = [8, 128], strides = [1, 1]} : vector<8x384xf32> to vector<8x128xf32>
    %438 = arith.addf %437, %15 : vector<8x128xf32>
    %439 = arith.mulf %427, %438 : vector<8x128xf32>
    %440 = arith.addf %436, %439 : vector<8x128xf32>
    %441 = math.tanh %440 : vector<8x128xf32>
    %cst_106 = arith.constant 1.000000e+00 : f32
    %442 = vector.broadcast %cst_106 : f32 to vector<8x128xf32>
    %443 = arith.subf %442, %435 : vector<8x128xf32>
    %444 = arith.mulf %443, %441 : vector<8x128xf32>
    %445 = arith.mulf %435, %379 : vector<8x128xf32>
    %446 = arith.addf %444, %445 : vector<8x128xf32>
    %c8_i32_107 = arith.constant 8 : i32
    %447 = arith.muli %416, %c8_i32_107 : i32
    %448 = tpu.assume_multiple %447, 8 : i32
    %449 = arith.index_cast %448 : i32 to index
    %c0_108 = arith.constant 0 : index
    %450 = vector.load %arg9[%449, %c0_108] : memref<64x128xf32, #tpu.memory_space<vmem>>, vector<8x128xf32>
    tpu.vector_store %arg9[%449, %c0_108], %446 {strides = array<i32>} : memref<64x128xf32, #tpu.memory_space<vmem>>, vector<8x128xf32>,
    %c7_i32 = arith.constant 7 : i32
    %c8_i32_109 = arith.constant 8 : i32
    %451 = arith.muli %c7_i32, %c8_i32_109 : i32
    %452 = tpu.assume_multiple %451, 8 : i32
    %453 = arith.index_cast %452 : i32 to index
    %c0_110 = arith.constant 0 : index
    %454 = vector.load %arg10[%453, %c0_110] : memref<64x384xf32, #tpu.memory_space<vmem>>, vector<8x384xf32>
    %cst_111 = arith.constant dense<0.000000e+00> : vector<8x384xf32>
    %455 = tpu.matmul %415, %7, %cst_111 {dimension_numbers = #tpu.dot_dimension_numbers<[1], [0], [0], [1], [0, 0, 1, 1], [], []>} : vector<8x128xf32>, vector<128x384xf32>, vector<8x384xf32> -> vector<8x384xf32>
    %456 = vector.extract_strided_slice %454 {offsets = [0, 0], sizes = [8, 128], strides = [1, 1]} : vector<8x384xf32> to vector<8x128xf32>
    %457 = vector.extract_strided_slice %455 {offsets = [0, 0], sizes = [8, 128], strides = [1, 1]} : vector<8x384xf32> to vector<8x128xf32>
    %458 = arith.addf %456, %457 : vector<8x128xf32>
    %459 = arith.negf %458 : vector<8x128xf32>
    %460 = math.exp %459 : vector<8x128xf32>
    %cst_112 = arith.constant 1.000000e+00 : f32
    %461 = vector.broadcast %cst_112 : f32 to vector<8x128xf32>
    %462 = arith.addf %461, %460 : vector<8x128xf32>
    %463 = arith.divf %461, %462 : vector<8x128xf32>
    %464 = vector.extract_strided_slice %454 {offsets = [0, 128], sizes = [8, 128], strides = [1, 1]} : vector<8x384xf32> to vector<8x128xf32>
    %465 = vector.extract_strided_slice %455 {offsets = [0, 128], sizes = [8, 128], strides = [1, 1]} : vector<8x384xf32> to vector<8x128xf32>
    %466 = arith.addf %464, %465 : vector<8x128xf32>
    %467 = arith.negf %466 : vector<8x128xf32>
    %468 = math.exp %467 : vector<8x128xf32>
    %cst_113 = arith.constant 1.000000e+00 : f32
    %469 = vector.broadcast %cst_113 : f32 to vector<8x128xf32>
    %470 = arith.addf %469, %468 : vector<8x128xf32>
    %471 = arith.divf %469, %470 : vector<8x128xf32>
    %472 = vector.extract_strided_slice %454 {offsets = [0, 256], sizes = [8, 128], strides = [1, 1]} : vector<8x384xf32> to vector<8x128xf32>
    %473 = vector.extract_strided_slice %455 {offsets = [0, 256], sizes = [8, 128], strides = [1, 1]} : vector<8x384xf32> to vector<8x128xf32>
    %474 = arith.addf %473, %12 : vector<8x128xf32>
    %475 = arith.mulf %463, %474 : vector<8x128xf32>
    %476 = arith.addf %472, %475 : vector<8x128xf32>
    %477 = math.tanh %476 : vector<8x128xf32>
    %cst_114 = arith.constant 1.000000e+00 : f32
    %478 = vector.broadcast %cst_114 : f32 to vector<8x128xf32>
    %479 = arith.subf %478, %471 : vector<8x128xf32>
    %480 = arith.mulf %479, %477 : vector<8x128xf32>
    %481 = arith.mulf %471, %415 : vector<8x128xf32>
    %482 = arith.addf %480, %481 : vector<8x128xf32>
    %c1_i32_115 = arith.constant 1 : i32
    %483 = arith.subi %c7_i32, %c1_i32_115 : i32
    %cst_116 = arith.constant dense<0.000000e+00> : vector<8x384xf32>
    %484 = tpu.matmul %415, %9, %cst_116 {dimension_numbers = #tpu.dot_dimension_numbers<[1], [0], [0], [1], [0, 0, 1, 1], [], []>} : vector<8x128xf32>, vector<128x384xf32>, vector<8x384xf32> -> vector<8x384xf32>
    %485 = arith.addf %484, %18 : vector<8x384xf32>
    %cst_117 = arith.constant dense<0.000000e+00> : vector<8x384xf32>
    %486 = tpu.matmul %446, %8, %cst_117 {dimension_numbers = #tpu.dot_dimension_numbers<[1], [0], [0], [1], [0, 0, 1, 1], [], []>} : vector<8x128xf32>, vector<128x384xf32>, vector<8x384xf32> -> vector<8x384xf32>
    %487 = vector.extract_strided_slice %485 {offsets = [0, 0], sizes = [8, 128], strides = [1, 1]} : vector<8x384xf32> to vector<8x128xf32>
    %488 = vector.extract_strided_slice %486 {offsets = [0, 0], sizes = [8, 128], strides = [1, 1]} : vector<8x384xf32> to vector<8x128xf32>
    %489 = arith.addf %487, %488 : vector<8x128xf32>
    %490 = arith.negf %489 : vector<8x128xf32>
    %491 = math.exp %490 : vector<8x128xf32>
    %cst_118 = arith.constant 1.000000e+00 : f32
    %492 = vector.broadcast %cst_118 : f32 to vector<8x128xf32>
    %493 = arith.addf %492, %491 : vector<8x128xf32>
    %494 = arith.divf %492, %493 : vector<8x128xf32>
    %495 = vector.extract_strided_slice %485 {offsets = [0, 128], sizes = [8, 128], strides = [1, 1]} : vector<8x384xf32> to vector<8x128xf32>
    %496 = vector.extract_strided_slice %486 {offsets = [0, 128], sizes = [8, 128], strides = [1, 1]} : vector<8x384xf32> to vector<8x128xf32>
    %497 = arith.addf %495, %496 : vector<8x128xf32>
    %498 = arith.negf %497 : vector<8x128xf32>
    %499 = math.exp %498 : vector<8x128xf32>
    %cst_119 = arith.constant 1.000000e+00 : f32
    %500 = vector.broadcast %cst_119 : f32 to vector<8x128xf32>
    %501 = arith.addf %500, %499 : vector<8x128xf32>
    %502 = arith.divf %500, %501 : vector<8x128xf32>
    %503 = vector.extract_strided_slice %485 {offsets = [0, 256], sizes = [8, 128], strides = [1, 1]} : vector<8x384xf32> to vector<8x128xf32>
    %504 = vector.extract_strided_slice %486 {offsets = [0, 256], sizes = [8, 128], strides = [1, 1]} : vector<8x384xf32> to vector<8x128xf32>
    %505 = arith.addf %504, %15 : vector<8x128xf32>
    %506 = arith.mulf %494, %505 : vector<8x128xf32>
    %507 = arith.addf %503, %506 : vector<8x128xf32>
    %508 = math.tanh %507 : vector<8x128xf32>
    %cst_120 = arith.constant 1.000000e+00 : f32
    %509 = vector.broadcast %cst_120 : f32 to vector<8x128xf32>
    %510 = arith.subf %509, %502 : vector<8x128xf32>
    %511 = arith.mulf %510, %508 : vector<8x128xf32>
    %512 = arith.mulf %502, %446 : vector<8x128xf32>
    %513 = arith.addf %511, %512 : vector<8x128xf32>
    %c8_i32_121 = arith.constant 8 : i32
    %514 = arith.muli %483, %c8_i32_121 : i32
    %515 = tpu.assume_multiple %514, 8 : i32
    %516 = arith.index_cast %515 : i32 to index
    %c0_122 = arith.constant 0 : index
    %517 = vector.load %arg9[%516, %c0_122] : memref<64x128xf32, #tpu.memory_space<vmem>>, vector<8x128xf32>
    tpu.vector_store %arg9[%516, %c0_122], %513 {strides = array<i32>} : memref<64x128xf32, #tpu.memory_space<vmem>>, vector<8x128xf32>,
    %c7_i32_123 = arith.constant 7 : i32
    %cst_124 = arith.constant dense<0.000000e+00> : vector<8x384xf32>
    %518 = tpu.matmul %482, %9, %cst_124 {dimension_numbers = #tpu.dot_dimension_numbers<[1], [0], [0], [1], [0, 0, 1, 1], [], []>} : vector<8x128xf32>, vector<128x384xf32>, vector<8x384xf32> -> vector<8x384xf32>
    %519 = arith.addf %518, %18 : vector<8x384xf32>
    %cst_125 = arith.constant dense<0.000000e+00> : vector<8x384xf32>
    %520 = tpu.matmul %513, %8, %cst_125 {dimension_numbers = #tpu.dot_dimension_numbers<[1], [0], [0], [1], [0, 0, 1, 1], [], []>} : vector<8x128xf32>, vector<128x384xf32>, vector<8x384xf32> -> vector<8x384xf32>
    %521 = vector.extract_strided_slice %519 {offsets = [0, 0], sizes = [8, 128], strides = [1, 1]} : vector<8x384xf32> to vector<8x128xf32>
    %522 = vector.extract_strided_slice %520 {offsets = [0, 0], sizes = [8, 128], strides = [1, 1]} : vector<8x384xf32> to vector<8x128xf32>
    %523 = arith.addf %521, %522 : vector<8x128xf32>
    %524 = arith.negf %523 : vector<8x128xf32>
    %525 = math.exp %524 : vector<8x128xf32>
    %cst_126 = arith.constant 1.000000e+00 : f32
    %526 = vector.broadcast %cst_126 : f32 to vector<8x128xf32>
    %527 = arith.addf %526, %525 : vector<8x128xf32>
    %528 = arith.divf %526, %527 : vector<8x128xf32>
    %529 = vector.extract_strided_slice %519 {offsets = [0, 128], sizes = [8, 128], strides = [1, 1]} : vector<8x384xf32> to vector<8x128xf32>
    %530 = vector.extract_strided_slice %520 {offsets = [0, 128], sizes = [8, 128], strides = [1, 1]} : vector<8x384xf32> to vector<8x128xf32>
    %531 = arith.addf %529, %530 : vector<8x128xf32>
    %532 = arith.negf %531 : vector<8x128xf32>
    %533 = math.exp %532 : vector<8x128xf32>
    %cst_127 = arith.constant 1.000000e+00 : f32
    %534 = vector.broadcast %cst_127 : f32 to vector<8x128xf32>
    %535 = arith.addf %534, %533 : vector<8x128xf32>
    %536 = arith.divf %534, %535 : vector<8x128xf32>
    %537 = vector.extract_strided_slice %519 {offsets = [0, 256], sizes = [8, 128], strides = [1, 1]} : vector<8x384xf32> to vector<8x128xf32>
    %538 = vector.extract_strided_slice %520 {offsets = [0, 256], sizes = [8, 128], strides = [1, 1]} : vector<8x384xf32> to vector<8x128xf32>
    %539 = arith.addf %538, %15 : vector<8x128xf32>
    %540 = arith.mulf %528, %539 : vector<8x128xf32>
    %541 = arith.addf %537, %540 : vector<8x128xf32>
    %542 = math.tanh %541 : vector<8x128xf32>
    %cst_128 = arith.constant 1.000000e+00 : f32
    %543 = vector.broadcast %cst_128 : f32 to vector<8x128xf32>
    %544 = arith.subf %543, %536 : vector<8x128xf32>
    %545 = arith.mulf %544, %542 : vector<8x128xf32>
    %546 = arith.mulf %536, %513 : vector<8x128xf32>
    %547 = arith.addf %545, %546 : vector<8x128xf32>
    %c56 = arith.constant 56 : index
    %c0_129 = arith.constant 0 : index
    %548 = vector.load %arg9[%c56, %c0_129] : memref<64x128xf32, #tpu.memory_space<vmem>>, vector<8x128xf32>
    tpu.vector_store %arg9[%c56, %c0_129], %547 {strides = array<i32>} : memref<64x128xf32, #tpu.memory_space<vmem>>, vector<8x128xf32>,
    return
  }
}

</mosaic_0001>

<bundles_post_ra>
// kernel: temp_dae_forward.1
= control target key start
LH: loop header
LB: loop body
LE: loop exit
PB: predicated region body
PF: predicated region fallthrough
CT: control target
= control target key end

     0   :  { %14 = vsyncpa [#allocation4], 0  ;;  %s9520_s0 = inlined_call_operand.vmem [shape: f32[64,16], index: 0, kind: input, shape index: {}]   ;;  %s9521_s1 = inlined_call_operand.vmem [shape: f32[16,384], index: 1, kind: input, shape index: {}]   ;;  %s9522_s2 = inlined_call_operand.hbm [shape: f32[128,384], index: 2, kind: input, shape index: {}]   ;;  %s9523_s3 = inlined_call_operand.vmem [shape: f32[1,384], index: 3, kind: input, shape index: {}]   ;;  %s9524_s4 = inlined_call_operand.vmem [shape: f32[1,128], index: 4, kind: input, shape index: {}]   ;;  %s9525_s5 = inlined_call_operand.hbm [shape: f32[128,384], index: 5, kind: input, shape index: {}]   ;;  %s9526_s6 = inlined_call_operand.hbm [shape: f32[128,384], index: 6, kind: input, shape index: {}]   ;;  %s9527_s7 = inlined_call_operand.vmem [shape: f32[1,384], index: 7, kind: input, shape index: {}]   ;;  %s9528_s8 = inlined_call_operand.vmem [shape: f32[1,128], index: 8, kind: input, shape index: {}]   ;;  %s9529_s9 = inlined_call_operand.vmem [shape: f32[64,128], index: 9, kind: output, shape index: {}]  }
   0x1   :  { %15 = vsyncpa [#allocation6], 0  ;;  %s6353_s30 = smov [#allocation5]   ;;  %s6354_s11 = smov [#allocation3]  }
   0x2   :  { %s41_s10 = sshll.u32 %s6353_s30, 4  ;;  %s25_s12 = sshll.u32 %s6354_s11, 4  ;;  %s42_s10 = int_to_ptr.vmem [resolvable:$true] %s41_s10  ;;  %s26_s12 = int_to_ptr.vmem [resolvable:$true] %s25_s12 }
   0x3   :  { %s6297_s13 = scalar_lea.vmem %s42_s10, 6144  ;;  %p6302_p1 = scmp.lt.s32.totalorder %s42_s10, %s42_s10 }
   0x4   :  { %p6298_p0 = scmp.ne.s32.totalorder %s42_s10, %s6297_s13  ;;  %p6303_p2 = scmp.lt.s32.totalorder %s6297_s13, %s6297_s13 }
   0x6   :  { %p6304_p3 = por %p6303_p2, %p6302_p1 }
   0x8   :  { %p6305_p4 = pnand %p6304_p3, %p6298_p0 }
   0xa   :  { %6308 = shalt.err (!%p6305_p4)
}
   0xb   :  { %s6355_s14 = smov 384   ;;  %s6356_s15 = smov 24  }
   0xc   :  { %47 = dma.hbm_to_vmem [thread:$0]  %s9525_s5, 6144, %s42_s10, [#allocation6], %s6355_s14, %s6355_s14, %s6356_s15  }
   0xd   :  { %s6317_s18 = scalar_lea.vmem %s26_s12, 6144  ;;  %p6322_p6 = scmp.lt.s32.totalorder %s26_s12, %s26_s12 }
   0xe   :  { %p6318_p5 = scmp.ne.s32.totalorder %s26_s12, %s6317_s18  ;;  %p6323_p7 = scmp.lt.s32.totalorder %s6317_s18, %s6317_s18 }
  0x10   :  { %p6324_p8 = por %p6323_p7, %p6322_p6 }
  0x12   :  { %p6325_p9 = pnand %p6324_p8, %p6318_p5 }
  0x14   :  { %6328 = shalt.err (!%p6325_p9)
}
  0x15   :  { %31 = dma.hbm_to_vmem [thread:$0]  %s9522_s2, 6144, %s26_s12, [#allocation4], %s6355_s14, %s6355_s14, %s6356_s15  }
  0x16   :  { %s6357_s21 = smov [#allocation7]  }
  0x17   :  { %s53_s22 = sshll.u32 %s6357_s21, 4  ;;  %s54_s22 = int_to_ptr.vmem [resolvable:$true] %s53_s22 }
  0x18   :  { %s6337_s23 = scalar_lea.vmem %s54_s22, 6144  ;;  %p6342_p11 = scmp.lt.s32.totalorder %s54_s22, %s54_s22 }
  0x19   :  { %p6338_p10 = scmp.ne.s32.totalorder %s54_s22, %s6337_s23  ;;  %p6343_p12 = scmp.lt.s32.totalorder %s6337_s23, %s6337_s23 }
  0x1b   :  { %p6344_p13 = por %p6343_p12, %p6342_p11 }
  0x1d   :  { %p6345_p0 = pnand %p6344_p13, %p6338_p10 }
  0x1f   :  { %6348 = shalt.err (!%p6345_p0)
}
  0x20   :  { %59 = dma.hbm_to_vmem [thread:$0]  %s9526_s6, 6144, %s54_s22, [#allocation6], %s6355_s14, %s6355_s14, %s6356_s15  }
  0x21   :  { %6349 = dma.done.wait [#allocation4], 6144  }
  0x22   :  { %6350 = vsyncadd [#allocation4], 4294961152 }
  0x23   :  { %6351 = dma.done.wait [#allocation6], 12288  }
  0x24   :  { %6352 = vsyncadd [#allocation6], 4294955008  ;;  %v9533_v0 = vmov 0.0   ;;  %v85_v1 = vld [vmem:[%s9521_s1 + $0x20] sm:$0xff]  ;;  %v84_v2 = vld [vmem:[%s9521_s1 + $0x18] sm:$0xff]  ;;  %vm104_vm0 = vcmask 130048  }
  0x25   :  { %193 = vmatprep.mubr.f32.mxu0 %v9533_v0  ;;  %v82_v3 = vld [vmem:[%s9521_s1 + $0x8] sm:$0xff]  ;;  %157 = vmatprep.subr.mxu0 %v85_v1  ;;  %v81_v4 = vld [vmem:[%s9521_s1] sm:$0xff]  ;;  %v6435_v6 = vld [vmem:[#allocation3 + $0x170] sm:$0xff]  ;;  %vm6359_vm1 = vmmov 0   ;;  %v89_v1 = vlaneseq }
  0x26   :  { %v73_v5 = vld [vmem:[%s9520_s0] sm:$0xff]  ;;  %158 = vmatpush1.msra.mxu0 %v84_v2  ;;  %v6438_v7 = vld [vmem:[#allocation3 + $0x168] sm:$0xff]  ;;  %v6440_v8 = vld [vmem:[#allocation3 + $0x158] sm:$0xff] }
  0x27   :  { %4832 = vmatprep.mubr.msk.f32.mxu1 %vm104_vm0, %v73_v5  ;;  %159 = vmatprep.subr.mxu0 %v82_v3  ;;  %v6444_v9 = vld [vmem:[#allocation3 + $0x150] sm:$0xff]  ;;  %v74_v10 = vld [vmem:[%s9520_s0 + $0x8] sm:$0xff]  ;;  %v6451_v11 = vld [vmem:[#allocation3 + $0x140] sm:$0xff]  ;;  %v6737_v2 = vshrl.u32 %v89_v1, 7 }
  0x28   :  { %160 = vmatpush1.msra.mxu0 %v81_v4  ;;  %v6454_v12 = vld [vmem:[#allocation3 + $0x138] sm:$0xff]  ;;  %v6457_v13 = vld [vmem:[#allocation3 + $0x128] sm:$0xff]  ;;  %v6461_v14 = vld [vmem:[#allocation3 + $0x120] sm:$0xff] }
  0x29   :  { %4354 = vmatmul.mubr.msk.f32.vlgmr.msra.gmra.mxu0 %vm104_vm0, %v73_v5  ;;  %549 = vmatprep.subr.mxu0 %v6435_v6  ;;  %v6468_v15 = vld [vmem:[%s9520_s0 + $0x10] sm:$0xff]  ;;  %v6473_v17 = vld [vmem:[#allocation3 + $0x108] sm:$0xff]  ;;  %v6476_v18 = vld [vmem:[#allocation3 + $0xf8] sm:$0xff]  ;;  %v9532_v3 = vsub.s32 0, %v6737_v2 }
  0x2a   :  { %550 = vmatpush1.msra.mxu0 %v6438_v7  ;;  %199 = vmatprep.mubr.f32.mxu0 %v9533_v0  ;;  %v6470_v16 = vld [vmem:[#allocation3 + $0x110] sm:$0xff]  ;;  %v86_v19 = vld [vmem:[%s9521_s1 + $0x28] sm:$0xff]  ;;  %v6491_v21 = vld [vmem:[%s9520_s0 + $0x18] sm:$0xff] }
  0x2b   :  { %551 = vmatprep.subr.mxu0 %v6440_v8  ;;  %v6484_v20 = vld [vmem:[#allocation3 + $0xf0] sm:$0xff]  ;;  %v6493_v22 = vld [vmem:[#allocation3 + $0xe0] sm:$0xff]  ;;  %v6496_v23 = vld [vmem:[#allocation3 + $0xd8] sm:$0xff]  ;;  %4828 = vmatprep.subr.mxu1 %v86_v19 }
  0x2c   :  { %552 = vmatpush1.msra.mxu0 %v6444_v9  ;;  %v6499_v24 = vld [vmem:[#allocation3 + $0xc8] sm:$0xff]  ;;  %4829 = vmatpush3.msra.mxu1 %v86_v19  ;;  %v83_v25 = vld [vmem:[%s9521_s1 + $0x10] sm:$0xff]  ;;  %v6507_v26 = vld [vmem:[#allocation3 + $0xc0] sm:$0xff]  ;;  %v9530_v19 = vsub.s32 2, %v6737_v2 }
  0x2d   :  { %4355 = vmatmul.mubr.msk.f32.gmra.mxu0 %vm104_vm0, %v74_v10  ;;  %553 = vmatprep.subr.mxu0 %v6451_v11  ;;  %v6514_v27 = vld [vmem:[%s9520_s0 + $0x20] sm:$0xff]  ;;  %v6516_v28 = vld [vmem:[#allocation3 + $0xb0] sm:$0xff]  ;;  %v6519_v29 = vld [vmem:[#allocation3 + $0xa8] sm:$0xff] }
  0x2e   :  { %554 = vmatpush1.msra.mxu0 %v6454_v12  ;;  %205 = vmatprep.mubr.f32.mxu0 %v9533_v0  ;;  %v6522_v30 = vld [vmem:[#allocation3 + $0x98] sm:$0xff]  ;;  %v6527_v31 = vld [vmem:[#allocation3 + $0x90] sm:$0xff]  ;;  %v6534_v32 = vld [vmem:[%s9520_s0 + $0x28] sm:$0xff] }
  0x2f   :  { %555 = vmatprep.subr.mxu0 %v6457_v13  ;;  %4830 = vmatprep.subr.mxu1 %v83_v25  ;;  %v6536_v33 = vld [vmem:[#allocation3 + $0x80] sm:$0xff]  ;;  %v6539_v34 = vld [vmem:[#allocation3 + $0x78] sm:$0xff]  ;;  %v6543_v35 = vld [vmem:[#allocation3 + $0x68] sm:$0xff] }
  0x30   :  { %556 = vmatpush1.msra.mxu0 %v6461_v14  ;;  %4831 = vmatpush3.msra.mxu1 %v83_v25  ;;  %v6546_v36 = vld [vmem:[#allocation3 + $0x178] sm:$0xff]  ;;  %v6551_v37 = vld [vmem:[#allocation3 + $0x60] sm:$0xff]  ;;  %v79_v38 = vld [vmem:[%s9520_s0 + $0x30] sm:$0xff] }
  0x31   :  { %4356 = vmatmul.mubr.msk.f32.gmra.mxu0 %vm104_vm0, %v6468_v15  ;;  %557 = vmatprep.subr.mxu0 %v6470_v16  ;;  %v6558_v39 = vld [vmem:[#allocation3 + $0x50] sm:$0xff]  ;;  %v6561_v40 = vld [vmem:[#allocation3 + $0x48] sm:$0xff]  ;;  %v6565_v41 = vld [vmem:[#allocation3 + $0x38] sm:$0xff] }
  0x32   :  { %558 = vmatpush1.msra.mxu0 %v6473_v17  ;;  %211 = vmatprep.mubr.f32.mxu0 %v9533_v0  ;;  %v6568_v42 = vld [vmem:[#allocation3 + $0x160] sm:$0xff]  ;;  %v6572_v43 = vld [vmem:[#allocation3 + $0x30] sm:$0xff]  ;;  %v80_v44 = vld [vmem:[%s9520_s0 + $0x38] sm:$0xff] }
  0x33   :  { %559 = vmatprep.subr.mxu0 %v6476_v18  ;;  %4844 = vmatprep.subr.mxu1 %v9533_v0  ;;  %v6579_v45 = vld [vmem:[#allocation3 + $0x20] sm:$0xff]  ;;  %v6582_v46 = vld [vmem:[#allocation3 + $0x18] sm:$0xff]  ;;  %v6586_v47 = vld [vmem:[#allocation3 + $0x8] sm:$0xff] }
  0x34   :  { %560 = vmatpush1.msra.mxu0 %v6484_v20  ;;  %4833 = vmatmul.mubr.msk.f32.vlgmr.msra.gmra.mxu1 %vm104_vm0, %v74_v10  ;;  %v6589_v48 = vld [vmem:[#allocation3 + $0x148] sm:$0xff]  ;;  %v6593_v49 = vld [vmem:[#allocation3] sm:$0xff]  ;;  %v6597_v50 = vld [vmem:[#allocation3 + $0x130] sm:$0xff] }
  0x35   :  { %4357 = vmatmul.mubr.msk.f32.gmra.mxu0 %vm104_vm0, %v6491_v21  ;;  %561 = vmatprep.subr.mxu0 %v6493_v22  ;;  %v6603_v51 = vld [vmem:[#allocation3 + $0x118] sm:$0xff]  ;;  %v6608_v52 = vld [vmem:[#allocation3 + $0x100] sm:$0xff]  ;;  %v6615_v53 = vld [vmem:[#allocation3 + $0xe8] sm:$0xff] }
  0x36   :  { %562 = vmatpush1.msra.mxu0 %v6496_v23  ;;  %217 = vmatprep.mubr.f32.mxu0 %v9533_v0  ;;  %v6623_v54 = vld [vmem:[#allocation3 + $0xd0] sm:$0xff]  ;;  %v6629_v55 = vld [vmem:[#allocation3 + $0xb8] sm:$0xff]  ;;  %v6636_v56 = vld [vmem:[#allocation3 + $0xa0] sm:$0xff] }
  0x37   :  { %563 = vmatprep.subr.mxu0 %v6499_v24  ;;  %4845 = vmatpush3.msra.mxu1 %v6546_v36  ;;  %v6642_v57 = vld [vmem:[#allocation3 + $0x88] sm:$0xff]  ;;  %v6649_v58 = vld [vmem:[#allocation3 + $0x70] sm:$0xff]  ;;  %v6655_v59 = vld [vmem:[#allocation3 + $0x58] sm:$0xff] }
  0x38   :  { %564 = vmatpush1.msra.mxu0 %v6507_v26  ;;  %4846 = vmatprep.subr.mxu1 %v9533_v0  ;;  %v6661_v60 = vld [vmem:[#allocation3 + $0x40] sm:$0xff]  ;;  %v6667_v61 = vld [vmem:[#allocation3 + $0x28] sm:$0xff]  ;;  %v6673_v62 = vld [vmem:[#allocation3 + $0x10] sm:$0xff] }
  0x39   :  { %4358 = vmatmul.mubr.msk.f32.gmra.mxu0 %vm104_vm0, %v6514_v27  ;;  %565 = vmatprep.subr.mxu0 %v6516_v28  ;;  %v6734_v63 = vld [vmem:[#allocation5 + $0x170] sm:$0xff]  ;;  %v87_v4 = vld [vmem:[%s9523_s3] sm:$0x7] }
  0x3a   :  { %566 = vmatpush1.msra.mxu0 %v6519_v29  ;;  %223 = vmatprep.mubr.f32.mxu0 %v9533_v0 }
  0x3b   :  { %567 = vmatprep.subr.mxu0 %v6522_v30  ;;  %4847 = vmatpush3.msra.mxu1 %v6568_v42 }
  0x3c   :  { %568 = vmatpush1.msra.mxu0 %v6527_v31  ;;  %4848 = vmatprep.subr.mxu1 %v9533_v0 }
  0x3d   :  { %4359 = vmatmul.mubr.msk.f32.gmra.mxu0 %vm104_vm0, %v6534_v32  ;;  %569 = vmatprep.subr.mxu0 %v6536_v33 }
  0x3e   :  { %570 = vmatpush1.msra.mxu0 %v6539_v34  ;;  %229 = vmatprep.mubr.f32.mxu0 %v9533_v0 }
  0x3f   :  { %571 = vmatprep.subr.mxu0 %v6543_v35  ;;  %4849 = vmatpush3.msra.mxu1 %v6589_v48 }
  0x40   :  { %572 = vmatpush1.msra.mxu0 %v6551_v37  ;;  %4850 = vmatprep.subr.mxu1 %v9533_v0 }
  0x41   :  { %4360 = vmatmul.mubr.msk.f32.gmra.mxu0 %vm104_vm0, %v79_v38  ;;  %573 = vmatprep.subr.mxu0 %v6558_v39 }
  0x42   :  { %574 = vmatpush1.msra.mxu0 %v6561_v40  ;;  %235 = vmatprep.mubr.f32.mxu0 %v9533_v0 }
  0x43   :  { %575 = vmatprep.subr.mxu0 %v6565_v41  ;;  %4851 = vmatpush3.msra.mxu1 %v6597_v50 }
  0x44   :  { %576 = vmatpush1.msra.mxu0 %v6572_v43  ;;  %4852 = vmatprep.subr.mxu1 %v9533_v0 }
  0x45   :  { %4361 = vmatmul.mubr.msk.f32.gmra.mxu0 %vm104_vm0, %v80_v44  ;;  %577 = vmatprep.subr.mxu0 %v6579_v45 }
  0x46   :  { %578 = vmatpush1.msra.mxu0 %v6582_v46  ;;  %613 = vmatprep.mubr.f32.mxu0 %v9533_v0 }
  0x47   :  { %579 = vmatprep.subr.mxu0 %v6586_v47  ;;  %4835 = vmatprep.mubr.msk.f32.mxu1 %vm104_vm0, %v6468_v15 }
  0x48   :  { %580 = vmatpush1.msra.mxu0 %v6593_v49  ;;  %4853 = vmatpush3.msra.mxu1 %v6603_v51 }
  0x49   :  { %614 = vmatmul.mubr.f32.vlgmr.msra.gmra.mxu0 %v9533_v0  ;;  %718 = vmatprep.subr.mxu0 %v6435_v6  ;;  %v9531_v6 = vsub.s32 1, %v6737_v2 }
  0x4a   :  { %4854 = vmatprep.subr.mxu1 %v9533_v0  ;;  %4836 = vmatmul.mubr.msk.f32.gmra.mxu1 %vm104_vm0, %v6491_v21 }
  0x4b   :  { %4855 = vmatpush3.msra.mxu1 %v6608_v52  ;;  %4838 = vmatprep.mubr.msk.f32.mxu1 %vm104_vm0, %v6514_v27  ;;  %v96_v10 = vrot.slane %v87_v4, %v9531_v6 }
  0x4c   :  { %4856 = vmatprep.subr.mxu1 %v9533_v0  ;;  %719 = vmatpush1.msra.mxu0 %v6438_v7 }
  0x4d   :  { %4857 = vmatpush3.msra.mxu1 %v6615_v53  ;;  %720 = vmatprep.subr.mxu0 %v6440_v8  ;;  %v92_v8 = vrot.slane %v87_v4, %v9532_v3  ;;  %v6801_v3 = vld [vmem:[#allocation5 + $0x168] sm:$0xff] }
  0x4e   :  { %4858 = vmatprep.subr.mxu1 %v9533_v0  ;;  %4839 = vmatmul.mubr.msk.f32.gmra.mxu1 %vm104_vm0, %v6534_v32 }
  0x4f   :  { %4859 = vmatpush3.msra.mxu1 %v6623_v54  ;;  %4841 = vmatprep.mubr.msk.f32.mxu1 %vm104_vm0, %v79_v38 }
  0x50   :  { %4860 = vmatprep.subr.mxu1 %v9533_v0  ;;  %721 = vmatpush1.msra.mxu0 %v6444_v9 }
  0x51   :  { %4861 = vmatpush3.msra.mxu1 %v6629_v55  ;;  %722 = vmatprep.subr.mxu0 %v6451_v11 }
  0x52   :  { %4862 = vmatprep.subr.mxu1 %v9533_v0  ;;  %4842 = vmatmul.mubr.msk.f32.gmra.mxu1 %vm104_vm0, %v80_v44 }
  0x53   :  { %4863 = vmatpush3.msra.mxu1 %v6636_v56  ;;  %4876 = vmatprep.mubr.msk.f32.mxu1 %vm6359_vm1, %v9533_v0 }
  0x54   :  { %4864 = vmatprep.subr.mxu1 %v9533_v0  ;;  %723 = vmatpush1.msra.mxu0 %v6454_v12 }
  0x55   :  { %4865 = vmatpush3.msra.mxu1 %v6642_v57  ;;  %724 = vmatprep.subr.mxu0 %v6457_v13 }
  0x56   :  { %4866 = vmatprep.subr.mxu1 %v9533_v0  ;;  %725 = vmatpush1.msra.mxu0 %v6461_v14 }
  0x57   :  { %4867 = vmatpush3.msra.mxu1 %v6649_v58  ;;  %726 = vmatprep.subr.mxu0 %v6470_v16 }
  0x58   :  { %4868 = vmatprep.subr.mxu1 %v9533_v0  ;;  %727 = vmatpush1.msra.mxu0 %v6473_v17 }
  0x59   :  { %4869 = vmatpush3.msra.mxu1 %v6655_v59  ;;  %728 = vmatprep.subr.mxu0 %v6476_v18 }
  0x5a   :  { %4870 = vmatprep.subr.mxu1 %v9533_v0  ;;  %729 = vmatpush1.msra.mxu0 %v6484_v20 }
  0x5b   :  { %4871 = vmatpush3.msra.mxu1 %v6661_v60  ;;  %730 = vmatprep.subr.mxu0 %v6493_v22 }
  0x5c   :  { %4872 = vmatprep.subr.mxu1 %v9533_v0  ;;  %731 = vmatpush1.msra.mxu0 %v6496_v23 }
  0x5d   :  { %4873 = vmatpush3.msra.mxu1 %v6667_v61  ;;  %732 = vmatprep.subr.mxu0 %v6499_v24  ;;  %v100_v24 = vrot.slane %v87_v4, %v9530_v19 }
  0x5e   :  { %4874 = vmatprep.subr.mxu1 %v9533_v0  ;;  %733 = vmatpush1.msra.mxu0 %v6507_v26 }
  0x5f   :  { %4875 = vmatpush3.msra.mxu1 %v6673_v62  ;;  %734 = vmatprep.subr.mxu0 %v6516_v28 }
  0x60   :  { %4877 = vmatmul.mubr.f32.vlgmr.msra.gmra.mxu1 %v9533_v0  ;;  %4879 = vmatprep.subr.mxu1 %v9533_v0 }
  0x61   :  { %4880 = vmatpush3.msra.mxu1 %v6546_v36  ;;  %735 = vmatpush1.msra.mxu0 %v6519_v29 }
  0x62   :  { %4881 = vmatprep.subr.mxu1 %v9533_v0  ;;  %736 = vmatprep.subr.mxu0 %v6522_v30 }
  0x63   :  { %4882 = vmatpush3.msra.mxu1 %v6568_v42  ;;  %737 = vmatpush1.msra.mxu0 %v6527_v31 }
  0x64   :  { %4883 = vmatprep.subr.mxu1 %v9533_v0  ;;  %738 = vmatprep.subr.mxu0 %v6536_v33 }
  0x65   :  { %4884 = vmatpush3.msra.mxu1 %v6589_v48  ;;  %739 = vmatpush1.msra.mxu0 %v6539_v34 }
  0x66   :  { %4885 = vmatprep.subr.mxu1 %v9533_v0  ;;  %740 = vmatprep.subr.mxu0 %v6543_v35 }
  0x67   :  { %4886 = vmatpush3.msra.mxu1 %v6597_v50  ;;  %741 = vmatpush1.msra.mxu0 %v6551_v37 }
  0x68   :  { %4887 = vmatprep.subr.mxu1 %v9533_v0  ;;  %742 = vmatprep.subr.mxu0 %v6558_v39 }
  0x69   :  { %4888 = vmatpush3.msra.mxu1 %v6603_v51  ;;  %743 = vmatpush1.msra.mxu0 %v6561_v40 }
  0x6a   :  { %4889 = vmatprep.subr.mxu1 %v9533_v0  ;;  %744 = vmatprep.subr.mxu0 %v6565_v41 }
  0x6b   :  { %4890 = vmatpush3.msra.mxu1 %v6608_v52  ;;  %745 = vmatpush1.msra.mxu0 %v6572_v43 }
  0x6c   :  { %4891 = vmatprep.subr.mxu1 %v9533_v0  ;;  %746 = vmatprep.subr.mxu0 %v6579_v45 }
  0x6d   :  { %4892 = vmatpush3.msra.mxu1 %v6615_v53  ;;  %747 = vmatpush1.msra.mxu0 %v6582_v46 }
  0x6e   :  { %4893 = vmatprep.subr.mxu1 %v9533_v0  ;;  %748 = vmatprep.subr.mxu0 %v6586_v47 }
  0x6f   :  { %4894 = vmatpush3.msra.mxu1 %v6623_v54  ;;  %749 = vmatpush1.msra.mxu0 %v6593_v49 }
  0x70   :  { %4895 = vmatprep.subr.mxu1 %v9533_v0  ;;  %782 = vmatprep.mubr.f32.mxu0 %v9533_v0 }
  0x71   :  { %4896 = vmatpush3.msra.mxu1 %v6629_v55  ;;  %4911 = vmatprep.mubr.msk.f32.mxu1 %vm6359_vm1, %v9533_v0 }
  0x72   :  { %4897 = vmatprep.subr.mxu1 %v9533_v0  ;;  %881 = vmatprep.subr.mxu0 %v6734_v63 }
  0x73   :  { %4898 = vmatpush3.msra.mxu1 %v6636_v56 }
  0x74   :  { %4899 = vmatprep.subr.mxu1 %v9533_v0 }
  0x75   :  { %4900 = vmatpush3.msra.mxu1 %v6642_v57 }
  0x76   :  { %4901 = vmatprep.subr.mxu1 %v9533_v0 }
  0x77   :  { %4902 = vmatpush3.msra.mxu1 %v6649_v58 }
  0x78   :  { %4903 = vmatprep.subr.mxu1 %v9533_v0 }
  0x79   :  { %4904 = vmatpush3.msra.mxu1 %v6655_v59 }
  0x7a   :  { %4905 = vmatprep.subr.mxu1 %v9533_v0 }
  0x7b   :  { %4906 = vmatpush3.msra.mxu1 %v6661_v60 }
  0x7c   :  { %4907 = vmatprep.subr.mxu1 %v9533_v0 }
  0x7d   :  { %4908 = vmatpush3.msra.mxu1 %v6667_v61 }
  0x7e   :  { %4909 = vmatprep.subr.mxu1 %v9533_v0 }
  0x7f   :  { %4910 = vmatpush3.msra.mxu1 %v6673_v62 }
  0x80   :  { %4914 = vmatprep.subr.mxu1 %v9533_v0  ;;  %v6803_v0 = vld [vmem:[#allocation5 + $0x178] sm:$0xff] }
  0xe9   :  { %v195_v5 = vpop.f32.mrf.mxu0 }
  0xea   :  { %v196_v1 = vadd.f32 %v195_v5, %v92_v8 }
  0xeb   :  { %v197_v7 = vpop.f32.mrf.mxu0 }
  0xed   :  { %v201_v9 = vpop.f32.mrf.mxu0 }
  0xee   :  { %v6748_v11 = vadd.f32 %v201_v9, %v92_v8 }
  0xef   :  { %v203_v12 = vpop.f32.mrf.mxu0 }
  0xf0   :  { %v6750_v13 = vadd.f32 %v203_v12, %v96_v10 }
  0xf1   :  { %v207_v14 = vpop.f32.mrf.mxu0 }
  0xf2   :  { %v6752_v15 = vadd.f32 %v207_v14, %v92_v8 }
  0xf3   :  { %v209_v16 = vpop.f32.mrf.mxu0 }
  0xf4   :  { %9827 = vst [vmem:[#allocation10_spill] sm:$0xff] %v6752_v15  ;;  %v6754_v17 = vadd.f32 %v209_v16, %v96_v10  ;;  %v4834_v28 = vpop.f32.mrf.mxu1  ;;  %v6909_v15 = vld [vmem:[#allocation5 + $0x60] sm:$0xff] }
  0xf5   :  { %v213_v18 = vpop.f32.mrf.mxu0  ;;  %v6767_v30 = vadd.f32 %v4834_v28, %v100_v24  ;;  %9854 = vst [vmem:[#allocation36_spill] sm:$0xff] %v6909_v15 }
  0xf6   :  { %9828 = vst [vmem:[#allocation11_spill] sm:$0xff] %v6754_v17  ;;  %v6757_v20 = vadd.f32 %v213_v18, %v92_v8  ;;  %v308_v14 = vpop.f32.mrf.mxu1  ;;  %v6905_v17 = vld [vmem:[#allocation5 + $0x68] sm:$0xff] }
  0xf7   :  { %v215_v21 = vpop.f32.mrf.mxu0  ;;  %9853 = vst [vmem:[#allocation35_spill] sm:$0xff] %v6905_v17 }
  0xf8   :  { %9829 = vst [vmem:[#allocation12_spill] sm:$0xff] %v6757_v20  ;;  %v6759_v22 = vadd.f32 %v215_v21, %v96_v10  ;;  %v6899_v20 = vld [vmem:[#allocation5 + $0x78] sm:$0xff] }
  0xf9   :  { %v219_v23 = vpop.f32.mrf.mxu0  ;;  %9851 = vst [vmem:[#allocation33_spill] sm:$0xff] %v6899_v20 }
  0xfa   :  { %9830 = vst [vmem:[#allocation13_spill] sm:$0xff] %v6759_v22  ;;  %v6763_v25 = vadd.f32 %v219_v23, %v92_v8  ;;  %v6895_v22 = vld [vmem:[#allocation5 + $0x80] sm:$0xff] }
  0xfb   :  { %v221_v26 = vpop.f32.mrf.mxu0  ;;  %9850 = vst [vmem:[#allocation32_spill] sm:$0xff] %v6895_v22 }
  0xfc   :  { %9831 = vst [vmem:[#allocation14_spill] sm:$0xff] %v6763_v25  ;;  %v6765_v27 = vadd.f32 %v221_v26, %v96_v10  ;;  %v198_v26 = vadd.f32 %v197_v7, %v96_v10  ;;  %v6889_v25 = vld [vmem:[#allocation5 + $0x90] sm:$0xff] }
  0xfd   :  { %v225_v29 = vpop.f32.mrf.mxu0  ;;  %9848 = vst [vmem:[#allocation30_spill] sm:$0xff] %v6889_v25 }
  0xfe   :  { %9832 = vst [vmem:[#allocation15_spill] sm:$0xff] %v6765_v27  ;;  %v6769_v31 = vadd.f32 %v225_v29, %v92_v8  ;;  %v6885_v27 = vld [vmem:[#allocation5 + $0x98] sm:$0xff] }
  0xff   :  { %v227_v32 = vpop.f32.mrf.mxu0  ;;  %9847 = vst [vmem:[#allocation29_spill] sm:$0xff] %v6885_v27 }
 0x100   :  { %9833 = vst [vmem:[#allocation16_spill] sm:$0xff] %v6769_v31  ;;  %v6771_v33 = vadd.f32 %v227_v32, %v96_v10  ;;  %v6879_v31 = vld [vmem:[#allocation5 + $0xa8] sm:$0xff] }
 0x101   :  { %v231_v34 = vpop.f32.mrf.mxu0 }
 0x102   :  { %9834 = vst [vmem:[#allocation17_spill] sm:$0xff] %v6771_v33  ;;  %v6773_v35 = vadd.f32 %v231_v34, %v92_v8  ;;  %v6875_v33 = vld [vmem:[#allocation5 + $0xb0] sm:$0xff] }
 0x103   :  { %v233_v37 = vpop.f32.mrf.mxu0 }
 0x104   :  { %9835 = vst [vmem:[#allocation18_spill] sm:$0xff] %v6773_v35  ;;  %v6775_v38 = vadd.f32 %v233_v37, %v96_v10  ;;  %v6869_v35 = vld [vmem:[#allocation5 + $0xc0] sm:$0xff] }
 0x105   :  { %v237_v39 = vpop.f32.mrf.mxu0 }
 0x106   :  { %9836 = vst [vmem:[#allocation19_spill] sm:$0xff] %v6775_v38  ;;  %v6777_v40 = vadd.f32 %v237_v39, %v92_v8  ;;  %v6865_v38 = vld [vmem:[#allocation5 + $0xc8] sm:$0xff] }
 0x107   :  { %v239_v44 = vpop.f32.mrf.mxu0 }
 0x108   :  { %9837 = vst [vmem:[#allocation20_spill] sm:$0xff] %v6777_v40  ;;  %v6779_v4 = vadd.f32 %v239_v44, %v96_v10  ;;  %v6859_v40 = vld [vmem:[#allocation5 + $0xd8] sm:$0xff] }
 0x109   :  { %v615_v9 = vpop.f32.mrf.mxu0 }
 0x10a   :  { %9838 = vst [vmem:[#allocation21_spill] sm:$0xff] %v6779_v4  ;;  %v690_v12 = vadd.f32 %v615_v9, %v196_v1  ;;  %v4837_v18 = vpop.f32.mrf.mxu1  ;;  %v6855_v4 = vld [vmem:[#allocation5 + $0xe0] sm:$0xff] }
 0x10b   :  { %v617_v21 = vpop.f32.mrf.mxu0  ;;  %v6781_v23 = vadd.f32 %v4837_v18, %v100_v24 }
 0x10c   :  { %v4372_v16 = vmul.f32 -1.442695, %v690_v12  ;;  %v318_v28 = vpop.f32.mrf.mxu1  ;;  %v697_v32 = vadd.f32 %v617_v21, %v198_v26  ;;  %v6796_v26 = vld [vmem:[%s9524_s4] ss:$0 sm:$0xff] }
 0x10d   :  { %9839 = vst [vmem:[#allocation22_spill] sm:$0xff] %v6781_v23  ;;  %v6783_v29 = vadd.f32 %v318_v28, %v100_v24  ;;  %v6891_v23 = vld [vmem:[#allocation5 + $0xa0] sm:$0xff] }
 0x10e   :  { %5691 = vpow2.f32 %v4372_v16  ;;  %v4840_v34 = vpop.f32.mrf.mxu1  ;;  %v4373_v39 = vmul.f32 -1.442695, %v697_v32  ;;  %9849 = vst [vmem:[#allocation31_spill] sm:$0xff] %v6891_v23 }
 0x10f   :  { %9840 = vst [vmem:[#allocation23_spill] sm:$0xff] %v6783_v29  ;;  %v6785_v37 = vadd.f32 %v4840_v34, %v100_v24  ;;  %v6901_v29 = vld [vmem:[#allocation5 + $0x88] sm:$0xff] }
 0x110   :  { %v328_v5 = vpop.f32.mrf.mxu1  ;;  %5693 = vpow2.f32 %v4373_v39  ;;  %9852 = vst [vmem:[#allocation34_spill] sm:$0xff] %v6901_v29 }
 0x111   :  { %9841 = vst [vmem:[#allocation24_spill] sm:$0xff] %v6785_v37  ;;  %v6787_v8 = vadd.f32 %v328_v5, %v100_v24  ;;  %v309_v5 = vadd.f32 %v308_v14, %v100_v24  ;;  %v6811_v14 = vld [vmem:[#allocation5 + $0x160] sm:$0xff]  ;;  %v6871_v37 = vld [vmem:[#allocation5 + $0xd0] sm:$0xff] }
 0x112   :  { %v4843_v44 = vpop.f32.mrf.mxu1 }
 0x113   :  { %9842 = vst [vmem:[#allocation25_spill] sm:$0xff] %v6787_v8  ;;  %v6789_v1 = vadd.f32 %v4843_v44, %v100_v24  ;;  %v6881_v8 = vld [vmem:[#allocation5 + $0xb8] sm:$0xff] }
 0x114   :  { %v338_v9 = vpop.f32.mrf.mxu1  ;;  %9846 = vst [vmem:[#allocation28_spill] sm:$0xff] %v6881_v8 }
 0x115   :  { %9843 = vst [vmem:[#allocation26_spill] sm:$0xff] %v6789_v1  ;;  %v6791_v12 = vadd.f32 %v338_v9, %v100_v24  ;;  %v6809_v24 = vld [vmem:[#allocation5 + $0x150] sm:$0xff]  ;;  %v6851_v1 = vld [vmem:[#allocation5 + $0x100] sm:$0xff] }
 0x117   :  { %9844 = vst [vmem:[#allocation27_spill] sm:$0xff] %v6791_v12  ;;  %v6861_v12 = vld [vmem:[#allocation5 + $0xe8] sm:$0xff] }
 0x11b   :  { %v5692_v7 = vpop.eup %5691 }
 0x11c   :  { %v694_v10 = vadd.f32 1.0, %v5692_v7 }
 0x11d   :  { %v5694_v21 = vpop.eup %5693 }
 0x11e   :  { %5695 = vrcp.f32 %v694_v10  ;;  %v701_v28 = vadd.f32 1.0, %v5694_v21  ;;  %v6805_v21 = vld [vmem:[#allocation5 + $0x158] sm:$0xff] }
 0x120   :  { %v686_v16 = vpop.f32.mrf.mxu1  ;;  %5697 = vrcp.f32 %v701_v28  ;;  %v6819_v28 = vld [vmem:[#allocation5 + $0x138] sm:$0xff] }
 0x121   :  { %v704_v32 = vadd.f32 %v6796_v26, %v686_v16  ;;  %v9845_v16 = vmov 0.0  }
 0x122   :  { %v4878_v18 = vpop.f32.mrf.mxu1 }
 0x12b   :  { %v5696_v34 = vpop.eup %5695 }
 0x12c   :  { %v705_v44 = vmul.f32 %v5696_v34, %v704_v32  ;;  %v6821_v32 = vld [vmem:[#allocation5 + $0x148] sm:$0xff] }
 0x12d   :  { %v5698_v39 = vpop.eup %5697  ;;  %v6825_v34 = vld [vmem:[#allocation5 + $0x128] sm:$0xff] }
 0x12e   :  { %v706_v9 = vadd.f32 %v705_v44, %v309_v5  ;;  %v708_v7 = vsub.f32 1.0, %v5698_v39  ;;  %v710_v18 = vmul.f32 0.0, %v5698_v39  ;;  %v6829_v5 = vld [vmem:[#allocation5 + $0x120] sm:$0xff]  ;;  %v6831_v44 = vld [vmem:[#allocation5 + $0x130] sm:$0xff]  ;;  %v6839_v39 = vld [vmem:[#allocation5 + $0x108] sm:$0xff] }
 0x130   :  { %5699 = vtanh.f32 %v706_v9  ;;  %v6835_v9 = vld [vmem:[#allocation5 + $0x110] sm:$0xff] }
 0x13d   :  { %v5700_v10 = vpop.eup %5699 }
 0x13e   :  { %v709_v19 = vmul.f32 %v5700_v10, %v708_v7  ;;  %v6841_v7 = vld [vmem:[#allocation5 + $0x118] sm:$0xff] }
 0x13f   :  { %v6845_v10 = vld [vmem:[#allocation5 + $0xf8] sm:$0xff] }
 0x140   :  { %v6799_v6 = vadd.f32 %v710_v18, %v709_v19  ;;  %v6815_v19 = vld [vmem:[#allocation5 + $0x140] sm:$0xff]  ;;  %v6849_v18 = vld [vmem:[#allocation5 + $0xf0] sm:$0xff] }
 0x142   :  { %783 = vmatmul.mubr.f32.vlgmr.msra.gmra.mxu0 %v6799_v6  ;;  %4912 = vmatmul.mubr.f32.vlgmr.msra.gmra.mxu1 %v6799_v6 }
 0x143   :  { %882 = vmatpush1.msra.mxu0 %v6801_v3  ;;  %4915 = vmatpush3.msra.mxu1 %v6803_v0 }
 0x144   :  { %883 = vmatprep.subr.mxu0 %v6805_v21  ;;  %4916 = vmatprep.subr.mxu1 %v9845_v16 }
 0x145   :  { %884 = vmatpush1.msra.mxu0 %v6809_v24  ;;  %4917 = vmatpush3.msra.mxu1 %v6811_v14 }
 0x146   :  { %885 = vmatprep.subr.mxu0 %v6815_v19  ;;  %4918 = vmatprep.subr.mxu1 %v9845_v16 }
 0x147   :  { %886 = vmatpush1.msra.mxu0 %v6819_v28  ;;  %4919 = vmatpush3.msra.mxu1 %v6821_v32 }
 0x148   :  { %887 = vmatprep.subr.mxu0 %v6825_v34  ;;  %4920 = vmatprep.subr.mxu1 %v9845_v16 }
 0x149   :  { %888 = vmatpush1.msra.mxu0 %v6829_v5  ;;  %4921 = vmatpush3.msra.mxu1 %v6831_v44 }
 0x14a   :  { %889 = vmatprep.subr.mxu0 %v6835_v9  ;;  %4922 = vmatprep.subr.mxu1 %v9845_v16 }
 0x14b   :  { %890 = vmatpush1.msra.mxu0 %v6839_v39  ;;  %4923 = vmatpush3.msra.mxu1 %v6841_v7 }
 0x14c   :  { %891 = vmatprep.subr.mxu0 %v6845_v10  ;;  %4924 = vmatprep.subr.mxu1 %v9845_v16 }
 0x14d   :  { %892 = vmatpush1.msra.mxu0 %v6849_v18  ;;  %4925 = vmatpush3.msra.mxu1 %v6851_v1 }
 0x14e   :  { %893 = vmatprep.subr.mxu0 %v6855_v4  ;;  %4926 = vmatprep.subr.mxu1 %v9845_v16 }
 0x14f   :  { %894 = vmatpush1.msra.mxu0 %v6859_v40  ;;  %4927 = vmatpush3.msra.mxu1 %v6861_v12 }
 0x150   :  { %895 = vmatprep.subr.mxu0 %v6865_v38  ;;  %4928 = vmatprep.subr.mxu1 %v9845_v16 }
 0x151   :  { %896 = vmatpush1.msra.mxu0 %v6869_v35  ;;  %4929 = vmatpush3.msra.mxu1 %v6871_v37 }
 0x152   :  { %897 = vmatprep.subr.mxu0 %v6875_v33  ;;  %4930 = vmatprep.subr.mxu1 %v9845_v16 }
 0x153   :  { %898 = vmatpush1.msra.mxu0 %v6879_v31  ;;  %4931 = vmatpush3.msra.mxu1 %v6881_v8  ;;  %v6911_v8 = vld [vmem:[#allocation5 + $0x70] sm:$0xff] }
 0x154   :  { %899 = vmatprep.subr.mxu0 %v6885_v27  ;;  %4932 = vmatprep.subr.mxu1 %v9845_v16  ;;  %9855 = vst [vmem:[#allocation37_spill] sm:$0xff] %v6911_v8  ;;  %v6915_v27 = vld [vmem:[#allocation5 + $0x50] sm:$0xff] }
 0x155   :  { %900 = vmatpush1.msra.mxu0 %v6889_v25  ;;  %4933 = vmatpush3.msra.mxu1 %v6891_v23  ;;  %9856 = vst [vmem:[#allocation38_spill] sm:$0xff] %v6915_v27  ;;  %v6919_v23 = vld [vmem:[#allocation5 + $0x48] sm:$0xff]  ;;  %v6921_v25 = vld [vmem:[#allocation5 + $0x58] sm:$0xff] }
 0x156   :  { %901 = vmatprep.subr.mxu0 %v6895_v22  ;;  %4934 = vmatprep.subr.mxu1 %v9845_v16  ;;  %9857 = vst [vmem:[#allocation39_spill] sm:$0xff] %v6919_v23  ;;  %9858 = vst [vmem:[#allocation40_spill] sm:$0xff] %v6921_v25  ;;  %v6925_v22 = vld [vmem:[#allocation5 + $0x38] sm:$0xff] }
 0x157   :  { %902 = vmatpush1.msra.mxu0 %v6899_v20  ;;  %4935 = vmatpush3.msra.mxu1 %v6901_v29  ;;  %9859 = vst [vmem:[#allocation41_spill] sm:$0xff] %v6925_v22  ;;  %v6929_v29 = vld [vmem:[#allocation5 + $0x30] sm:$0xff]  ;;  %v6931_v20 = vld [vmem:[#allocation5 + $0x40] sm:$0xff] }
 0x158   :  { %903 = vmatprep.subr.mxu0 %v6905_v17  ;;  %4936 = vmatprep.subr.mxu1 %v9845_v16  ;;  %9860 = vst [vmem:[#allocation42_spill] sm:$0xff] %v6929_v29  ;;  %9861 = vst [vmem:[#allocation43_spill] sm:$0xff] %v6931_v20  ;;  %v6935_v17 = vld [vmem:[#allocation5 + $0x20] sm:$0xff] }
 0x159   :  { %904 = vmatpush1.msra.mxu0 %v6909_v15  ;;  %4937 = vmatpush3.msra.mxu1 %v6911_v8  ;;  %9862 = vst [vmem:[#allocation44_spill] sm:$0xff] %v6935_v17  ;;  %v6939_v8 = vld [vmem:[#allocation5 + $0x18] sm:$0xff]  ;;  %v6941_v15 = vld [vmem:[#allocation5 + $0x28] sm:$0xff] }
 0x15a   :  { %905 = vmatprep.subr.mxu0 %v6915_v27  ;;  %4938 = vmatprep.subr.mxu1 %v9845_v16  ;;  %9863 = vst [vmem:[#allocation45_spill] sm:$0xff] %v6939_v8  ;;  %9864 = vst [vmem:[#allocation46_spill] sm:$0xff] %v6941_v15  ;;  %v6945_v27 = vld [vmem:[#allocation5 + $0x8] sm:$0xff] }
 0x15b   :  { %906 = vmatpush1.msra.mxu0 %v6919_v23  ;;  %4939 = vmatpush3.msra.mxu1 %v6921_v25  ;;  %9865 = vst [vmem:[#allocation47_spill] sm:$0xff] %v6945_v27  ;;  %v6949_v25 = vld [vmem:[#allocation5] sm:$0xff]  ;;  %v6990_v23 = vld [vmem:[#allocation7 + $0x148] sm:$0xff] }
 0x15c   :  { %907 = vmatprep.subr.mxu0 %v6925_v22  ;;  %4940 = vmatprep.subr.mxu1 %v9845_v16  ;;  %9866 = vst [vmem:[#allocation48_spill] sm:$0xff] %v6949_v25  ;;  %v6953_v22 = vld [vmem:[#allocation5 + $0x10] sm:$0xff]  ;;  %9877 = vst [vmem:[#allocation59_spill] sm:$0xff] %v6990_v23 }
 0x15d   :  { %908 = vmatpush1.msra.mxu0 %v6929_v29  ;;  %4941 = vmatpush3.msra.mxu1 %v6931_v20  ;;  %9867 = vst [vmem:[#allocation49_spill] sm:$0xff] %v6953_v22  ;;  %v6959_v20 = vld [vmem:[#allocation7 + $0x170] sm:$0xff]  ;;  %v6983_v29 = vld [vmem:[#allocation7 + $0x138] sm:$0xff] }
 0x15e   :  { %909 = vmatprep.subr.mxu0 %v6935_v17  ;;  %4942 = vmatprep.subr.mxu1 %v9845_v16  ;;  %9868 = vst [vmem:[#allocation50_spill] sm:$0xff] %v6959_v20  ;;  %v6980_v17 = vld [vmem:[#allocation7 + $0x160] sm:$0xff]  ;;  %9875 = vst [vmem:[#allocation57_spill] sm:$0xff] %v6983_v29 }
 0x15f   :  { %910 = vmatpush1.msra.mxu0 %v6939_v8  ;;  %4943 = vmatpush3.msra.mxu1 %v6941_v15  ;;  %v6964_v8 = vld [vmem:[#allocation7 + $0x168] sm:$0xff]  ;;  %v6970_v15 = vld [vmem:[#allocation7 + $0x178] sm:$0xff]  ;;  %9874 = vst [vmem:[#allocation56_spill] sm:$0xff] %v6980_v17 }
 0x160   :  { %911 = vmatprep.subr.mxu0 %v6945_v27  ;;  %4944 = vmatprep.subr.mxu1 %v9845_v16  ;;  %9869 = vst [vmem:[#allocation51_spill] sm:$0xff] %v6964_v8  ;;  %v6968_v27 = vld [vmem:[#allocation7 + $0x158] sm:$0xff]  ;;  %9871 = vst [vmem:[#allocation53_spill] sm:$0xff] %v6970_v15 }
 0x161   :  { %912 = vmatpush1.msra.mxu0 %v6949_v25  ;;  %945 = vmatprep.mubr.f32.mxu0 %v9845_v16  ;;  %9870 = vst [vmem:[#allocation52_spill] sm:$0xff] %v6968_v27  ;;  %v6973_v25 = vld [vmem:[#allocation7 + $0x150] sm:$0xff] }
 0x162   :  { %4945 = vmatpush3.msra.mxu1 %v6953_v22  ;;  %4946 = vmatprep.mubr.msk.f32.mxu1 %vm6359_vm1, %v9845_v16  ;;  %9872 = vst [vmem:[#allocation54_spill] sm:$0xff] %v6973_v25  ;;  %v6977_v22 = vld [vmem:[#allocation7 + $0x140] sm:$0xff] }
 0x163   :  { %946 = vmatmul.mubr.f32.vlgmr.msra.gmra.mxu0 %v6799_v6  ;;  %4947 = vmatmul.mubr.f32.vlgmr.msra.gmra.mxu1 %v6799_v6  ;;  %9873 = vst [vmem:[#allocation55_spill] sm:$0xff] %v6977_v22 }
 0x164   :  { %1022 = vmatprep.subr.mxu0 %v6959_v20  ;;  %1086 = vmatprep.mubr.f32.mxu0 %v9845_v16  ;;  %v6987_v20 = vld [vmem:[#allocation7 + $0x128] sm:$0xff] }
 0x165   :  { %1023 = vmatpush1.msra.mxu0 %v6964_v8  ;;  %4949 = vmatprep.subr.mxu1 %v9845_v16  ;;  %9876 = vst [vmem:[#allocation58_spill] sm:$0xff] %v6987_v20  ;;  %v6993_v8 = vld [vmem:[#allocation7 + $0x120] sm:$0xff] }
 0x166   :  { %1024 = vmatprep.subr.mxu0 %v6968_v27  ;;  %4950 = vmatpush3.msra.mxu1 %v6970_v15  ;;  %9878 = vst [vmem:[#allocation60_spill] sm:$0xff] %v6993_v8  ;;  %v6997_v27 = vld [vmem:[#allocation7 + $0x110] sm:$0xff] }
 0x167   :  { %1025 = vmatpush1.msra.mxu0 %v6973_v25  ;;  %4951 = vmatprep.subr.mxu1 %v9845_v16  ;;  %9879 = vst [vmem:[#allocation61_spill] sm:$0xff] %v6997_v27  ;;  %v7000_v15 = vld [vmem:[#allocation7 + $0x130] sm:$0xff]  ;;  %v7003_v25 = vld [vmem:[#allocation7 + $0x108] sm:$0xff] }
 0x168   :  { %1026 = vmatprep.subr.mxu0 %v6977_v22  ;;  %4952 = vmatpush3.msra.mxu1 %v6980_v17  ;;  %9880 = vst [vmem:[#allocation62_spill] sm:$0xff] %v7000_v15  ;;  %9881 = vst [vmem:[#allocation63_spill] sm:$0xff] %v7003_v25  ;;  %v7007_v22 = vld [vmem:[#allocation7 + $0xf8] sm:$0xff] }
 0x169   :  { %1027 = vmatpush1.msra.mxu0 %v6983_v29  ;;  %4953 = vmatprep.subr.mxu1 %v9845_v16  ;;  %9882 = vst [vmem:[#allocation64_spill] sm:$0xff] %v7007_v22  ;;  %v7010_v17 = vld [vmem:[#allocation7 + $0x118] sm:$0xff]  ;;  %v7013_v29 = vld [vmem:[#allocation7 + $0xf0] sm:$0xff] }
 0x16a   :  { %1028 = vmatprep.subr.mxu0 %v6987_v20  ;;  %4954 = vmatpush3.msra.mxu1 %v6990_v23  ;;  %9883 = vst [vmem:[#allocation65_spill] sm:$0xff] %v7010_v17  ;;  %9884 = vst [vmem:[#allocation66_spill] sm:$0xff] %v7013_v29  ;;  %v7017_v20 = vld [vmem:[#allocation7 + $0xe0] sm:$0xff] }
 0x16b   :  { %1029 = vmatpush1.msra.mxu0 %v6993_v8  ;;  %4955 = vmatprep.subr.mxu1 %v9845_v16  ;;  %9885 = vst [vmem:[#allocation67_spill] sm:$0xff] %v7017_v20  ;;  %v7020_v23 = vld [vmem:[#allocation7 + $0x100] sm:$0xff]  ;;  %v7023_v8 = vld [vmem:[#allocation7 + $0xd8] sm:$0xff] }
 0x16c   :  { %1030 = vmatprep.subr.mxu0 %v6997_v27  ;;  %4956 = vmatpush3.msra.mxu1 %v7000_v15  ;;  %9886 = vst [vmem:[#allocation68_spill] sm:$0xff] %v7020_v23  ;;  %9887 = vst [vmem:[#allocation69_spill] sm:$0xff] %v7023_v8  ;;  %v7027_v27 = vld [vmem:[#allocation7 + $0xc8] sm:$0xff] }
 0x16d   :  { %1031 = vmatpush1.msra.mxu0 %v7003_v25  ;;  %4957 = vmatprep.subr.mxu1 %v9845_v16  ;;  %9888 = vst [vmem:[#allocation70_spill] sm:$0xff] %v7027_v27  ;;  %v7030_v15 = vld [vmem:[#allocation7 + $0xe8] sm:$0xff]  ;;  %v7033_v25 = vld [vmem:[#allocation7 + $0xc0] sm:$0xff] }
 0x16e   :  { %1032 = vmatprep.subr.mxu0 %v7007_v22  ;;  %4958 = vmatpush3.msra.mxu1 %v7010_v17  ;;  %9889 = vst [vmem:[#allocation71_spill] sm:$0xff] %v7030_v15  ;;  %9890 = vst [vmem:[#allocation72_spill] sm:$0xff] %v7033_v25  ;;  %v7037_v22 = vld [vmem:[#allocation7 + $0xb0] sm:$0xff] }
 0x16f   :  { %1033 = vmatpush1.msra.mxu0 %v7013_v29  ;;  %4959 = vmatprep.subr.mxu1 %v9845_v16  ;;  %9891 = vst [vmem:[#allocation73_spill] sm:$0xff] %v7037_v22  ;;  %v7040_v17 = vld [vmem:[#allocation7 + $0xd0] sm:$0xff]  ;;  %v7043_v29 = vld [vmem:[#allocation7 + $0xa8] sm:$0xff] }
 0x170   :  { %1034 = vmatprep.subr.mxu0 %v7017_v20  ;;  %4960 = vmatpush3.msra.mxu1 %v7020_v23  ;;  %9892 = vst [vmem:[#allocation74_spill] sm:$0xff] %v7040_v17  ;;  %9893 = vst [vmem:[#allocation75_spill] sm:$0xff] %v7043_v29  ;;  %v7047_v20 = vld [vmem:[#allocation7 + $0x98] sm:$0xff] }
 0x171   :  { %1035 = vmatpush1.msra.mxu0 %v7023_v8  ;;  %4961 = vmatprep.subr.mxu1 %v9845_v16  ;;  %9894 = vst [vmem:[#allocation76_spill] sm:$0xff] %v7047_v20  ;;  %v7050_v23 = vld [vmem:[#allocation7 + $0xb8] sm:$0xff]  ;;  %v7053_v8 = vld [vmem:[#allocation7 + $0x90] sm:$0xff] }
 0x172   :  { %1036 = vmatprep.subr.mxu0 %v7027_v27  ;;  %4962 = vmatpush3.msra.mxu1 %v7030_v15  ;;  %9895 = vst [vmem:[#allocation77_spill] sm:$0xff] %v7050_v23  ;;  %9896 = vst [vmem:[#allocation78_spill] sm:$0xff] %v7053_v8  ;;  %v7057_v27 = vld [vmem:[#allocation7 + $0x80] sm:$0xff] }
 0x173   :  { %1037 = vmatpush1.msra.mxu0 %v7033_v25  ;;  %4963 = vmatprep.subr.mxu1 %v9845_v16  ;;  %9897 = vst [vmem:[#allocation79_spill] sm:$0xff] %v7057_v27  ;;  %v7060_v15 = vld [vmem:[#allocation7 + $0xa0] sm:$0xff]  ;;  %v7063_v25 = vld [vmem:[#allocation7 + $0x78] sm:$0xff] }
 0x174   :  { %1038 = vmatprep.subr.mxu0 %v7037_v22  ;;  %4964 = vmatpush3.msra.mxu1 %v7040_v17  ;;  %9898 = vst [vmem:[#allocation80_spill] sm:$0xff] %v7060_v15  ;;  %9899 = vst [vmem:[#allocation81_spill] sm:$0xff] %v7063_v25  ;;  %v7067_v22 = vld [vmem:[#allocation7 + $0x68] sm:$0xff] }
 0x175   :  { %1039 = vmatpush1.msra.mxu0 %v7043_v29  ;;  %4965 = vmatprep.subr.mxu1 %v9845_v16  ;;  %9900 = vst [vmem:[#allocation82_spill] sm:$0xff] %v7067_v22  ;;  %v7070_v17 = vld [vmem:[#allocation7 + $0x88] sm:$0xff]  ;;  %v7073_v29 = vld [vmem:[#allocation7 + $0x60] sm:$0xff] }
 0x176   :  { %1040 = vmatprep.subr.mxu0 %v7047_v20  ;;  %4966 = vmatpush3.msra.mxu1 %v7050_v23  ;;  %9901 = vst [vmem:[#allocation83_spill] sm:$0xff] %v7070_v17  ;;  %9902 = vst [vmem:[#allocation84_spill] sm:$0xff] %v7073_v29  ;;  %v7077_v20 = vld [vmem:[#allocation7 + $0x50] sm:$0xff] }
 0x177   :  { %1041 = vmatpush1.msra.mxu0 %v7053_v8  ;;  %4967 = vmatprep.subr.mxu1 %v9845_v16  ;;  %9903 = vst [vmem:[#allocation85_spill] sm:$0xff] %v7077_v20  ;;  %v7080_v23 = vld [vmem:[#allocation7 + $0x70] sm:$0xff]  ;;  %v7083_v8 = vld [vmem:[#allocation7 + $0x48] sm:$0xff] }
 0x178   :  { %1042 = vmatprep.subr.mxu0 %v7057_v27  ;;  %4968 = vmatpush3.msra.mxu1 %v7060_v15  ;;  %9904 = vst [vmem:[#allocation86_spill] sm:$0xff] %v7080_v23  ;;  %9905 = vst [vmem:[#allocation87_spill] sm:$0xff] %v7083_v8  ;;  %v7087_v27 = vld [vmem:[#allocation7 + $0x38] sm:$0xff] }
 0x179   :  { %1043 = vmatpush1.msra.mxu0 %v7063_v25  ;;  %4969 = vmatprep.subr.mxu1 %v9845_v16  ;;  %9906 = vst [vmem:[#allocation88_spill] sm:$0xff] %v7087_v27  ;;  %v7090_v15 = vld [vmem:[#allocation7 + $0x58] sm:$0xff]  ;;  %v7093_v25 = vld [vmem:[#allocation7 + $0x30] sm:$0xff] }
 0x17a   :  { %1044 = vmatprep.subr.mxu0 %v7067_v22  ;;  %4970 = vmatpush3.msra.mxu1 %v7070_v17  ;;  %v7097_v22 = vld [vmem:[#allocation7 + $0x20] sm:$0xff] }
 0x17b   :  { %1045 = vmatpush1.msra.mxu0 %v7073_v29  ;;  %4971 = vmatprep.subr.mxu1 %v9845_v16  ;;  %v7100_v17 = vld [vmem:[#allocation7 + $0x40] sm:$0xff]  ;;  %v7103_v29 = vld [vmem:[#allocation7 + $0x18] sm:$0xff] }
 0x17c   :  { %1046 = vmatprep.subr.mxu0 %v7077_v20  ;;  %4972 = vmatpush3.msra.mxu1 %v7080_v23  ;;  %9907 = vst [vmem:[#allocation89_spill] sm:$0xff] %v7103_v29  ;;  %v7107_v20 = vld [vmem:[#allocation7 + $0x8] sm:$0xff] }
 0x17d   :  { %1047 = vmatpush1.msra.mxu0 %v7083_v8  ;;  %4973 = vmatprep.subr.mxu1 %v9845_v16  ;;  %9908 = vst [vmem:[#allocation90_spill] sm:$0xff] %v7107_v20  ;;  %v7110_v23 = vld [vmem:[#allocation7 + $0x28] sm:$0xff]  ;;  %v7113_v8 = vld [vmem:[#allocation7] sm:$0xff] }
 0x17e   :  { %1048 = vmatprep.subr.mxu0 %v7087_v27  ;;  %4974 = vmatpush3.msra.mxu1 %v7090_v15  ;;  %9909 = vst [vmem:[#allocation91_spill] sm:$0xff] %v7113_v8  ;;  %v7118_v27 = vld [vmem:[#allocation7 + $0x10] sm:$0xff] }
 0x17f   :  { %1049 = vmatpush1.msra.mxu0 %v7093_v25  ;;  %4975 = vmatprep.subr.mxu1 %v9845_v16  ;;  %9910 = vst [vmem:[#allocation92_spill] sm:$0xff] %v7118_v27 }
 0x180   :  { %1050 = vmatprep.subr.mxu0 %v7097_v22  ;;  %4976 = vmatpush3.msra.mxu1 %v7100_v17 }
 0x181   :  { %1051 = vmatpush1.msra.mxu0 %v7103_v29  ;;  %4977 = vmatprep.subr.mxu1 %v9845_v16  ;;  %v7128_v29 = vld [vmem:[#allocation3 + $0x170] sm:$0xff] }
 0x182   :  { %1052 = vmatprep.subr.mxu0 %v7107_v20  ;;  %4978 = vmatpush3.msra.mxu1 %v7110_v23  ;;  %9911 = vst [vmem:[#allocation93_spill] sm:$0xff] %v7128_v29  ;;  %v7133_v20 = vld [vmem:[#allocation3 + $0x168] sm:$0xff] }
 0x183   :  { %1053 = vmatpush1.msra.mxu0 %v7113_v8  ;;  %4979 = vmatprep.subr.mxu1 %v9845_v16  ;;  %9912 = vst [vmem:[#allocation94_spill] sm:$0xff] %v7133_v20  ;;  %v7137_v8 = vld [vmem:[#allocation3 + $0x158] sm:$0xff] }
 0x184   :  { %1087 = vmatmul.mubr.f32.vlgmr.msra.gmra.mxu0 %v9845_v16  ;;  %4980 = vmatpush3.msra.mxu1 %v7118_v27  ;;  %v7141_v27 = vld [vmem:[#allocation3 + $0x150] sm:$0xff] }
 0x185   :  { %4981 = vmatprep.mubr.msk.f32.mxu1 %vm6359_vm1, %v9845_v16  ;;  %1192 = vmatprep.subr.mxu0 %v7128_v29  ;;  %9913 = vst [vmem:[#allocation95_spill] sm:$0xff] %v7141_v27  ;;  %v7145_v29 = vld [vmem:[#allocation3 + $0x140] sm:$0xff] }
 0x186   :  { %4982 = vmatmul.mubr.f32.vlgmr.msra.gmra.mxu1 %v9845_v16  ;;  %4984 = vmatprep.subr.mxu1 %v9845_v16 }
 0x187   :  { %1193 = vmatpush1.msra.mxu0 %v7133_v20  ;;  %4985 = vmatpush3.msra.mxu1 %v6546_v36  ;;  %v7149_v20 = vld [vmem:[#allocation3 + $0x138] sm:$0xff]  ;;  %v7153_v36 = vld [vmem:[#allocation3 + $0x128] sm:$0xff] }
 0x188   :  { %1194 = vmatprep.subr.mxu0 %v7137_v8  ;;  %4986 = vmatprep.subr.mxu1 %v9845_v16  ;;  %9914 = vst [vmem:[#allocation96_spill] sm:$0xff] %v7149_v20 }
 0x189   :  { %1195 = vmatpush1.msra.mxu0 %v7141_v27  ;;  %4987 = vmatpush3.msra.mxu1 %v6568_v42  ;;  %v7157_v27 = vld [vmem:[#allocation3 + $0x120] sm:$0xff]  ;;  %v7161_v42 = vld [vmem:[#allocation3 + $0x110] sm:$0xff] }
 0x18a   :  { %1196 = vmatprep.subr.mxu0 %v7145_v29  ;;  %4988 = vmatprep.subr.mxu1 %v9845_v16  ;;  %9915 = vst [vmem:[#allocation97_spill] sm:$0xff] %v7157_v27 }
 0x18b   :  { %1197 = vmatpush1.msra.mxu0 %v7149_v20  ;;  %4989 = vmatpush3.msra.mxu1 %v6589_v48  ;;  %v7165_v20 = vld [vmem:[#allocation3 + $0x108] sm:$0xff]  ;;  %v7169_v48 = vld [vmem:[#allocation3 + $0xf8] sm:$0xff] }
 0x18c   :  { %1198 = vmatprep.subr.mxu0 %v7153_v36  ;;  %4990 = vmatprep.subr.mxu1 %v9845_v16  ;;  %9916 = vst [vmem:[#allocation98_spill] sm:$0xff] %v7165_v20 }
 0x18d   :  { %1199 = vmatpush1.msra.mxu0 %v7157_v27  ;;  %4991 = vmatpush3.msra.mxu1 %v6597_v50  ;;  %v7173_v27 = vld [vmem:[#allocation3 + $0xf0] sm:$0xff]  ;;  %v7177_v50 = vld [vmem:[#allocation3 + $0xe0] sm:$0xff] }
 0x18e   :  { %1200 = vmatprep.subr.mxu0 %v7161_v42  ;;  %4992 = vmatprep.subr.mxu1 %v9845_v16  ;;  %9917 = vst [vmem:[#allocation99_spill] sm:$0xff] %v7173_v27 }
 0x18f   :  { %1201 = vmatpush1.msra.mxu0 %v7165_v20  ;;  %4993 = vmatpush3.msra.mxu1 %v6603_v51  ;;  %v7181_v20 = vld [vmem:[#allocation3 + $0xd8] sm:$0xff]  ;;  %v7185_v51 = vld [vmem:[#allocation3 + $0xc8] sm:$0xff] }
 0x190   :  { %1202 = vmatprep.subr.mxu0 %v7169_v48  ;;  %4994 = vmatprep.subr.mxu1 %v9845_v16  ;;  %9918 = vst [vmem:[#allocation100_spill] sm:$0xff] %v7181_v20 }
 0x191   :  { %1203 = vmatpush1.msra.mxu0 %v7173_v27  ;;  %4995 = vmatpush3.msra.mxu1 %v6608_v52  ;;  %v7189_v27 = vld [vmem:[#allocation3 + $0xc0] sm:$0xff]  ;;  %v7193_v52 = vld [vmem:[#allocation3 + $0xb0] sm:$0xff] }
 0x192   :  { %1204 = vmatprep.subr.mxu0 %v7177_v50  ;;  %4996 = vmatprep.subr.mxu1 %v9845_v16  ;;  %9919 = vst [vmem:[#allocation101_spill] sm:$0xff] %v7189_v27 }
 0x193   :  { %1205 = vmatpush1.msra.mxu0 %v7181_v20  ;;  %4997 = vmatpush3.msra.mxu1 %v6615_v53  ;;  %v7197_v20 = vld [vmem:[#allocation3 + $0xa8] sm:$0xff]  ;;  %v7201_v53 = vld [vmem:[#allocation3 + $0x98] sm:$0xff] }
 0x194   :  { %1206 = vmatprep.subr.mxu0 %v7185_v51  ;;  %4998 = vmatprep.subr.mxu1 %v9845_v16  ;;  %9920 = vst [vmem:[#allocation102_spill] sm:$0xff] %v7197_v20 }
 0x195   :  { %1207 = vmatpush1.msra.mxu0 %v7189_v27  ;;  %4999 = vmatpush3.msra.mxu1 %v6623_v54  ;;  %v7205_v27 = vld [vmem:[#allocation3 + $0x90] sm:$0xff]  ;;  %v7209_v54 = vld [vmem:[#allocation3 + $0x80] sm:$0xff] }
 0x196   :  { %1208 = vmatprep.subr.mxu0 %v7193_v52  ;;  %5000 = vmatprep.subr.mxu1 %v9845_v16  ;;  %9921 = vst [vmem:[#allocation103_spill] sm:$0xff] %v7205_v27 }
 0x197   :  { %1209 = vmatpush1.msra.mxu0 %v7197_v20  ;;  %5001 = vmatpush3.msra.mxu1 %v6629_v55  ;;  %v7213_v20 = vld [vmem:[#allocation3 + $0x78] sm:$0xff]  ;;  %v7217_v55 = vld [vmem:[#allocation3 + $0x68] sm:$0xff] }
 0x198   :  { %1210 = vmatprep.subr.mxu0 %v7201_v53  ;;  %5002 = vmatprep.subr.mxu1 %v9845_v16  ;;  %9922 = vst [vmem:[#allocation104_spill] sm:$0xff] %v7213_v20 }
 0x199   :  { %1211 = vmatpush1.msra.mxu0 %v7205_v27  ;;  %5003 = vmatpush3.msra.mxu1 %v6636_v56  ;;  %v7221_v27 = vld [vmem:[#allocation3 + $0x60] sm:$0xff]  ;;  %v7225_v56 = vld [vmem:[#allocation3 + $0x50] sm:$0xff] }
 0x19a   :  { %1212 = vmatprep.subr.mxu0 %v7209_v54  ;;  %5004 = vmatprep.subr.mxu1 %v9845_v16  ;;  %9923 = vst [vmem:[#allocation105_spill] sm:$0xff] %v7221_v27  ;;  %9924 = vst [vmem:[#allocation106_spill] sm:$0xff] %v7225_v56 }
 0x19b   :  { %1213 = vmatpush1.msra.mxu0 %v7213_v20  ;;  %5005 = vmatpush3.msra.mxu1 %v6642_v57  ;;  %v7229_v20 = vld [vmem:[#allocation3 + $0x48] sm:$0xff] }
 0x19c   :  { %1214 = vmatprep.subr.mxu0 %v7217_v55  ;;  %5006 = vmatprep.subr.mxu1 %v9845_v16  ;;  %9925 = vst [vmem:[#allocation107_spill] sm:$0xff] %v7229_v20 }
 0x19d   :  { %1215 = vmatpush1.msra.mxu0 %v7221_v27  ;;  %5007 = vmatpush3.msra.mxu1 %v6649_v58 }
 0x19e   :  { %1216 = vmatprep.subr.mxu0 %v7225_v56  ;;  %5008 = vmatprep.subr.mxu1 %v9845_v16 }
 0x19f   :  { %1217 = vmatpush1.msra.mxu0 %v7229_v20  ;;  %5009 = vmatpush3.msra.mxu1 %v6655_v59 }
 0x1a0   :  { %1218 = vmatprep.subr.mxu0 %v6565_v41  ;;  %5010 = vmatprep.subr.mxu1 %v9845_v16 }
 0x1a1   :  { %1219 = vmatpush1.msra.mxu0 %v6572_v43  ;;  %5011 = vmatpush3.msra.mxu1 %v6661_v60 }
 0x1a2   :  { %1220 = vmatprep.subr.mxu0 %v6579_v45  ;;  %5012 = vmatprep.subr.mxu1 %v9845_v16 }
 0x1a3   :  { %1221 = vmatpush1.msra.mxu0 %v6582_v46  ;;  %5013 = vmatpush3.msra.mxu1 %v6667_v61 }
 0x1a4   :  { %1222 = vmatprep.subr.mxu0 %v6586_v47  ;;  %5014 = vmatprep.subr.mxu1 %v9845_v16 }
 0x1a5   :  { %1223 = vmatpush1.msra.mxu0 %v6593_v49  ;;  %5015 = vmatpush3.msra.mxu1 %v6673_v62 }
 0x1a6   :  { %1256 = vmatprep.mubr.f32.mxu0 %v9845_v16  ;;  %5016 = vmatprep.mubr.msk.f32.mxu1 %vm6359_vm1, %v9845_v16 }
 0x1a7   :  { %1355 = vmatprep.subr.mxu0 %v6734_v63  ;;  %5019 = vmatprep.subr.mxu1 %v9845_v16 }
 0x202   :  { %v784_v41 = vpop.f32.mrf.mxu0  ;;  %v855_v43 = vpop.f32.mrf.mxu1 }
 0x203   :  { %v859_v45 = vadd.f32 %v784_v41, %v6748_v11  ;;  %v873_v63 = vadd.f32 %v6796_v26, %v855_v43  ;;  %v7264_v26 = vld [vmem:[%s9527_s7] sm:$0x7]  ;;  %v9943_v43 = vld [vmem:[#allocation41_spill] sm:$0xff] }
 0x204   :  { %v4913_v46 = vpop.f32.mrf.mxu1  ;;  %v786_v57 = vpop.f32.mrf.mxu0 }
 0x205   :  { %v4374_v47 = vmul.f32 -1.442695, %v859_v45  ;;  %v866_v49 = vadd.f32 %v786_v57, %v6750_v13 }
 0x207   :  { %5701 = vpow2.f32 %v4374_v47  ;;  %v4375_v58 = vmul.f32 -1.442695, %v866_v49 }
 0x209   :  { %5703 = vpow2.f32 %v4375_v58 }
 0x214   :  { %v5702_v59 = vpop.eup %5701 }
 0x215   :  { %v863_v60 = vadd.f32 1.0, %v5702_v59  ;;  %v9944_v59 = vld [vmem:[#allocation42_spill] sm:$0xff] }
 0x216   :  { %v5704_v61 = vpop.eup %5703 }
 0x217   :  { %5705 = vrcp.f32 %v863_v60  ;;  %v870_v62 = vadd.f32 1.0, %v5704_v61  ;;  %v9945_v60 = vld [vmem:[#allocation43_spill] sm:$0xff] }
 0x219   :  { %5707 = vrcp.f32 %v870_v62  ;;  %v9946_v62 = vld [vmem:[#allocation44_spill] sm:$0xff] }
 0x223   :  { %v7253_v20 = vpop.f32.mrf.mxu1 }
 0x224   :  { %v5706_v56 = vpop.eup %5705 }
 0x225   :  { %v874_v27 = vmul.f32 %v5706_v56, %v873_v63  ;;  %v4948_v11 = vpop.f32.mrf.mxu1  ;;  %v9942_v56 = vld [vmem:[#allocation40_spill] sm:$0xff]  ;;  %v9947_v63 = vld [vmem:[#allocation45_spill] sm:$0xff] }
 0x226   :  { %v5708_v45 = vpop.eup %5707  ;;  %v9948_v11 = vld [vmem:[#allocation46_spill] sm:$0xff] }
 0x227   :  { %v875_v41 = vadd.f32 %v874_v27, %v6767_v30  ;;  %v877_v13 = vsub.f32 1.0, %v5708_v45  ;;  %v879_v57 = vmul.f32 %v5708_v45, %v6799_v6  ;;  %v947_v6 = vpop.f32.mrf.mxu0  ;;  %v9926_v27 = vsub.s32 0, %v6737_v2  ;;  %v9950_v45 = vld [vmem:[#allocation48_spill] sm:$0xff] }
 0x229   :  { %5709 = vtanh.f32 %v875_v41  ;;  %v7275_v30 = vrot.slane %v7264_v26, %v9926_v27  ;;  %v9949_v41 = vld [vmem:[#allocation47_spill] sm:$0xff] }
 0x22b   :  { %9927 = vst [vmem:[#allocation108_spill] sm:$0xff] %v7275_v30 }
 0x236   :  { %v5710_v46 = vpop.eup %5709 }
 0x237   :  { %v878_v47 = vmul.f32 %v5710_v46, %v877_v13  ;;  %v9951_v13 = vld [vmem:[#allocation49_spill] sm:$0xff]  ;;  %v9952_v46 = vld [vmem:[#allocation50_spill] sm:$0xff] }
 0x239   :  { %v7257_v49 = vadd.f32 %v879_v57, %v878_v47  ;;  %v9953_v47 = vld [vmem:[#allocation51_spill] sm:$0xff]  ;;  %v9954_v57 = vld [vmem:[#allocation53_spill] sm:$0xff] }
 0x23b   :  { %1257 = vmatmul.mubr.f32.vlgmr.msra.gmra.mxu0 %v7257_v49  ;;  %5017 = vmatmul.mubr.f32.vlgmr.msra.gmra.mxu1 %v7257_v49 }
 0x23c   :  { %1356 = vmatpush1.msra.mxu0 %v6801_v3  ;;  %5020 = vmatpush3.msra.mxu1 %v6803_v0  ;;  %v949_v0 = vpop.f32.mrf.mxu0  ;;  %v948_v3 = vadd.f32 %v947_v6, %v7275_v30  ;;  %v9955_v6 = vld [vmem:[#allocation52_spill] sm:$0xff] }
 0x23d   :  { %1357 = vmatprep.subr.mxu0 %v6805_v21  ;;  %5021 = vmatprep.subr.mxu1 %v9845_v16 }
 0x23e   :  { %1358 = vmatpush1.msra.mxu0 %v6809_v24  ;;  %5022 = vmatpush3.msra.mxu1 %v6811_v14  ;;  %v9928_v24 = vsub.s32 1, %v6737_v2 }
 0x23f   :  { %1359 = vmatprep.subr.mxu0 %v6815_v19  ;;  %5023 = vmatprep.subr.mxu1 %v9845_v16 }
 0x240   :  { %1360 = vmatpush1.msra.mxu0 %v6819_v28  ;;  %5024 = vmatpush3.msra.mxu1 %v6821_v32  ;;  %v7293_v14 = vrot.slane %v7264_v26, %v9928_v24  ;;  %v9958_v24 = vld [vmem:[#allocation55_spill] sm:$0xff] }
 0x241   :  { %1361 = vmatprep.subr.mxu0 %v6825_v34  ;;  %5025 = vmatprep.subr.mxu1 %v9845_v16 }
 0x242   :  { %1362 = vmatpush1.msra.mxu0 %v6829_v5  ;;  %5026 = vmatpush3.msra.mxu1 %v6831_v44  ;;  %9929 = vst [vmem:[#allocation109_spill] sm:$0xff] %v7293_v14  ;;  %v950_v44 = vadd.f32 %v949_v0, %v7293_v14  ;;  %v9956_v0 = vld [vmem:[#allocation54_spill] sm:$0xff] }
 0x243   :  { %1363 = vmatprep.subr.mxu0 %v6835_v9  ;;  %5027 = vmatprep.subr.mxu1 %v9845_v16  ;;  %v9934_v9 = vld [vmem:[#allocation32_spill] sm:$0xff] }
 0x244   :  { %v1088_v21 = vpop.f32.mrf.mxu0  ;;  %1364 = vmatpush1.msra.mxu0 %v6839_v39  ;;  %5028 = vmatpush3.msra.mxu1 %v6841_v7  ;;  %v9938_v39 = vld [vmem:[#allocation36_spill] sm:$0xff]  ;;  %v9939_v7 = vld [vmem:[#allocation37_spill] sm:$0xff] }
 0x245   :  { %v1163_v19 = vadd.f32 %v1088_v21, %v948_v3  ;;  %1365 = vmatprep.subr.mxu0 %v6845_v10  ;;  %5029 = vmatprep.subr.mxu1 %v9845_v16  ;;  %v9940_v10 = vld [vmem:[#allocation38_spill] sm:$0xff]  ;;  %v9957_v3 = vld [vmem:[#allocation56_spill] sm:$0xff] }
 0x246   :  { %1366 = vmatpush1.msra.mxu0 %v6849_v18  ;;  %5030 = vmatpush3.msra.mxu1 %v6851_v1  ;;  %v7299_v28 = vpop.f32.mrf.mxu1  ;;  %v1090_v34 = vpop.f32.mrf.mxu0  ;;  %v9931_v1 = vld [vmem:[#allocation29_spill] sm:$0xff]  ;;  %v9941_v18 = vld [vmem:[#allocation39_spill] sm:$0xff]  ;;  %v7358_v21 = vld [vmem:[%s9528_s8] ss:$0 sm:$0xff] }
 0x247   :  { %v4376_v32 = vmul.f32 -1.442695, %v1163_v19  ;;  %1367 = vmatprep.subr.mxu0 %v6855_v4  ;;  %5031 = vmatprep.subr.mxu1 %v9845_v16  ;;  %v1170_v4 = vadd.f32 %v1090_v34, %v950_v44  ;;  %v9959_v19 = vld [vmem:[#allocation57_spill] sm:$0xff]  ;;  %v9961_v34 = vsub.s32 2, %v6737_v2 }
 0x248   :  { %1368 = vmatpush1.msra.mxu0 %v6859_v40  ;;  %5032 = vmatpush3.msra.mxu1 %v6861_v12  ;;  %v4983_v5 = vpop.f32.mrf.mxu1  ;;  %v9930_v40 = vld [vmem:[#allocation28_spill] sm:$0xff]  ;;  %v9933_v12 = vld [vmem:[#allocation31_spill] sm:$0xff] }
 0x249   :  { %5711 = vpow2.f32 %v4376_v32  ;;  %1369 = vmatprep.subr.mxu0 %v6865_v38  ;;  %5033 = vmatprep.subr.mxu1 %v9845_v16  ;;  %v9932_v38 = vld [vmem:[#allocation30_spill] sm:$0xff]  ;;  %v9960_v32 = vld [vmem:[#allocation59_spill] sm:$0xff]  ;;  %v7367_v5 = vrot.slane %v7264_v26, %v9961_v34  ;;  %v9968_v26 = vld [vmem:[#allocation65_spill] sm:$0xff] }
 0x24a   :  { %1370 = vmatpush1.msra.mxu0 %v6869_v35  ;;  %5034 = vmatpush3.msra.mxu1 %v6871_v37  ;;  %v4377_v35 = vmul.f32 -1.442695, %v1170_v4  ;;  %v9936_v37 = vld [vmem:[#allocation34_spill] sm:$0xff]  ;;  %v1177_v4 = vadd.f32 %v7358_v21, %v7299_v28  ;;  %v9993_v34 = vld [vmem:[#allocation89_spill] sm:$0xff] }
 0x24b   :  { %1371 = vmatprep.subr.mxu0 %v6875_v33  ;;  %5035 = vmatprep.subr.mxu1 %v9845_v16  ;;  %v9935_v33 = vld [vmem:[#allocation33_spill] sm:$0xff]  ;;  %9962 = vst [vmem:[#allocation28_spill] sm:$0xff] %v7367_v5  ;;  %v1019_v28 = vadd.f32 %v7253_v20, %v7367_v5  ;;  %v9975_v20 = vld [vmem:[#allocation70_spill] sm:$0xff] }
 0x24c   :  { %1372 = vmatpush1.msra.mxu0 %v6879_v31  ;;  %5036 = vmatpush3.msra.mxu1 %v9930_v40  ;;  %v9937_v31 = vld [vmem:[#allocation35_spill] sm:$0xff]  ;;  %5713 = vpow2.f32 %v4377_v35  ;;  %v9963_v40 = vld [vmem:[#allocation58_spill] sm:$0xff] }
 0x24d   :  { %1373 = vmatprep.subr.mxu0 %v9931_v1  ;;  %5037 = vmatprep.subr.mxu1 %v9845_v16  ;;  %v9964_v1 = vld [vmem:[#allocation60_spill] sm:$0xff]  ;;  %v9967_v35 = vld [vmem:[#allocation63_spill] sm:$0xff] }
 0x24e   :  { %1374 = vmatpush1.msra.mxu0 %v9932_v38  ;;  %5038 = vmatpush3.msra.mxu1 %v9933_v12  ;;  %v9965_v38 = vld [vmem:[#allocation62_spill] sm:$0xff]  ;;  %v9966_v12 = vld [vmem:[#allocation61_spill] sm:$0xff] }
 0x24f   :  { %1375 = vmatprep.subr.mxu0 %v9934_v9  ;;  %5039 = vmatprep.subr.mxu1 %v9845_v16 }
 0x250   :  { %1376 = vmatpush1.msra.mxu0 %v9935_v33  ;;  %5040 = vmatpush3.msra.mxu1 %v9936_v37  ;;  %v9969_v33 = vld [vmem:[#allocation64_spill] sm:$0xff]  ;;  %v9970_v37 = vld [vmem:[#allocation66_spill] sm:$0xff] }
 0x251   :  { %1377 = vmatprep.subr.mxu0 %v9937_v31  ;;  %5041 = vmatprep.subr.mxu1 %v9845_v16  ;;  %v9971_v31 = vld [vmem:[#allocation68_spill] sm:$0xff] }
 0x252   :  { %1378 = vmatpush1.msra.mxu0 %v9938_v39  ;;  %5042 = vmatpush3.msra.mxu1 %v9939_v7  ;;  %v9972_v7 = vld [vmem:[#allocation67_spill] sm:$0xff] }
 0x253   :  { %1379 = vmatprep.subr.mxu0 %v9940_v10  ;;  %5043 = vmatprep.subr.mxu1 %v9845_v16  ;;  %v9973_v10 = vld [vmem:[#allocation69_spill] sm:$0xff] }
 0x254   :  { %1380 = vmatpush1.msra.mxu0 %v9941_v18  ;;  %5044 = vmatpush3.msra.mxu1 %v9942_v56  ;;  %v9974_v18 = vld [vmem:[#allocation71_spill] sm:$0xff]  ;;  %v9976_v56 = vld [vmem:[#allocation72_spill] sm:$0xff] }
 0x255   :  { %1381 = vmatprep.subr.mxu0 %v9943_v43  ;;  %5045 = vmatprep.subr.mxu1 %v9845_v16  ;;  %v9977_v43 = vld [vmem:[#allocation74_spill] sm:$0xff] }
 0x256   :  { %v5712_v58 = vpop.eup %5711  ;;  %1382 = vmatpush1.msra.mxu0 %v9944_v59  ;;  %5046 = vmatpush3.msra.mxu1 %v9945_v60  ;;  %v9979_v59 = vld [vmem:[#allocation75_spill] sm:$0xff]  ;;  %v9980_v60 = vld [vmem:[#allocation77_spill] sm:$0xff] }
 0x257   :  { %v1167_v61 = vadd.f32 1.0, %v5712_v58  ;;  %1383 = vmatprep.subr.mxu0 %v9946_v62  ;;  %5047 = vmatprep.subr.mxu1 %v9845_v16  ;;  %v9978_v58 = vld [vmem:[#allocation73_spill] sm:$0xff]  ;;  %v9982_v62 = vld [vmem:[#allocation78_spill] sm:$0xff] }
 0x258   :  { %1384 = vmatpush1.msra.mxu0 %v9947_v63  ;;  %5048 = vmatpush3.msra.mxu1 %v9948_v11  ;;  %v9983_v63 = vld [vmem:[#allocation80_spill] sm:$0xff]  ;;  %v9984_v11 = vld [vmem:[#allocation79_spill] sm:$0xff] }
 0x259   :  { %5715 = vrcp.f32 %v1167_v61  ;;  %1385 = vmatprep.subr.mxu0 %v9949_v41  ;;  %5049 = vmatprep.subr.mxu1 %v9845_v16  ;;  %v5714_v27 = vpop.eup %5713  ;;  %v9981_v61 = vld [vmem:[#allocation76_spill] sm:$0xff]  ;;  %v9985_v41 = vld [vmem:[#allocation81_spill] sm:$0xff] }
 0x25a   :  { %1386 = vmatpush1.msra.mxu0 %v9950_v45  ;;  %1419 = vmatprep.mubr.f32.mxu0 %v9845_v16  ;;  %v1174_v44 = vadd.f32 1.0, %v5714_v27  ;;  %v9986_v45 = vld [vmem:[#allocation83_spill] sm:$0xff] }
 0x25b   :  { %5050 = vmatpush3.msra.mxu1 %v9951_v13  ;;  %5051 = vmatprep.mubr.msk.f32.mxu1 %vm6359_vm1, %v9845_v16  ;;  %v9987_v13 = vld [vmem:[#allocation82_spill] sm:$0xff]  ;;  %v9991_v27 = vld [vmem:[#allocation87_spill] sm:$0xff] }
 0x25c   :  { %1420 = vmatmul.mubr.f32.vlgmr.msra.gmra.mxu0 %v7257_v49  ;;  %5052 = vmatmul.mubr.f32.vlgmr.msra.gmra.mxu1 %v7257_v49  ;;  %5717 = vrcp.f32 %v1174_v44 }
 0x25d   :  { %1496 = vmatprep.subr.mxu0 %v9952_v46  ;;  %5054 = vmatprep.subr.mxu1 %v9845_v16 }
 0x25e   :  { %1497 = vmatpush1.msra.mxu0 %v9953_v47  ;;  %5055 = vmatpush3.msra.mxu1 %v9954_v57  ;;  %v9988_v47 = vld [vmem:[#allocation84_spill] sm:$0xff]  ;;  %v9989_v57 = vld [vmem:[#allocation86_spill] sm:$0xff] }
 0x25f   :  { %1498 = vmatprep.subr.mxu0 %v9955_v6  ;;  %5056 = vmatprep.subr.mxu1 %v9845_v16  ;;  %v9990_v6 = vld [vmem:[#allocation85_spill] sm:$0xff] }
 0x260   :  { %1499 = vmatpush1.msra.mxu0 %v9956_v0  ;;  %5057 = vmatpush3.msra.mxu1 %v9957_v3  ;;  %v9992_v0 = vld [vmem:[#allocation88_spill] sm:$0xff] }
 0x261   :  { %1500 = vmatprep.subr.mxu0 %v9958_v24  ;;  %5058 = vmatprep.subr.mxu1 %v9845_v16 }
 0x262   :  { %1501 = vmatpush1.msra.mxu0 %v9959_v19  ;;  %5059 = vmatpush3.msra.mxu1 %v9960_v32 }
 0x263   :  { %1502 = vmatprep.subr.mxu0 %v9963_v40  ;;  %5060 = vmatprep.subr.mxu1 %v9845_v16  ;;  %v9999_v40 = vld [vmem:[#allocation95_spill] sm:$0xff] }
 0x264   :  { %1503 = vmatpush1.msra.mxu0 %v9964_v1  ;;  %5061 = vmatpush3.msra.mxu1 %v9965_v38  ;;  %v7445_v1 = vld [vmem:[#allocation3 + $0x160] sm:$0xff]  ;;  %v10000_v38 = vld [vmem:[#allocation96_spill] sm:$0xff] }
 0x265   :  { %1504 = vmatprep.subr.mxu0 %v9966_v12  ;;  %5062 = vmatprep.subr.mxu1 %v9845_v16  ;;  %v7451_v12 = vld [vmem:[#allocation3 + $0x148] sm:$0xff] }
 0x266   :  { %v5716_v2 = vpop.eup %5715  ;;  %1505 = vmatpush1.msra.mxu0 %v9967_v35  ;;  %5063 = vmatpush3.msra.mxu1 %v9968_v26  ;;  %v7463_v35 = vld [vmem:[#allocation3 + $0x118] sm:$0xff]  ;;  %v7469_v26 = vld [vmem:[#allocation3 + $0x100] sm:$0xff] }
 0x267   :  { %v1178_v9 = vmul.f32 %v5716_v2, %v1177_v4  ;;  %1506 = vmatprep.subr.mxu0 %v9969_v33  ;;  %5064 = vmatprep.subr.mxu1 %v9845_v16  ;;  %v9995_v4 = vld [vmem:[#allocation91_spill] sm:$0xff]  ;;  %v7457_v2 = vld [vmem:[#allocation3 + $0x130] sm:$0xff]  ;;  %v7487_v33 = vld [vmem:[#allocation3 + $0xb8] sm:$0xff] }
 0x268   :  { %1507 = vmatpush1.msra.mxu0 %v9970_v37  ;;  %5065 = vmatpush3.msra.mxu1 %v9971_v31  ;;  %v7493_v37 = vld [vmem:[#allocation3 + $0xa0] sm:$0xff]  ;;  %v7499_v31 = vld [vmem:[#allocation3 + $0x88] sm:$0xff] }
 0x269   :  { %v1179_v39 = vadd.f32 %v1178_v9, %v1019_v28  ;;  %1508 = vmatprep.subr.mxu0 %v9972_v7  ;;  %5066 = vmatprep.subr.mxu1 %v9845_v16  ;;  %v5718_v46 = vpop.eup %5717  ;;  %v7475_v28 = vld [vmem:[#allocation3 + $0xe8] sm:$0xff]  ;;  %v7481_v9 = vld [vmem:[#allocation3 + $0xd0] sm:$0xff]  ;;  %v10010_v7 = vld [vmem:[#allocation106_spill] sm:$0xff] }
 0x26a   :  { %1509 = vmatpush1.msra.mxu0 %v9973_v10  ;;  %5067 = vmatpush3.msra.mxu1 %v9974_v18  ;;  %v1181_v3 = vsub.f32 1.0, %v5718_v46  ;;  %v1183_v32 = vmul.f32 0.0, %v5718_v46  ;;  %v7511_v10 = vld [vmem:[#allocation3 + $0x58] sm:$0xff] }
 0x26b   :  { %5719 = vtanh.f32 %v1179_v39  ;;  %1510 = vmatprep.subr.mxu0 %v9975_v20  ;;  %5068 = vmatprep.subr.mxu1 %v9845_v16  ;;  %v7505_v39 = vld [vmem:[#allocation3 + $0x70] sm:$0xff]  ;;  %v7514_v18 = vld [vmem:[#allocation3 + $0x38] sm:$0xff]  ;;  %v7521_v20 = vld [vmem:[#allocation3 + $0x40] sm:$0xff] }
 0x26c   :  { %1511 = vmatpush1.msra.mxu0 %v9976_v56  ;;  %5069 = vmatpush3.msra.mxu1 %v9977_v43  ;;  %v7524_v56 = vld [vmem:[#allocation3 + $0x20] sm:$0xff]  ;;  %v7528_v43 = vld [vmem:[#allocation3 + $0x18] sm:$0xff] }
 0x26d   :  { %1512 = vmatprep.subr.mxu0 %v9978_v58  ;;  %5070 = vmatprep.subr.mxu1 %v9845_v16  ;;  %v7531_v58 = vld [vmem:[#allocation3 + $0x28] sm:$0xff] }
 0x26e   :  { %1513 = vmatpush1.msra.mxu0 %v9979_v59  ;;  %5071 = vmatpush3.msra.mxu1 %v9980_v60  ;;  %v7534_v59 = vld [vmem:[#allocation3 + $0x8] sm:$0xff]  ;;  %v7538_v60 = vld [vmem:[#allocation3] sm:$0xff] }
 0x26f   :  { %1514 = vmatprep.subr.mxu0 %v9981_v61  ;;  %5072 = vmatprep.subr.mxu1 %v9845_v16  ;;  %v7541_v61 = vld [vmem:[#allocation3 + $0x10] sm:$0xff] }
 0x270   :  { %1515 = vmatpush1.msra.mxu0 %v9982_v62  ;;  %5073 = vmatpush3.msra.mxu1 %v9983_v63  ;;  %v7547_v62 = vld [vmem:[#allocation5 + $0x170] sm:$0xff] }
 0x271   :  { %1516 = vmatprep.subr.mxu0 %v9984_v11  ;;  %5074 = vmatprep.subr.mxu1 %v9845_v16 }
 0x272   :  { %1517 = vmatpush1.msra.mxu0 %v9985_v41  ;;  %5075 = vmatpush3.msra.mxu1 %v9986_v45  ;;  %v10012_v41 = vld [vmem:[#allocation10_spill] sm:$0xff] }
 0x273   :  { %1518 = vmatprep.subr.mxu0 %v9987_v13  ;;  %5076 = vmatprep.subr.mxu1 %v9845_v16 }
 0x274   :  { %1519 = vmatpush1.msra.mxu0 %v9988_v47  ;;  %5077 = vmatpush3.msra.mxu1 %v9989_v57  ;;  %v10013_v57 = vld [vmem:[#allocation11_spill] sm:$0xff] }
 0x275   :  { %1520 = vmatprep.subr.mxu0 %v9990_v6  ;;  %5078 = vmatprep.subr.mxu1 %v9845_v16 }
 0x276   :  { %1521 = vmatpush1.msra.mxu0 %v9991_v27  ;;  %5079 = vmatpush3.msra.mxu1 %v7090_v15  ;;  %v9994_v15 = vld [vmem:[#allocation90_spill] sm:$0xff] }
 0x277   :  { %1522 = vmatprep.subr.mxu0 %v9992_v0  ;;  %5080 = vmatprep.subr.mxu1 %v9845_v16 }
 0x278   :  { %v5720_v24 = vpop.eup %5719  ;;  %1523 = vmatpush1.msra.mxu0 %v7093_v25  ;;  %5081 = vmatpush3.msra.mxu1 %v7100_v17  ;;  %v9996_v17 = vld [vmem:[#allocation92_spill] sm:$0xff]  ;;  %v9998_v25 = vld [vmem:[#allocation94_spill] sm:$0xff] }
 0x279   :  { %1524 = vmatprep.subr.mxu0 %v7097_v22  ;;  %5082 = vmatprep.subr.mxu1 %v9845_v16  ;;  %v1182_v19 = vmul.f32 %v5720_v24, %v1181_v3  ;;  %v9997_v22 = vld [vmem:[#allocation93_spill] sm:$0xff] }
 0x27a   :  { %1525 = vmatpush1.msra.mxu0 %v9993_v34  ;;  %5083 = vmatpush3.msra.mxu1 %v7110_v23  ;;  %v7439_v23 = vld [vmem:[#allocation3 + $0x178] sm:$0xff] }
 0x27b   :  { %1526 = vmatprep.subr.mxu0 %v9994_v15  ;;  %5084 = vmatprep.subr.mxu1 %v9845_v16  ;;  %v7423_v44 = vadd.f32 %v1183_v32, %v1182_v19  ;;  %v7556_v32 = vld [vmem:[%s9524_s4] ss:$0 sm:$0xff] }
 0x27c   :  { %1527 = vmatpush1.msra.mxu0 %v9995_v4  ;;  %1560 = vmatprep.mubr.f32.mxu0 %v9845_v16 }
 0x27d   :  { %5085 = vmatpush3.msra.mxu1 %v9996_v17  ;;  %5086 = vmatprep.mubr.msk.f32.mxu1 %vm6359_vm1, %v9845_v16  ;;  %1185 = vst [vmem:[%s9529_s9] sm:$0xff] %v7423_v44 }
 0x27e   :  { %1561 = vmatmul.mubr.f32.vlgmr.msra.gmra.mxu0 %v7423_v44  ;;  %5087 = vmatmul.mubr.f32.vlgmr.msra.gmra.mxu1 %v7423_v44 }
 0x27f   :  { %1667 = vmatprep.subr.mxu0 %v9997_v22  ;;  %5089 = vmatprep.subr.mxu1 %v9845_v16 }
 0x280   :  { %1668 = vmatpush1.msra.mxu0 %v9998_v25  ;;  %5090 = vmatpush3.msra.mxu1 %v7439_v23  ;;  %v10014_v25 = vld [vmem:[#allocation23_spill] sm:$0xff] }
 0x281   :  { %1669 = vmatprep.subr.mxu0 %v7137_v8  ;;  %5091 = vmatprep.subr.mxu1 %v9845_v16  ;;  %v10001_v8 = vld [vmem:[#allocation97_spill] sm:$0xff] }
 0x282   :  { %1670 = vmatpush1.msra.mxu0 %v9999_v40  ;;  %5092 = vmatpush3.msra.mxu1 %v7445_v1 }
 0x283   :  { %1671 = vmatprep.subr.mxu0 %v7145_v29  ;;  %5093 = vmatprep.subr.mxu1 %v9845_v16  ;;  %v10002_v29 = vld [vmem:[#allocation98_spill] sm:$0xff] }
 0x284   :  { %1672 = vmatpush1.msra.mxu0 %v10000_v38  ;;  %5094 = vmatpush3.msra.mxu1 %v7451_v12 }
 0x285   :  { %1673 = vmatprep.subr.mxu0 %v7153_v36  ;;  %5095 = vmatprep.subr.mxu1 %v9845_v16  ;;  %v10003_v36 = vld [vmem:[#allocation99_spill] sm:$0xff] }
 0x286   :  { %1674 = vmatpush1.msra.mxu0 %v10001_v8  ;;  %5096 = vmatpush3.msra.mxu1 %v7457_v2 }
 0x287   :  { %1675 = vmatprep.subr.mxu0 %v7161_v42  ;;  %5097 = vmatprep.subr.mxu1 %v9845_v16  ;;  %v10004_v42 = vld [vmem:[#allocation100_spill] sm:$0xff] }
 0x288   :  { %1676 = vmatpush1.msra.mxu0 %v10002_v29  ;;  %5098 = vmatpush3.msra.mxu1 %v7463_v35 }
 0x289   :  { %1677 = vmatprep.subr.mxu0 %v7169_v48  ;;  %5099 = vmatprep.subr.mxu1 %v9845_v16  ;;  %v10005_v48 = vld [vmem:[#allocation101_spill] sm:$0xff] }
 0x28a   :  { %1678 = vmatpush1.msra.mxu0 %v10003_v36  ;;  %5100 = vmatpush3.msra.mxu1 %v7469_v26 }
 0x28b   :  { %1679 = vmatprep.subr.mxu0 %v7177_v50  ;;  %5101 = vmatprep.subr.mxu1 %v9845_v16  ;;  %v10006_v50 = vld [vmem:[#allocation102_spill] sm:$0xff] }
 0x28c   :  { %1680 = vmatpush1.msra.mxu0 %v10004_v42  ;;  %5102 = vmatpush3.msra.mxu1 %v7475_v28 }
 0x28d   :  { %1681 = vmatprep.subr.mxu0 %v7185_v51  ;;  %5103 = vmatprep.subr.mxu1 %v9845_v16  ;;  %v10007_v51 = vld [vmem:[#allocation103_spill] sm:$0xff] }
 0x28e   :  { %1682 = vmatpush1.msra.mxu0 %v10005_v48  ;;  %5104 = vmatpush3.msra.mxu1 %v7481_v9 }
 0x28f   :  { %1683 = vmatprep.subr.mxu0 %v7193_v52  ;;  %5105 = vmatprep.subr.mxu1 %v9845_v16  ;;  %v10008_v52 = vld [vmem:[#allocation104_spill] sm:$0xff] }
 0x290   :  { %1684 = vmatpush1.msra.mxu0 %v10006_v50  ;;  %5106 = vmatpush3.msra.mxu1 %v7487_v33  ;;  %v7567_v50 = vld [vmem:[#allocation5 + $0x168] sm:$0xff] }
 0x291   :  { %1685 = vmatprep.subr.mxu0 %v7201_v53  ;;  %5107 = vmatprep.subr.mxu1 %v9845_v16  ;;  %v10009_v53 = vld [vmem:[#allocation105_spill] sm:$0xff] }
 0x292   :  { %1686 = vmatpush1.msra.mxu0 %v10007_v51  ;;  %5108 = vmatpush3.msra.mxu1 %v7493_v37  ;;  %v7570_v51 = vld [vmem:[#allocation5 + $0x178] sm:$0xff] }
 0x293   :  { %1687 = vmatprep.subr.mxu0 %v7209_v54  ;;  %5109 = vmatprep.subr.mxu1 %v9845_v16  ;;  %v10011_v54 = vld [vmem:[#allocation107_spill] sm:$0xff] }
 0x294   :  { %1688 = vmatpush1.msra.mxu0 %v10008_v52  ;;  %5110 = vmatpush3.msra.mxu1 %v7499_v31  ;;  %v7573_v52 = vld [vmem:[#allocation5 + $0x158] sm:$0xff] }
 0x295   :  { %1689 = vmatprep.subr.mxu0 %v7217_v55  ;;  %5111 = vmatprep.subr.mxu1 %v9845_v16  ;;  %v7518_v55 = vld [vmem:[#allocation3 + $0x30] sm:$0xff] }
 0x296   :  { %1690 = vmatpush1.msra.mxu0 %v10009_v53  ;;  %5112 = vmatpush3.msra.mxu1 %v7505_v39  ;;  %v7580_v53 = vld [vmem:[#allocation5 + $0x160] sm:$0xff] }
 0x297   :  { %1691 = vmatprep.subr.mxu0 %v10010_v7  ;;  %5113 = vmatprep.subr.mxu1 %v9845_v16 }
 0x298   :  { %1692 = vmatpush1.msra.mxu0 %v10011_v54  ;;  %5114 = vmatpush3.msra.mxu1 %v7511_v10  ;;  %v7583_v54 = vld [vmem:[#allocation5 + $0x140] sm:$0xff] }
 0x299   :  { %1693 = vmatprep.subr.mxu0 %v7514_v18  ;;  %5115 = vmatprep.subr.mxu1 %v9845_v16 }
 0x29a   :  { %1694 = vmatpush1.msra.mxu0 %v7518_v55  ;;  %5116 = vmatpush3.msra.mxu1 %v7521_v20 }
 0x29b   :  { %1695 = vmatprep.subr.mxu0 %v7524_v56  ;;  %5117 = vmatprep.subr.mxu1 %v9845_v16 }
 0x29c   :  { %1696 = vmatpush1.msra.mxu0 %v7528_v43  ;;  %5118 = vmatpush3.msra.mxu1 %v7531_v58 }
 0x29d   :  { %1697 = vmatprep.subr.mxu0 %v7534_v59  ;;  %5119 = vmatprep.subr.mxu1 %v9845_v16 }
 0x29e   :  { %1698 = vmatpush1.msra.mxu0 %v7538_v60  ;;  %5120 = vmatpush3.msra.mxu1 %v7541_v61 }
 0x29f   :  { %1731 = vmatprep.mubr.f32.mxu0 %v9845_v16  ;;  %5121 = vmatprep.mubr.msk.f32.mxu1 %vm6359_vm1, %v9845_v16 }
 0x2a0   :  { %1830 = vmatprep.subr.mxu0 %v7547_v62  ;;  %5124 = vmatprep.subr.mxu1 %v9845_v16 }
 0x2fb   :  { %v1258_v63 = vpop.f32.mrf.mxu0  ;;  %v1329_v11 = vpop.f32.mrf.mxu1 }
 0x2fc   :  { %v1333_v45 = vadd.f32 %v1258_v63, %v10012_v41  ;;  %v1347_v34 = vadd.f32 %v7556_v32, %v1329_v11  ;;  %v7587_v63 = vld [vmem:[#allocation5 + $0x138] sm:$0xff]  ;;  %v7590_v11 = vld [vmem:[#allocation5 + $0x148] sm:$0xff] }
 0x2fd   :  { %v5018_v13 = vpop.f32.mrf.mxu1  ;;  %v1260_v47 = vpop.f32.mrf.mxu0  ;;  %v7593_v41 = vld [vmem:[#allocation5 + $0x128] sm:$0xff] }
 0x2fe   :  { %v4378_v46 = vmul.f32 -1.442695, %v1333_v45  ;;  %v1340_v6 = vadd.f32 %v1260_v47, %v10013_v57  ;;  %v7597_v45 = vld [vmem:[#allocation5 + $0x120] sm:$0xff]  ;;  %v7600_v13 = vld [vmem:[#allocation5 + $0x130] sm:$0xff] }
 0x2ff   :  { %v7603_v47 = vld [vmem:[#allocation5 + $0x110] sm:$0xff] }
 0x300   :  { %5721 = vpow2.f32 %v4378_v46  ;;  %v4379_v27 = vmul.f32 -1.442695, %v1340_v6  ;;  %v7608_v6 = vld [vmem:[#allocation5 + $0x108] sm:$0xff] }
 0x302   :  { %5723 = vpow2.f32 %v4379_v27  ;;  %v7611_v27 = vld [vmem:[#allocation5 + $0x118] sm:$0xff] }
 0x30d   :  { %v5722_v0 = vpop.eup %5721 }
 0x30e   :  { %v1337_v3 = vadd.f32 1.0, %v5722_v0 }
 0x30f   :  { %v5724_v24 = vpop.eup %5723 }
 0x310   :  { %5725 = vrcp.f32 %v1337_v3  ;;  %v1344_v19 = vadd.f32 1.0, %v5724_v24  ;;  %v7616_v24 = vld [vmem:[#allocation5 + $0xf8] sm:$0xff] }
 0x312   :  { %5727 = vrcp.f32 %v1344_v19 }
 0x31c   :  { %v7559_v15 = vpop.f32.mrf.mxu1  ;;  %v1421_v7 = vpop.f32.mrf.mxu0 }
 0x31d   :  { %v5726_v4 = vpop.eup %5725  ;;  %v1422_v57 = vadd.f32 %v1421_v7, %v7275_v30  ;;  %v7644_v7 = vld [vmem:[#allocation5 + $0xd0] sm:$0xff] }
 0x31e   :  { %v1348_v17 = vmul.f32 %v5726_v4, %v1347_v34  ;;  %v5053_v22 = vpop.f32.mrf.mxu1  ;;  %v1423_v46 = vpop.f32.mrf.mxu0  ;;  %v7620_v34 = vld [vmem:[#allocation5 + $0xf0] sm:$0xff]  ;;  %v7623_v4 = vld [vmem:[#allocation5 + $0x100] sm:$0xff] }
 0x31f   :  { %v5728_v38 = vpop.eup %5727  ;;  %v7626_v22 = vld [vmem:[#allocation5 + $0xe0] sm:$0xff] }
 0x320   :  { %v1349_v40 = vadd.f32 %v1348_v17, %v10014_v25  ;;  %v1351_v8 = vsub.f32 1.0, %v5728_v38  ;;  %v1353_v42 = vmul.f32 %v5728_v38, %v7257_v49  ;;  %v7577_v49 = vld [vmem:[#allocation5 + $0x150] sm:$0xff]  ;;  %v7633_v38 = vld [vmem:[#allocation5 + $0xe8] sm:$0xff] }
 0x322   :  { %5729 = vtanh.f32 %v1349_v40  ;;  %v7630_v40 = vld [vmem:[#allocation5 + $0xd8] sm:$0xff] }
 0x32f   :  { %v5730_v29 = vpop.eup %5729 }
 0x330   :  { %v1352_v36 = vmul.f32 %v5730_v29, %v1351_v8  ;;  %v7636_v29 = vld [vmem:[#allocation5 + $0xc8] sm:$0xff] }
 0x332   :  { %v7563_v48 = vadd.f32 %v1353_v42, %v1352_v36  ;;  %v1424_v36 = vadd.f32 %v1423_v46, %v7293_v14  ;;  %v7641_v42 = vld [vmem:[#allocation5 + $0xc0] sm:$0xff]  ;;  %v7654_v46 = vld [vmem:[#allocation5 + $0xb8] sm:$0xff] }
 0x333   :  { %10017 = vst [vmem:[#allocation31_spill] sm:$0xff] %v7654_v46 }
 0x334   :  { %1732 = vmatmul.mubr.f32.vlgmr.msra.gmra.mxu0 %v7563_v48  ;;  %5122 = vmatmul.mubr.f32.vlgmr.msra.gmra.mxu1 %v7563_v48 }
 0x335   :  { %1831 = vmatpush1.msra.mxu0 %v7567_v50  ;;  %5125 = vmatpush3.msra.mxu1 %v7570_v51 }
 0x336   :  { %1832 = vmatprep.subr.mxu0 %v7573_v52  ;;  %5126 = vmatprep.subr.mxu1 %v9845_v16 }
 0x337   :  { %1833 = vmatpush1.msra.mxu0 %v7577_v49  ;;  %5127 = vmatpush3.msra.mxu1 %v7580_v53 }
 0x338   :  { %1834 = vmatprep.subr.mxu0 %v7583_v54  ;;  %5128 = vmatprep.subr.mxu1 %v9845_v16 }
 0x339   :  { %1835 = vmatpush1.msra.mxu0 %v7587_v63  ;;  %5129 = vmatpush3.msra.mxu1 %v7590_v11 }
 0x33a   :  { %1836 = vmatprep.subr.mxu0 %v7593_v41  ;;  %5130 = vmatprep.subr.mxu1 %v9845_v16 }
 0x33b   :  { %1837 = vmatpush1.msra.mxu0 %v7597_v45  ;;  %5131 = vmatpush3.msra.mxu1 %v7600_v13 }
 0x33c   :  { %1838 = vmatprep.subr.mxu0 %v7603_v47  ;;  %5132 = vmatprep.subr.mxu1 %v9845_v16 }
 0x33d   :  { %1839 = vmatpush1.msra.mxu0 %v7608_v6  ;;  %5133 = vmatpush3.msra.mxu1 %v7611_v27 }
 0x33e   :  { %v1562_v0 = vpop.f32.mrf.mxu0  ;;  %v7614_v3 = vpop.f32.mrf.mxu1  ;;  %1840 = vmatprep.subr.mxu0 %v7616_v24  ;;  %5134 = vmatprep.subr.mxu1 %v9845_v16 }
 0x33f   :  { %v1637_v19 = vadd.f32 %v1562_v0, %v1422_v57  ;;  %1841 = vmatpush1.msra.mxu0 %v7620_v34  ;;  %5135 = vmatpush3.msra.mxu1 %v7623_v4  ;;  %v7647_v57 = vld [vmem:[#allocation5 + $0xb0] sm:$0xff] }
 0x340   :  { %v5088_v17 = vpop.f32.mrf.mxu1  ;;  %1842 = vmatprep.subr.mxu0 %v7626_v22  ;;  %5136 = vmatprep.subr.mxu1 %v9845_v16  ;;  %v1564_v8 = vpop.f32.mrf.mxu0  ;;  %10015 = vst [vmem:[#allocation29_spill] sm:$0xff] %v7647_v57 }
 0x341   :  { %v4380_v25 = vmul.f32 -1.442695, %v1637_v19  ;;  %1843 = vmatpush1.msra.mxu0 %v7630_v40  ;;  %5137 = vmatpush3.msra.mxu1 %v7633_v38  ;;  %v1644_v0 = vadd.f32 %v1564_v8, %v1424_v36  ;;  %v7651_v19 = vld [vmem:[#allocation5 + $0xa8] sm:$0xff]  ;;  %v7657_v17 = vld [vmem:[#allocation5 + $0x98] sm:$0xff]  ;;  %v7667_v8 = vld [vmem:[#allocation5 + $0x80] sm:$0xff] }
 0x342   :  { %1844 = vmatprep.subr.mxu0 %v7636_v29  ;;  %5138 = vmatprep.subr.mxu1 %v9845_v16  ;;  %10016 = vst [vmem:[#allocation30_spill] sm:$0xff] %v7651_v19  ;;  %10018 = vst [vmem:[#allocation32_spill] sm:$0xff] %v7657_v17 }
 0x343   :  { %5731 = vpow2.f32 %v4380_v25  ;;  %1845 = vmatpush1.msra.mxu0 %v7641_v42  ;;  %5139 = vmatpush3.msra.mxu1 %v7644_v7  ;;  %v7661_v25 = vld [vmem:[#allocation5 + $0x90] sm:$0xff]  ;;  %10021 = vst [vmem:[#allocation35_spill] sm:$0xff] %v7667_v8  ;;  %v4381_v36 = vmul.f32 -1.442695, %v1644_v0 }
 0x344   :  { %1846 = vmatprep.subr.mxu0 %v7647_v57  ;;  %5140 = vmatprep.subr.mxu1 %v9845_v16  ;;  %10019 = vst [vmem:[#allocation33_spill] sm:$0xff] %v7661_v25  ;;  %v7664_v57 = vld [vmem:[#allocation5 + $0xa0] sm:$0xff]  ;;  %v7687_v0 = vld [vmem:[#allocation5 + $0x50] sm:$0xff] }
 0x345   :  { %1847 = vmatpush1.msra.mxu0 %v7651_v19  ;;  %5141 = vmatpush3.msra.mxu1 %v7654_v46  ;;  %10020 = vst [vmem:[#allocation34_spill] sm:$0xff] %v7664_v57  ;;  %v7671_v46 = vld [vmem:[#allocation5 + $0x78] sm:$0xff]  ;;  %10027 = vst [vmem:[#allocation41_spill] sm:$0xff] %v7687_v0  ;;  %5733 = vpow2.f32 %v4381_v36 }
 0x346   :  { %1848 = vmatprep.subr.mxu0 %v7657_v17  ;;  %5142 = vmatprep.subr.mxu1 %v9845_v16  ;;  %10022 = vst [vmem:[#allocation36_spill] sm:$0xff] %v7671_v46  ;;  %v7674_v17 = vld [vmem:[#allocation5 + $0x88] sm:$0xff]  ;;  %v7784_v19 = vld [vmem:[#allocation7 + $0xf8] sm:$0xff] }
 0x347   :  { %1849 = vmatpush1.msra.mxu0 %v7661_v25  ;;  %5143 = vmatpush3.msra.mxu1 %v7664_v57  ;;  %10023 = vst [vmem:[#allocation37_spill] sm:$0xff] %v7674_v17  ;;  %v7677_v25 = vld [vmem:[#allocation5 + $0x68] sm:$0xff]  ;;  %v7681_v57 = vld [vmem:[#allocation5 + $0x60] sm:$0xff]  ;;  %10054 = vst [vmem:[#allocation67_spill] sm:$0xff] %v7784_v19 }
 0x348   :  { %1850 = vmatprep.subr.mxu0 %v7667_v8  ;;  %5144 = vmatprep.subr.mxu1 %v9845_v16  ;;  %10024 = vst [vmem:[#allocation38_spill] sm:$0xff] %v7677_v25  ;;  %10025 = vst [vmem:[#allocation39_spill] sm:$0xff] %v7681_v57  ;;  %v7684_v8 = vld [vmem:[#allocation5 + $0x70] sm:$0xff] }
 0x349   :  { %1851 = vmatpush1.msra.mxu0 %v7671_v46  ;;  %5145 = vmatpush3.msra.mxu1 %v7674_v17  ;;  %10026 = vst [vmem:[#allocation40_spill] sm:$0xff] %v7684_v8  ;;  %v7691_v17 = vld [vmem:[#allocation5 + $0x48] sm:$0xff]  ;;  %v7711_v46 = vld [vmem:[#allocation5 + $0x18] sm:$0xff] }
 0x34a   :  { %1852 = vmatprep.subr.mxu0 %v7677_v25  ;;  %5146 = vmatprep.subr.mxu1 %v9845_v16  ;;  %10028 = vst [vmem:[#allocation42_spill] sm:$0xff] %v7691_v17  ;;  %v7694_v25 = vld [vmem:[#allocation5 + $0x58] sm:$0xff]  ;;  %10034 = vst [vmem:[#allocation48_spill] sm:$0xff] %v7711_v46 }
 0x34b   :  { %1853 = vmatpush1.msra.mxu0 %v7681_v57  ;;  %5147 = vmatpush3.msra.mxu1 %v7684_v8  ;;  %10029 = vst [vmem:[#allocation43_spill] sm:$0xff] %v7694_v25  ;;  %v7697_v57 = vld [vmem:[#allocation5 + $0x38] sm:$0xff]  ;;  %v7701_v8 = vld [vmem:[#allocation5 + $0x30] sm:$0xff] }
 0x34c   :  { %1854 = vmatprep.subr.mxu0 %v7687_v0  ;;  %5148 = vmatprep.subr.mxu1 %v9845_v16  ;;  %10030 = vst [vmem:[#allocation44_spill] sm:$0xff] %v7697_v57  ;;  %10031 = vst [vmem:[#allocation45_spill] sm:$0xff] %v7701_v8  ;;  %v7704_v0 = vld [vmem:[#allocation5 + $0x40] sm:$0xff] }
 0x34d   :  { %1855 = vmatpush1.msra.mxu0 %v7691_v17  ;;  %5149 = vmatpush3.msra.mxu1 %v7694_v25  ;;  %10032 = vst [vmem:[#allocation46_spill] sm:$0xff] %v7704_v0  ;;  %v7707_v17 = vld [vmem:[#allocation5 + $0x20] sm:$0xff] }
 0x34e   :  { %1856 = vmatprep.subr.mxu0 %v7697_v57  ;;  %5150 = vmatprep.subr.mxu1 %v9845_v16  ;;  %10033 = vst [vmem:[#allocation47_spill] sm:$0xff] %v7707_v17  ;;  %v7714_v57 = vld [vmem:[#allocation5 + $0x28] sm:$0xff] }
 0x34f   :  { %1857 = vmatpush1.msra.mxu0 %v7701_v8  ;;  %5151 = vmatpush3.msra.mxu1 %v7704_v0  ;;  %10035 = vst [vmem:[#allocation49_spill] sm:$0xff] %v7714_v57  ;;  %v7717_v8 = vld [vmem:[#allocation5 + $0x8] sm:$0xff]  ;;  %v7721_v0 = vld [vmem:[#allocation5] sm:$0xff] }
 0x350   :  { %v5732_v36 = vpop.eup %5731  ;;  %1858 = vmatprep.subr.mxu0 %v7707_v17  ;;  %5152 = vmatprep.subr.mxu1 %v9845_v16  ;;  %10036 = vst [vmem:[#allocation50_spill] sm:$0xff] %v7717_v8  ;;  %10037 = vst [vmem:[#allocation51_spill] sm:$0xff] %v7721_v0  ;;  %v7766_v17 = vld [vmem:[#allocation7 + $0x120] sm:$0xff] }
 0x351   :  { %v1641_v25 = vadd.f32 1.0, %v5732_v36  ;;  %1859 = vmatpush1.msra.mxu0 %v7711_v46  ;;  %5153 = vmatpush3.msra.mxu1 %v7714_v57  ;;  %v7725_v36 = vld [vmem:[#allocation5 + $0x10] sm:$0xff]  ;;  %10049 = vst [vmem:[#allocation63_spill] sm:$0xff] %v7766_v17 }
 0x352   :  { %1860 = vmatprep.subr.mxu0 %v7717_v8  ;;  %5154 = vmatprep.subr.mxu1 %v9845_v16  ;;  %10038 = vst [vmem:[#allocation53_spill] sm:$0xff] %v7725_v36  ;;  %v7732_v8 = vld [vmem:[#allocation7 + $0x170] sm:$0xff]  ;;  %v5734_v46 = vpop.eup %5733 }
 0x353   :  { %5735 = vrcp.f32 %v1641_v25  ;;  %1861 = vmatpush1.msra.mxu0 %v7721_v0  ;;  %1894 = vmatprep.mubr.f32.mxu0 %v9845_v16  ;;  %10039 = vst [vmem:[#allocation52_spill] sm:$0xff] %v7732_v8  ;;  %v7736_v25 = vld [vmem:[#allocation7 + $0x168] sm:$0xff]  ;;  %v7739_v0 = vld [vmem:[#allocation7 + $0x178] sm:$0xff]  ;;  %v7746_v57 = vld [vmem:[#allocation7 + $0x150] sm:$0xff] }
 0x354   :  { %5155 = vmatpush3.msra.mxu1 %v7725_v36  ;;  %5156 = vmatprep.mubr.msk.f32.mxu1 %vm6359_vm1, %v9845_v16  ;;  %10040 = vst [vmem:[#allocation54_spill] sm:$0xff] %v7736_v25  ;;  %10041 = vst [vmem:[#allocation56_spill] sm:$0xff] %v7739_v0  ;;  %v7742_v36 = vld [vmem:[#allocation7 + $0x158] sm:$0xff] }
 0x355   :  { %1895 = vmatmul.mubr.f32.vlgmr.msra.gmra.mxu0 %v7563_v48  ;;  %5157 = vmatmul.mubr.f32.vlgmr.msra.gmra.mxu1 %v7563_v48  ;;  %10042 = vst [vmem:[#allocation55_spill] sm:$0xff] %v7742_v36  ;;  %10043 = vst [vmem:[#allocation57_spill] sm:$0xff] %v7746_v57 }
 0x356   :  { %1971 = vmatprep.subr.mxu0 %v7732_v8  ;;  %5159 = vmatprep.subr.mxu1 %v9845_v16  ;;  %v7749_v8 = vld [vmem:[#allocation7 + $0x160] sm:$0xff] }
 0x357   :  { %1972 = vmatpush1.msra.mxu0 %v7736_v25  ;;  %5160 = vmatpush3.msra.mxu1 %v7739_v0  ;;  %10044 = vst [vmem:[#allocation59_spill] sm:$0xff] %v7749_v8  ;;  %v7752_v25 = vld [vmem:[#allocation7 + $0x140] sm:$0xff]  ;;  %v7756_v0 = vld [vmem:[#allocation7 + $0x138] sm:$0xff] }
 0x358   :  { %1973 = vmatprep.subr.mxu0 %v7742_v36  ;;  %5161 = vmatprep.subr.mxu1 %v9845_v16  ;;  %10045 = vst [vmem:[#allocation58_spill] sm:$0xff] %v7752_v25  ;;  %10046 = vst [vmem:[#allocation60_spill] sm:$0xff] %v7756_v0  ;;  %v7759_v36 = vld [vmem:[#allocation7 + $0x148] sm:$0xff] }
 0x359   :  { %1974 = vmatpush1.msra.mxu0 %v7746_v57  ;;  %5162 = vmatpush3.msra.mxu1 %v7749_v8  ;;  %10047 = vst [vmem:[#allocation62_spill] sm:$0xff] %v7759_v36  ;;  %v7762_v57 = vld [vmem:[#allocation7 + $0x128] sm:$0xff]  ;;  %v1648_v8 = vadd.f32 1.0, %v5734_v46  ;;  %v7781_v46 = vld [vmem:[#allocation7 + $0x118] sm:$0xff] }
 0x35a   :  { %1975 = vmatprep.subr.mxu0 %v7752_v25  ;;  %5163 = vmatprep.subr.mxu1 %v9845_v16  ;;  %10048 = vst [vmem:[#allocation61_spill] sm:$0xff] %v7762_v57  ;;  %v7769_v25 = vld [vmem:[#allocation7 + $0x130] sm:$0xff]  ;;  %10053 = vst [vmem:[#allocation68_spill] sm:$0xff] %v7781_v46 }
 0x35b   :  { %1976 = vmatpush1.msra.mxu0 %v7756_v0  ;;  %5164 = vmatpush3.msra.mxu1 %v7759_v36  ;;  %10050 = vst [vmem:[#allocation65_spill] sm:$0xff] %v7769_v25  ;;  %v7772_v0 = vld [vmem:[#allocation7 + $0x110] sm:$0xff]  ;;  %v7778_v36 = vld [vmem:[#allocation7 + $0x108] sm:$0xff]  ;;  %5737 = vrcp.f32 %v1648_v8 }
 0x35c   :  { %1977 = vmatprep.subr.mxu0 %v7762_v57  ;;  %5165 = vmatprep.subr.mxu1 %v9845_v16  ;;  %10051 = vst [vmem:[#allocation64_spill] sm:$0xff] %v7772_v0  ;;  %v1651_v57 = vadd.f32 %v7358_v21, %v7614_v3  ;;  %10052 = vst [vmem:[#allocation66_spill] sm:$0xff] %v7778_v36  ;;  %v7790_v21 = vld [vmem:[#allocation7 + $0xf0] sm:$0xff]  ;;  %v7793_v3 = vld [vmem:[#allocation7 + $0x100] sm:$0xff] }
 0x35d   :  { %1978 = vmatpush1.msra.mxu0 %v7766_v17  ;;  %5166 = vmatpush3.msra.mxu1 %v7769_v25  ;;  %10055 = vst [vmem:[#allocation69_spill] sm:$0xff] %v7793_v3  ;;  %v7813_v8 = vld [vmem:[#allocation7 + $0xd0] sm:$0xff] }
 0x35e   :  { %1979 = vmatprep.subr.mxu0 %v7772_v0  ;;  %5167 = vmatprep.subr.mxu1 %v9845_v16  ;;  %v1493_v0 = vadd.f32 %v7559_v15, %v7367_v5  ;;  %v7803_v15 = vld [vmem:[#allocation7 + $0xe8] sm:$0xff]  ;;  %10061 = vst [vmem:[#allocation75_spill] sm:$0xff] %v7813_v8 }
 0x35f   :  { %1980 = vmatpush1.msra.mxu0 %v7778_v36  ;;  %5168 = vmatpush3.msra.mxu1 %v7781_v46  ;;  %v7796_v46 = vld [vmem:[#allocation7 + $0xe0] sm:$0xff]  ;;  %v7800_v36 = vld [vmem:[#allocation7 + $0xd8] sm:$0xff]  ;;  %10058 = vst [vmem:[#allocation72_spill] sm:$0xff] %v7803_v15 }
 0x360   :  { %v5736_v17 = vpop.eup %5735  ;;  %1981 = vmatprep.subr.mxu0 %v7784_v19  ;;  %5169 = vmatprep.subr.mxu1 %v9845_v16  ;;  %10056 = vst [vmem:[#allocation71_spill] sm:$0xff] %v7796_v46  ;;  %10057 = vst [vmem:[#allocation70_spill] sm:$0xff] %v7800_v36 }
 0x361   :  { %v1652_v25 = vmul.f32 %v5736_v17, %v1651_v57  ;;  %1982 = vmatpush1.msra.mxu0 %v7790_v21  ;;  %5170 = vmatpush3.msra.mxu1 %v7793_v3  ;;  %v7806_v57 = vld [vmem:[#allocation7 + $0xc8] sm:$0xff]  ;;  %v7810_v17 = vld [vmem:[#allocation7 + $0xc0] sm:$0xff]  ;;  %v7897_v3 = vld [vmem:[#allocation7 + $0x10] sm:$0xff] }
 0x362   :  { %1983 = vmatprep.subr.mxu0 %v7796_v46  ;;  %5171 = vmatprep.subr.mxu1 %v9845_v16  ;;  %10059 = vst [vmem:[#allocation74_spill] sm:$0xff] %v7806_v57  ;;  %10060 = vst [vmem:[#allocation73_spill] sm:$0xff] %v7810_v17 }
 0x363   :  { %v1653_v19 = vadd.f32 %v1652_v25, %v1493_v0  ;;  %1984 = vmatpush1.msra.mxu0 %v7800_v36  ;;  %5172 = vmatpush3.msra.mxu1 %v7803_v15  ;;  %v7816_v0 = vld [vmem:[#allocation7 + $0xb0] sm:$0xff]  ;;  %v7820_v25 = vld [vmem:[#allocation7 + $0xa8] sm:$0xff]  ;;  %v7876_v36 = vld [vmem:[#allocation7 + $0x20] sm:$0xff] }
 0x364   :  { %1985 = vmatprep.subr.mxu0 %v7806_v57  ;;  %5173 = vmatprep.subr.mxu1 %v9845_v16  ;;  %10062 = vst [vmem:[#allocation77_spill] sm:$0xff] %v7816_v0  ;;  %10063 = vst [vmem:[#allocation76_spill] sm:$0xff] %v7820_v25  ;;  %v7823_v57 = vld [vmem:[#allocation7 + $0xb8] sm:$0xff] }
 0x365   :  { %5739 = vtanh.f32 %v1653_v19  ;;  %1986 = vmatpush1.msra.mxu0 %v7810_v17  ;;  %5174 = vmatpush3.msra.mxu1 %v7813_v8  ;;  %10064 = vst [vmem:[#allocation78_spill] sm:$0xff] %v7823_v57  ;;  %v7826_v19 = vld [vmem:[#allocation7 + $0x98] sm:$0xff]  ;;  %v7830_v8 = vld [vmem:[#allocation7 + $0x90] sm:$0xff]  ;;  %v7836_v17 = vld [vmem:[#allocation7 + $0x80] sm:$0xff] }
 0x366   :  { %1987 = vmatprep.subr.mxu0 %v7816_v0  ;;  %5175 = vmatprep.subr.mxu1 %v9845_v16  ;;  %10065 = vst [vmem:[#allocation80_spill] sm:$0xff] %v7826_v19  ;;  %10066 = vst [vmem:[#allocation79_spill] sm:$0xff] %v7830_v8  ;;  %v7833_v0 = vld [vmem:[#allocation7 + $0xa0] sm:$0xff] }
 0x367   :  { %1988 = vmatpush1.msra.mxu0 %v7820_v25  ;;  %5176 = vmatpush3.msra.mxu1 %v7823_v57  ;;  %10067 = vst [vmem:[#allocation81_spill] sm:$0xff] %v7833_v0  ;;  %10068 = vst [vmem:[#allocation83_spill] sm:$0xff] %v7836_v17  ;;  %v7840_v57 = vld [vmem:[#allocation7 + $0x78] sm:$0xff]  ;;  %v7846_v25 = vld [vmem:[#allocation7 + $0x68] sm:$0xff] }
 0x368   :  { %1989 = vmatprep.subr.mxu0 %v7826_v19  ;;  %5177 = vmatprep.subr.mxu1 %v9845_v16  ;;  %10069 = vst [vmem:[#allocation82_spill] sm:$0xff] %v7840_v57  ;;  %v7843_v19 = vld [vmem:[#allocation7 + $0x88] sm:$0xff]  ;;  %10071 = vst [vmem:[#allocation86_spill] sm:$0xff] %v7846_v25 }
 0x369   :  { %1990 = vmatpush1.msra.mxu0 %v7830_v8  ;;  %5178 = vmatpush3.msra.mxu1 %v7833_v0  ;;  %10070 = vst [vmem:[#allocation84_spill] sm:$0xff] %v7843_v19  ;;  %v7850_v0 = vld [vmem:[#allocation7 + $0x60] sm:$0xff]  ;;  %v5738_v8 = vpop.eup %5737  ;;  %10080 = vst [vmem:[#allocation94_spill] sm:$0xff] %v7876_v36 }
 0x36a   :  { %1991 = vmatprep.subr.mxu0 %v7836_v17  ;;  %5179 = vmatprep.subr.mxu1 %v9845_v16  ;;  %10072 = vst [vmem:[#allocation85_spill] sm:$0xff] %v7850_v0  ;;  %v7853_v17 = vld [vmem:[#allocation7 + $0x70] sm:$0xff]  ;;  %v1655_v15 = vsub.f32 1.0, %v5738_v8  ;;  %v1657_v46 = vmul.f32 %v5738_v8, %v7423_v44  ;;  %v7924_v8 = vld [vmem:[#allocation3 + $0x140] sm:$0xff] }
 0x36b   :  { %1992 = vmatpush1.msra.mxu0 %v7840_v57  ;;  %5180 = vmatpush3.msra.mxu1 %v7843_v19  ;;  %10073 = vst [vmem:[#allocation87_spill] sm:$0xff] %v7853_v17  ;;  %v7856_v57 = vld [vmem:[#allocation7 + $0x50] sm:$0xff]  ;;  %v7860_v19 = vld [vmem:[#allocation7 + $0x48] sm:$0xff] }
 0x36c   :  { %1993 = vmatprep.subr.mxu0 %v7846_v25  ;;  %5181 = vmatprep.subr.mxu1 %v9845_v16  ;;  %10074 = vst [vmem:[#allocation88_spill] sm:$0xff] %v7856_v57  ;;  %10075 = vst [vmem:[#allocation89_spill] sm:$0xff] %v7860_v19  ;;  %v7863_v25 = vld [vmem:[#allocation7 + $0x58] sm:$0xff]  ;;  %v7908_v44 = vld [vmem:[#allocation3 + $0x170] sm:$0xff] }
 0x36d   :  { %1994 = vmatpush1.msra.mxu0 %v7850_v0  ;;  %5182 = vmatpush3.msra.mxu1 %v7853_v17  ;;  %10076 = vst [vmem:[#allocation90_spill] sm:$0xff] %v7863_v25  ;;  %v7866_v0 = vld [vmem:[#allocation7 + $0x38] sm:$0xff]  ;;  %v7870_v17 = vld [vmem:[#allocation7 + $0x30] sm:$0xff] }
 0x36e   :  { %1995 = vmatprep.subr.mxu0 %v7856_v57  ;;  %5183 = vmatprep.subr.mxu1 %v9845_v16  ;;  %10077 = vst [vmem:[#allocation91_spill] sm:$0xff] %v7866_v0  ;;  %10078 = vst [vmem:[#allocation92_spill] sm:$0xff] %v7870_v17  ;;  %v7873_v57 = vld [vmem:[#allocation7 + $0x40] sm:$0xff] }
 0x36f   :  { %1996 = vmatpush1.msra.mxu0 %v7860_v19  ;;  %5184 = vmatpush3.msra.mxu1 %v7863_v25  ;;  %10079 = vst [vmem:[#allocation93_spill] sm:$0xff] %v7873_v57  ;;  %v7880_v25 = vld [vmem:[#allocation7 + $0x18] sm:$0xff] }
 0x370   :  { %1997 = vmatprep.subr.mxu0 %v7866_v0  ;;  %5185 = vmatprep.subr.mxu1 %v9845_v16  ;;  %10081 = vst [vmem:[#allocation95_spill] sm:$0xff] %v7880_v25  ;;  %v7883_v0 = vld [vmem:[#allocation7 + $0x28] sm:$0xff] }
 0x371   :  { %1998 = vmatpush1.msra.mxu0 %v7870_v17  ;;  %5186 = vmatpush3.msra.mxu1 %v7873_v57  ;;  %v7887_v57 = vld [vmem:[#allocation7 + $0x8] sm:$0xff] }
 0x372   :  { %v5740_v19 = vpop.eup %5739  ;;  %1999 = vmatprep.subr.mxu0 %v7876_v36  ;;  %5187 = vmatprep.subr.mxu1 %v9845_v16  ;;  %v7891_v36 = vld [vmem:[#allocation7] sm:$0xff] }
 0x373   :  { %2000 = vmatpush1.msra.mxu0 %v7880_v25  ;;  %5188 = vmatpush3.msra.mxu1 %v7883_v0  ;;  %v1656_v17 = vmul.f32 %v5740_v19, %v1655_v15  ;;  %v7916_v15 = vld [vmem:[#allocation3 + $0x158] sm:$0xff] }
 0x374   :  { %2001 = vmatprep.subr.mxu0 %v7887_v57  ;;  %5189 = vmatprep.subr.mxu1 %v9845_v16  ;;  %v7928_v19 = vld [vmem:[#allocation3 + $0x138] sm:$0xff] }
 0x375   :  { %2002 = vmatpush1.msra.mxu0 %v7891_v36  ;;  %2035 = vmatprep.mubr.f32.mxu0 %v9845_v16  ;;  %v7895_v25 = vadd.f32 %v1657_v46, %v1656_v17  ;;  %v7912_v46 = vld [vmem:[#allocation3 + $0x168] sm:$0xff]  ;;  %v7920_v17 = vld [vmem:[#allocation3 + $0x150] sm:$0xff]  ;;  %10083 = vst [vmem:[#allocation97_spill] sm:$0xff] %v7928_v19 }
 0x376   :  { %5190 = vmatpush3.msra.mxu1 %v7897_v3  ;;  %5191 = vmatprep.mubr.msk.f32.mxu1 %vm6359_vm1, %v9845_v16  ;;  %10082 = vst [vmem:[#allocation96_spill] sm:$0xff] %v7920_v17 }
 0x377   :  { %4382 = vst [vmem:[%s9529_s9 + $0x8] sm:$0xff] %v7895_v25  ;;  %2036 = vmatmul.mubr.f32.vlgmr.msra.gmra.mxu0 %v7895_v25  ;;  %5192 = vmatmul.mubr.f32.vlgmr.msra.gmra.mxu1 %v7895_v25 }
 0x378   :  { %2142 = vmatprep.subr.mxu0 %v7908_v44  ;;  %5194 = vmatprep.subr.mxu1 %v9845_v16 }
 0x379   :  { %2143 = vmatpush1.msra.mxu0 %v7912_v46  ;;  %5195 = vmatpush3.msra.mxu1 %v7439_v23  ;;  %v7932_v23 = vld [vmem:[#allocation3 + $0x128] sm:$0xff] }
 0x37a   :  { %2144 = vmatprep.subr.mxu0 %v7916_v15  ;;  %5196 = vmatprep.subr.mxu1 %v9845_v16 }
 0x37b   :  { %2145 = vmatpush1.msra.mxu0 %v7920_v17  ;;  %5197 = vmatpush3.msra.mxu1 %v7445_v1  ;;  %v7936_v17 = vld [vmem:[#allocation3 + $0x120] sm:$0xff]  ;;  %v7940_v1 = vld [vmem:[#allocation3 + $0x110] sm:$0xff] }
 0x37c   :  { %2146 = vmatprep.subr.mxu0 %v7924_v8  ;;  %5198 = vmatprep.subr.mxu1 %v9845_v16  ;;  %10084 = vst [vmem:[#allocation98_spill] sm:$0xff] %v7936_v17 }
 0x37d   :  { %2147 = vmatpush1.msra.mxu0 %v7928_v19  ;;  %5199 = vmatpush3.msra.mxu1 %v7451_v12  ;;  %v7944_v19 = vld [vmem:[#allocation3 + $0x108] sm:$0xff]  ;;  %v7948_v12 = vld [vmem:[#allocation3 + $0xf8] sm:$0xff] }
 0x37e   :  { %2148 = vmatprep.subr.mxu0 %v7932_v23  ;;  %5200 = vmatprep.subr.mxu1 %v9845_v16  ;;  %10085 = vst [vmem:[#allocation99_spill] sm:$0xff] %v7944_v19 }
 0x37f   :  { %2149 = vmatpush1.msra.mxu0 %v7936_v17  ;;  %5201 = vmatpush3.msra.mxu1 %v7457_v2  ;;  %v7952_v17 = vld [vmem:[#allocation3 + $0xf0] sm:$0xff]  ;;  %v7956_v2 = vld [vmem:[#allocation3 + $0xe0] sm:$0xff] }
 0x380   :  { %2150 = vmatprep.subr.mxu0 %v7940_v1  ;;  %5202 = vmatprep.subr.mxu1 %v9845_v16  ;;  %10086 = vst [vmem:[#allocation100_spill] sm:$0xff] %v7952_v17 }
 0x381   :  { %2151 = vmatpush1.msra.mxu0 %v7944_v19  ;;  %5203 = vmatpush3.msra.mxu1 %v7463_v35  ;;  %v7960_v19 = vld [vmem:[#allocation3 + $0xd8] sm:$0xff]  ;;  %v7964_v35 = vld [vmem:[#allocation3 + $0xc8] sm:$0xff] }
 0x382   :  { %2152 = vmatprep.subr.mxu0 %v7948_v12  ;;  %5204 = vmatprep.subr.mxu1 %v9845_v16  ;;  %10087 = vst [vmem:[#allocation101_spill] sm:$0xff] %v7960_v19 }
 0x383   :  { %2153 = vmatpush1.msra.mxu0 %v7952_v17  ;;  %5205 = vmatpush3.msra.mxu1 %v7469_v26  ;;  %v7968_v17 = vld [vmem:[#allocation3 + $0xc0] sm:$0xff]  ;;  %v7972_v26 = vld [vmem:[#allocation3 + $0xb0] sm:$0xff] }
 0x384   :  { %2154 = vmatprep.subr.mxu0 %v7956_v2  ;;  %5206 = vmatprep.subr.mxu1 %v9845_v16  ;;  %10088 = vst [vmem:[#allocation102_spill] sm:$0xff] %v7968_v17 }
 0x385   :  { %2155 = vmatpush1.msra.mxu0 %v7960_v19  ;;  %5207 = vmatpush3.msra.mxu1 %v7475_v28  ;;  %v7976_v19 = vld [vmem:[#allocation3 + $0xa8] sm:$0xff]  ;;  %v7980_v28 = vld [vmem:[#allocation3 + $0x98] sm:$0xff] }
 0x386   :  { %2156 = vmatprep.subr.mxu0 %v7964_v35  ;;  %5208 = vmatprep.subr.mxu1 %v9845_v16  ;;  %10089 = vst [vmem:[#allocation103_spill] sm:$0xff] %v7976_v19 }
 0x387   :  { %2157 = vmatpush1.msra.mxu0 %v7968_v17  ;;  %5209 = vmatpush3.msra.mxu1 %v7481_v9  ;;  %v7984_v17 = vld [vmem:[#allocation3 + $0x90] sm:$0xff]  ;;  %v7988_v9 = vld [vmem:[#allocation3 + $0x80] sm:$0xff] }
 0x388   :  { %2158 = vmatprep.subr.mxu0 %v7972_v26  ;;  %5210 = vmatprep.subr.mxu1 %v9845_v16  ;;  %10090 = vst [vmem:[#allocation104_spill] sm:$0xff] %v7984_v17  ;;  %10091 = vst [vmem:[#allocation105_spill] sm:$0xff] %v7988_v9 }
 0x389   :  { %2159 = vmatpush1.msra.mxu0 %v7976_v19  ;;  %5211 = vmatpush3.msra.mxu1 %v7487_v33  ;;  %v7992_v19 = vld [vmem:[#allocation3 + $0x78] sm:$0xff]  ;;  %v7996_v33 = vld [vmem:[#allocation3 + $0x68] sm:$0xff] }
 0x38a   :  { %2160 = vmatprep.subr.mxu0 %v7980_v28  ;;  %5212 = vmatprep.subr.mxu1 %v9845_v16  ;;  %10092 = vst [vmem:[#allocation106_spill] sm:$0xff] %v7992_v19  ;;  %10093 = vst [vmem:[#allocation107_spill] sm:$0xff] %v7996_v33 }
 0x38b   :  { %2161 = vmatpush1.msra.mxu0 %v7984_v17  ;;  %5213 = vmatpush3.msra.mxu1 %v7493_v37  ;;  %v8000_v17 = vld [vmem:[#allocation3 + $0x60] sm:$0xff]  ;;  %v8004_v37 = vld [vmem:[#allocation3 + $0x50] sm:$0xff] }
 0x38c   :  { %2162 = vmatprep.subr.mxu0 %v7988_v9  ;;  %5214 = vmatprep.subr.mxu1 %v9845_v16  ;;  %10094 = vst [vmem:[#allocation10_spill] sm:$0xff] %v8000_v17  ;;  %10095 = vst [vmem:[#allocation11_spill] sm:$0xff] %v8004_v37 }
 0x38d   :  { %2163 = vmatpush1.msra.mxu0 %v7992_v19  ;;  %5215 = vmatpush3.msra.mxu1 %v7499_v31  ;;  %v8008_v19 = vld [vmem:[#allocation3 + $0x48] sm:$0xff] }
 0x38e   :  { %2164 = vmatprep.subr.mxu0 %v7996_v33  ;;  %5216 = vmatprep.subr.mxu1 %v9845_v16  ;;  %10096 = vst [vmem:[#allocation23_spill] sm:$0xff] %v8008_v19 }
 0x38f   :  { %2165 = vmatpush1.msra.mxu0 %v8000_v17  ;;  %5217 = vmatpush3.msra.mxu1 %v7505_v39 }
 0x390   :  { %2166 = vmatprep.subr.mxu0 %v8004_v37  ;;  %5218 = vmatprep.subr.mxu1 %v9845_v16 }
 0x391   :  { %2167 = vmatpush1.msra.mxu0 %v8008_v19  ;;  %5219 = vmatpush3.msra.mxu1 %v7511_v10  ;;  %v10097_v10 = vld [vmem:[#allocation12_spill] sm:$0xff] }
 0x392   :  { %2168 = vmatprep.subr.mxu0 %v7514_v18  ;;  %5220 = vmatprep.subr.mxu1 %v9845_v16 }
 0x393   :  { %2169 = vmatpush1.msra.mxu0 %v7518_v55  ;;  %5221 = vmatpush3.msra.mxu1 %v7521_v20 }
 0x394   :  { %2170 = vmatprep.subr.mxu0 %v7524_v56  ;;  %5222 = vmatprep.subr.mxu1 %v9845_v16 }
 0x395   :  { %2171 = vmatpush1.msra.mxu0 %v7528_v43  ;;  %5223 = vmatpush3.msra.mxu1 %v7531_v58  ;;  %v10098_v43 = vld [vmem:[#allocation13_spill] sm:$0xff] }
 0x396   :  { %2172 = vmatprep.subr.mxu0 %v7534_v59  ;;  %5224 = vmatprep.subr.mxu1 %v9845_v16 }
 0x397   :  { %2173 = vmatpush1.msra.mxu0 %v7538_v60  ;;  %5225 = vmatpush3.msra.mxu1 %v7541_v61 }
 0x398   :  { %2206 = vmatprep.mubr.f32.mxu0 %v9845_v16  ;;  %5226 = vmatprep.mubr.msk.f32.mxu1 %vm6359_vm1, %v9845_v16 }
 0x399   :  { %2305 = vmatprep.subr.mxu0 %v7547_v62  ;;  %5229 = vmatprep.subr.mxu1 %v9845_v16 }
 0x3f4   :  { %v1733_v31 = vpop.f32.mrf.mxu0  ;;  %v1804_v39 = vpop.f32.mrf.mxu1 }
 0x3f5   :  { %v1808_v18 = vadd.f32 %v1733_v31, %v10097_v10  ;;  %v1822_v62 = vadd.f32 %v7556_v32, %v1804_v39  ;;  %v10099_v10 = vld [vmem:[#allocation22_spill] sm:$0xff] }
 0x3f6   :  { %v5123_v55 = vpop.f32.mrf.mxu1  ;;  %v1735_v56 = vpop.f32.mrf.mxu0  ;;  %v10117_v39 = vld [vmem:[#allocation46_spill] sm:$0xff] }
 0x3f7   :  { %v4383_v20 = vmul.f32 -1.442695, %v1808_v18  ;;  %v1815_v58 = vadd.f32 %v1735_v56, %v10098_v43 }
 0x3f9   :  { %5741 = vpow2.f32 %v4383_v20  ;;  %v4384_v59 = vmul.f32 -1.442695, %v1815_v58 }
 0x3fb   :  { %5743 = vpow2.f32 %v4384_v59 }
 0x406   :  { %v5742_v60 = vpop.eup %5741 }
 0x407   :  { %v1812_v61 = vadd.f32 1.0, %v5742_v60 }
 0x408   :  { %v5744_v19 = vpop.eup %5743 }
 0x409   :  { %5745 = vrcp.f32 %v1812_v61  ;;  %v1819_v37 = vadd.f32 1.0, %v5744_v19  ;;  %v10113_v19 = vld [vmem:[#allocation42_spill] sm:$0xff]  ;;  %v10118_v61 = vld [vmem:[#allocation47_spill] sm:$0xff] }
 0x40b   :  { %5747 = vrcp.f32 %v1819_v37  ;;  %v10116_v37 = vld [vmem:[#allocation45_spill] sm:$0xff] }
 0x415   :  { %v8032_v17 = vpop.f32.mrf.mxu1  ;;  %v1896_v32 = vpop.f32.mrf.mxu0 }
 0x416   :  { %v5746_v33 = vpop.eup %5745 }
 0x417   :  { %v1823_v9 = vmul.f32 %v5746_v33, %v1822_v62  ;;  %v5158_v31 = vpop.f32.mrf.mxu1  ;;  %v10115_v33 = vld [vmem:[#allocation44_spill] sm:$0xff] }
 0x418   :  { %v5748_v55 = vpop.eup %5747  ;;  %v10119_v31 = vld [vmem:[#allocation48_spill] sm:$0xff] }
 0x419   :  { %v1824_v18 = vadd.f32 %v1823_v9, %v10099_v10  ;;  %v1826_v20 = vsub.f32 1.0, %v5748_v55  ;;  %v1828_v58 = vmul.f32 %v5748_v55, %v7563_v48  ;;  %v1898_v48 = vpop.f32.mrf.mxu0  ;;  %v10114_v9 = vld [vmem:[#allocation43_spill] sm:$0xff]  ;;  %v10120_v10 = vld [vmem:[#allocation49_spill] sm:$0xff] }
 0x41a   :  { %v10122_v55 = vld [vmem:[#allocation51_spill] sm:$0xff] }
 0x41b   :  { %5749 = vtanh.f32 %v1824_v18  ;;  %v10121_v18 = vld [vmem:[#allocation50_spill] sm:$0xff] }
 0x428   :  { %v5750_v56 = vpop.eup %5749 }
 0x429   :  { %v1827_v43 = vmul.f32 %v5750_v56, %v1826_v20  ;;  %v10123_v20 = vld [vmem:[#allocation53_spill] sm:$0xff]  ;;  %v10124_v56 = vld [vmem:[#allocation52_spill] sm:$0xff] }
 0x42b   :  { %v8036_v59 = vadd.f32 %v1828_v58, %v1827_v43  ;;  %v10125_v43 = vld [vmem:[#allocation54_spill] sm:$0xff]  ;;  %v10126_v58 = vld [vmem:[#allocation56_spill] sm:$0xff] }
 0x42d   :  { %2207 = vmatmul.mubr.f32.vlgmr.msra.gmra.mxu0 %v8036_v59  ;;  %5227 = vmatmul.mubr.f32.vlgmr.msra.gmra.mxu1 %v8036_v59 }
 0x42e   :  { %2306 = vmatpush1.msra.mxu0 %v7567_v50  ;;  %5230 = vmatpush3.msra.mxu1 %v7570_v51  ;;  %v1897_v50 = vadd.f32 %v1896_v32, %v7275_v30  ;;  %v10127_v32 = vld [vmem:[#allocation55_spill] sm:$0xff] }
 0x42f   :  { %2307 = vmatprep.subr.mxu0 %v7573_v52  ;;  %5231 = vmatprep.subr.mxu1 %v9845_v16 }
 0x430   :  { %2308 = vmatpush1.msra.mxu0 %v7577_v49  ;;  %5232 = vmatpush3.msra.mxu1 %v7580_v53 }
 0x431   :  { %2309 = vmatprep.subr.mxu0 %v7583_v54  ;;  %5233 = vmatprep.subr.mxu1 %v9845_v16 }
 0x432   :  { %2310 = vmatpush1.msra.mxu0 %v7587_v63  ;;  %5234 = vmatpush3.msra.mxu1 %v7590_v11  ;;  %v1899_v11 = vadd.f32 %v1898_v48, %v7293_v14  ;;  %v10128_v48 = vld [vmem:[#allocation57_spill] sm:$0xff] }
 0x433   :  { %2311 = vmatprep.subr.mxu0 %v7593_v41  ;;  %5235 = vmatprep.subr.mxu1 %v9845_v16  ;;  %v10100_v41 = vld [vmem:[#allocation29_spill] sm:$0xff] }
 0x434   :  { %2312 = vmatpush1.msra.mxu0 %v7597_v45  ;;  %5236 = vmatpush3.msra.mxu1 %v7600_v13  ;;  %v10101_v13 = vld [vmem:[#allocation30_spill] sm:$0xff] }
 0x435   :  { %2313 = vmatprep.subr.mxu0 %v7603_v47  ;;  %5237 = vmatprep.subr.mxu1 %v9845_v16  ;;  %v10102_v47 = vld [vmem:[#allocation31_spill] sm:$0xff] }
 0x436   :  { %2314 = vmatpush1.msra.mxu0 %v7608_v6  ;;  %5238 = vmatpush3.msra.mxu1 %v7611_v27  ;;  %v10103_v6 = vld [vmem:[#allocation32_spill] sm:$0xff]  ;;  %v10104_v27 = vld [vmem:[#allocation33_spill] sm:$0xff] }
 0x437   :  { %v2037_v51 = vpop.f32.mrf.mxu0  ;;  %v8059_v52 = vpop.f32.mrf.mxu1  ;;  %2315 = vmatprep.subr.mxu0 %v7616_v24  ;;  %5239 = vmatprep.subr.mxu1 %v9845_v16  ;;  %v10105_v24 = vld [vmem:[#allocation34_spill] sm:$0xff] }
 0x438   :  { %v2112_v49 = vadd.f32 %v2037_v51, %v1897_v50  ;;  %2316 = vmatpush1.msra.mxu0 %v7620_v34  ;;  %5240 = vmatpush3.msra.mxu1 %v7623_v4  ;;  %v10106_v34 = vld [vmem:[#allocation35_spill] sm:$0xff] }
 0x439   :  { %v5193_v53 = vpop.f32.mrf.mxu1  ;;  %2317 = vmatprep.subr.mxu0 %v7626_v22  ;;  %5241 = vmatprep.subr.mxu1 %v9845_v16  ;;  %v2039_v63 = vpop.f32.mrf.mxu0  ;;  %v10107_v22 = vld [vmem:[#allocation36_spill] sm:$0xff]  ;;  %v10129_v50 = vld [vmem:[#allocation59_spill] sm:$0xff] }
 0x43a   :  { %v4385_v54 = vmul.f32 -1.442695, %v2112_v49  ;;  %2318 = vmatpush1.msra.mxu0 %v7630_v40  ;;  %5242 = vmatpush3.msra.mxu1 %v7633_v38  ;;  %v2119_v45 = vadd.f32 %v2039_v63, %v1899_v11  ;;  %v10108_v40 = vld [vmem:[#allocation37_spill] sm:$0xff]  ;;  %v10109_v38 = vld [vmem:[#allocation38_spill] sm:$0xff]  ;;  %v10131_v53 = vld [vmem:[#allocation60_spill] sm:$0xff] }
 0x43b   :  { %2319 = vmatprep.subr.mxu0 %v7636_v29  ;;  %5243 = vmatprep.subr.mxu1 %v9845_v16  ;;  %v10110_v29 = vld [vmem:[#allocation39_spill] sm:$0xff]  ;;  %v10130_v49 = vld [vmem:[#allocation58_spill] sm:$0xff]  ;;  %v10133_v63 = vld [vmem:[#allocation61_spill] sm:$0xff] }
 0x43c   :  { %5751 = vpow2.f32 %v4385_v54  ;;  %2320 = vmatpush1.msra.mxu0 %v7641_v42  ;;  %5244 = vmatpush3.msra.mxu1 %v7644_v7  ;;  %v4386_v4 = vmul.f32 -1.442695, %v2119_v45  ;;  %v10111_v42 = vld [vmem:[#allocation40_spill] sm:$0xff]  ;;  %v10112_v7 = vld [vmem:[#allocation41_spill] sm:$0xff]  ;;  %v10132_v54 = vld [vmem:[#allocation62_spill] sm:$0xff] }
 0x43d   :  { %2321 = vmatprep.subr.mxu0 %v10100_v41  ;;  %5245 = vmatprep.subr.mxu1 %v9845_v16  ;;  %v10134_v41 = vld [vmem:[#allocation63_spill] sm:$0xff]  ;;  %v10135_v45 = vld [vmem:[#allocation65_spill] sm:$0xff] }
 0x43e   :  { %2322 = vmatpush1.msra.mxu0 %v10101_v13  ;;  %5246 = vmatpush3.msra.mxu1 %v10102_v47  ;;  %5753 = vpow2.f32 %v4386_v4  ;;  %v10136_v13 = vld [vmem:[#allocation64_spill] sm:$0xff]  ;;  %v8132_v47 = vld [vmem:[%s9528_s8] ss:$0 sm:$0xff]  ;;  %v10139_v4 = vld [vmem:[#allocation67_spill] sm:$0xff] }
 0x43f   :  { %2323 = vmatprep.subr.mxu0 %v10103_v6  ;;  %5247 = vmatprep.subr.mxu1 %v9845_v16  ;;  %v2126_v6 = vadd.f32 %v8132_v47, %v8059_v52 }
 0x440   :  { %2324 = vmatpush1.msra.mxu0 %v10104_v27  ;;  %5248 = vmatpush3.msra.mxu1 %v10105_v24  ;;  %v10137_v27 = vld [vmem:[#allocation66_spill] sm:$0xff]  ;;  %v10138_v24 = vld [vmem:[#allocation68_spill] sm:$0xff] }
 0x441   :  { %2325 = vmatprep.subr.mxu0 %v10106_v34  ;;  %5249 = vmatprep.subr.mxu1 %v9845_v16 }
 0x442   :  { %2326 = vmatpush1.msra.mxu0 %v10107_v22  ;;  %5250 = vmatpush3.msra.mxu1 %v10108_v40  ;;  %v1968_v22 = vadd.f32 %v8032_v17, %v7367_v5  ;;  %v10145_v17 = vld [vmem:[#allocation73_spill] sm:$0xff] }
 0x443   :  { %2327 = vmatprep.subr.mxu0 %v10109_v38  ;;  %5251 = vmatprep.subr.mxu1 %v9845_v16  ;;  %v10140_v38 = vld [vmem:[#allocation69_spill] sm:$0xff] }
 0x444   :  { %2328 = vmatpush1.msra.mxu0 %v10110_v29  ;;  %5252 = vmatpush3.msra.mxu1 %v10111_v42  ;;  %v10141_v29 = vld [vmem:[#allocation71_spill] sm:$0xff]  ;;  %v10142_v42 = vld [vmem:[#allocation70_spill] sm:$0xff] }
 0x445   :  { %2329 = vmatprep.subr.mxu0 %v10112_v7  ;;  %5253 = vmatprep.subr.mxu1 %v9845_v16  ;;  %v10143_v7 = vld [vmem:[#allocation72_spill] sm:$0xff] }
 0x446   :  { %2330 = vmatpush1.msra.mxu0 %v10113_v19  ;;  %5254 = vmatpush3.msra.mxu1 %v10114_v9  ;;  %v10144_v19 = vld [vmem:[#allocation74_spill] sm:$0xff]  ;;  %v10146_v9 = vld [vmem:[#allocation75_spill] sm:$0xff] }
 0x447   :  { %2331 = vmatprep.subr.mxu0 %v10115_v33  ;;  %5255 = vmatprep.subr.mxu1 %v9845_v16  ;;  %v10148_v33 = vld [vmem:[#allocation76_spill] sm:$0xff] }
 0x448   :  { %2332 = vmatpush1.msra.mxu0 %v10116_v37  ;;  %5256 = vmatpush3.msra.mxu1 %v10117_v39  ;;  %v10149_v37 = vld [vmem:[#allocation78_spill] sm:$0xff]  ;;  %v10150_v39 = vld [vmem:[#allocation80_spill] sm:$0xff] }
 0x449   :  { %v5752_v60 = vpop.eup %5751  ;;  %2333 = vmatprep.subr.mxu0 %v10118_v61  ;;  %5257 = vmatprep.subr.mxu1 %v9845_v16  ;;  %v10152_v61 = vld [vmem:[#allocation81_spill] sm:$0xff] }
 0x44a   :  { %v2116_v62 = vadd.f32 1.0, %v5752_v60  ;;  %2334 = vmatpush1.msra.mxu0 %v10119_v31  ;;  %5258 = vmatpush3.msra.mxu1 %v10120_v10  ;;  %v10151_v60 = vld [vmem:[#allocation79_spill] sm:$0xff]  ;;  %v10154_v31 = vld [vmem:[#allocation82_spill] sm:$0xff]  ;;  %v10155_v10 = vld [vmem:[#allocation84_spill] sm:$0xff] }
 0x44b   :  { %2335 = vmatprep.subr.mxu0 %v10121_v18  ;;  %5259 = vmatprep.subr.mxu1 %v9845_v16  ;;  %v5754_v51 = vpop.eup %5753  ;;  %v10156_v18 = vld [vmem:[#allocation86_spill] sm:$0xff] }
 0x44c   :  { %5755 = vrcp.f32 %v2116_v62  ;;  %2336 = vmatpush1.msra.mxu0 %v10122_v55  ;;  %2369 = vmatprep.mubr.f32.mxu0 %v9845_v16  ;;  %v2123_v11 = vadd.f32 1.0, %v5754_v51  ;;  %v10153_v62 = vld [vmem:[#allocation83_spill] sm:$0xff]  ;;  %v10157_v55 = vld [vmem:[#allocation85_spill] sm:$0xff] }
 0x44d   :  { %5260 = vmatpush3.msra.mxu1 %v10123_v20  ;;  %5261 = vmatprep.mubr.msk.f32.mxu1 %vm6359_vm1, %v9845_v16  ;;  %v10158_v20 = vld [vmem:[#allocation87_spill] sm:$0xff]  ;;  %v10164_v51 = vld [vmem:[#allocation93_spill] sm:$0xff] }
 0x44e   :  { %2370 = vmatmul.mubr.f32.vlgmr.msra.gmra.mxu0 %v8036_v59  ;;  %5262 = vmatmul.mubr.f32.vlgmr.msra.gmra.mxu1 %v8036_v59  ;;  %5757 = vrcp.f32 %v2123_v11 }
 0x44f   :  { %2446 = vmatprep.subr.mxu0 %v10124_v56  ;;  %5264 = vmatprep.subr.mxu1 %v9845_v16 }
 0x450   :  { %2447 = vmatpush1.msra.mxu0 %v10125_v43  ;;  %5265 = vmatpush3.msra.mxu1 %v10126_v58  ;;  %v10159_v43 = vld [vmem:[#allocation88_spill] sm:$0xff]  ;;  %v10160_v58 = vld [vmem:[#allocation89_spill] sm:$0xff] }
 0x451   :  { %2448 = vmatprep.subr.mxu0 %v10127_v32  ;;  %5266 = vmatprep.subr.mxu1 %v9845_v16  ;;  %v10161_v32 = vld [vmem:[#allocation90_spill] sm:$0xff] }
 0x452   :  { %2449 = vmatpush1.msra.mxu0 %v10128_v48  ;;  %5267 = vmatpush3.msra.mxu1 %v10129_v50  ;;  %v10162_v48 = vld [vmem:[#allocation91_spill] sm:$0xff]  ;;  %v10163_v50 = vld [vmem:[#allocation92_spill] sm:$0xff] }
 0x453   :  { %2450 = vmatprep.subr.mxu0 %v10130_v49  ;;  %5268 = vmatprep.subr.mxu1 %v9845_v16 }
 0x454   :  { %2451 = vmatpush1.msra.mxu0 %v10131_v53  ;;  %5269 = vmatpush3.msra.mxu1 %v10132_v54  ;;  %v10165_v54 = vld [vmem:[#allocation94_spill] sm:$0xff] }
 0x455   :  { %2452 = vmatprep.subr.mxu0 %v10133_v63  ;;  %5270 = vmatprep.subr.mxu1 %v9845_v16  ;;  %v10166_v63 = vld [vmem:[#allocation95_spill] sm:$0xff] }
 0x456   :  { %2453 = vmatpush1.msra.mxu0 %v10134_v41  ;;  %5271 = vmatpush3.msra.mxu1 %v10135_v45 }
 0x457   :  { %2454 = vmatprep.subr.mxu0 %v10136_v13  ;;  %5272 = vmatprep.subr.mxu1 %v9845_v16  ;;  %v8229_v13 = vld [vmem:[#allocation3 + $0x100] sm:$0xff] }
 0x458   :  { %2455 = vmatpush1.msra.mxu0 %v10137_v27  ;;  %5273 = vmatpush3.msra.mxu1 %v10138_v24  ;;  %v8241_v27 = vld [vmem:[#allocation3 + $0xd0] sm:$0xff]  ;;  %v8247_v24 = vld [vmem:[#allocation3 + $0xb8] sm:$0xff] }
 0x459   :  { %v5756_v34 = vpop.eup %5755  ;;  %2456 = vmatprep.subr.mxu0 %v10139_v4  ;;  %5274 = vmatprep.subr.mxu1 %v9845_v16  ;;  %v10176_v4 = vld [vmem:[#allocation105_spill] sm:$0xff] }
 0x45a   :  { %v2127_v40 = vmul.f32 %v5756_v34, %v2126_v6  ;;  %2457 = vmatpush1.msra.mxu0 %v7790_v21  ;;  %5275 = vmatpush3.msra.mxu1 %v10140_v38  ;;  %v10147_v21 = vld [vmem:[#allocation77_spill] sm:$0xff]  ;;  %v8235_v6 = vld [vmem:[#allocation3 + $0xe8] sm:$0xff]  ;;  %v8253_v34 = vld [vmem:[#allocation3 + $0xa0] sm:$0xff] }
 0x45b   :  { %2458 = vmatprep.subr.mxu0 %v10141_v29  ;;  %5276 = vmatprep.subr.mxu1 %v9845_v16  ;;  %v5758_v56 = vpop.eup %5757  ;;  %v8265_v38 = vld [vmem:[#allocation3 + $0x70] sm:$0xff]  ;;  %v10180_v29 = vld [vmem:[#allocation11_spill] sm:$0xff] }
 0x45c   :  { %v2128_v52 = vadd.f32 %v2127_v40, %v1968_v22  ;;  %2459 = vmatpush1.msra.mxu0 %v10142_v42  ;;  %5277 = vmatpush3.msra.mxu1 %v10143_v7  ;;  %v2130_v49 = vsub.f32 1.0, %v5758_v56  ;;  %v2132_v41 = vmul.f32 %v5758_v56, %v7895_v25  ;;  %v8211_v25 = vld [vmem:[#allocation3 + $0x148] sm:$0xff]  ;;  %v8271_v42 = vld [vmem:[#allocation3 + $0x58] sm:$0xff] }
 0x45d   :  { %2460 = vmatprep.subr.mxu0 %v10144_v19  ;;  %5278 = vmatprep.subr.mxu1 %v9845_v16  ;;  %v8259_v22 = vld [vmem:[#allocation3 + $0x88] sm:$0xff]  ;;  %v8274_v7 = vld [vmem:[#allocation3 + $0x38] sm:$0xff]  ;;  %v8278_v19 = vld [vmem:[#allocation3 + $0x30] sm:$0xff] }
 0x45e   :  { %5759 = vtanh.f32 %v2128_v52  ;;  %2461 = vmatpush1.msra.mxu0 %v10145_v17  ;;  %5279 = vmatpush3.msra.mxu1 %v10146_v9  ;;  %v10178_v40 = vld [vmem:[#allocation107_spill] sm:$0xff]  ;;  %v8281_v17 = vld [vmem:[#allocation3 + $0x40] sm:$0xff] }
 0x45f   :  { %2462 = vmatprep.subr.mxu0 %v10147_v21  ;;  %5280 = vmatprep.subr.mxu1 %v9845_v16  ;;  %v10181_v52 = vld [vmem:[#allocation23_spill] sm:$0xff]  ;;  %v8284_v9 = vld [vmem:[#allocation3 + $0x20] sm:$0xff]  ;;  %v8288_v21 = vld [vmem:[#allocation3 + $0x18] sm:$0xff] }
 0x460   :  { %2463 = vmatpush1.msra.mxu0 %v10148_v33  ;;  %5281 = vmatpush3.msra.mxu1 %v10149_v37  ;;  %v8291_v33 = vld [vmem:[#allocation3 + $0x28] sm:$0xff] }
 0x461   :  { %2464 = vmatprep.subr.mxu0 %v10150_v39  ;;  %5282 = vmatprep.subr.mxu1 %v9845_v16  ;;  %v8294_v37 = vld [vmem:[#allocation3 + $0x8] sm:$0xff]  ;;  %v8298_v39 = vld [vmem:[#allocation3] sm:$0xff] }
 0x462   :  { %2465 = vmatpush1.msra.mxu0 %v10151_v60  ;;  %5283 = vmatpush3.msra.mxu1 %v10152_v61  ;;  %v8301_v60 = vld [vmem:[#allocation3 + $0x10] sm:$0xff] }
 0x463   :  { %2466 = vmatprep.subr.mxu0 %v10153_v62  ;;  %5284 = vmatprep.subr.mxu1 %v9845_v16  ;;  %v8307_v61 = vld [vmem:[#allocation5 + $0x170] sm:$0xff] }
 0x464   :  { %2467 = vmatpush1.msra.mxu0 %v10154_v31  ;;  %5285 = vmatpush3.msra.mxu1 %v10155_v10  ;;  %v10182_v10 = vld [vmem:[#allocation14_spill] sm:$0xff] }
 0x465   :  { %2468 = vmatprep.subr.mxu0 %v10156_v18  ;;  %5286 = vmatprep.subr.mxu1 %v9845_v16 }
 0x466   :  { %2469 = vmatpush1.msra.mxu0 %v10157_v55  ;;  %5287 = vmatpush3.msra.mxu1 %v10158_v20 }
 0x467   :  { %2470 = vmatprep.subr.mxu0 %v10159_v43  ;;  %5288 = vmatprep.subr.mxu1 %v9845_v16  ;;  %v10183_v43 = vld [vmem:[#allocation15_spill] sm:$0xff] }
 0x468   :  { %2471 = vmatpush1.msra.mxu0 %v10160_v58  ;;  %5289 = vmatpush3.msra.mxu1 %v10161_v32 }
 0x469   :  { %2472 = vmatprep.subr.mxu0 %v10162_v48  ;;  %5290 = vmatprep.subr.mxu1 %v9845_v16 }
 0x46a   :  { %2473 = vmatpush1.msra.mxu0 %v10163_v50  ;;  %5291 = vmatpush3.msra.mxu1 %v10164_v51 }
 0x46b   :  { %v5760_v53 = vpop.eup %5759  ;;  %2474 = vmatprep.subr.mxu0 %v10165_v54  ;;  %5292 = vmatprep.subr.mxu1 %v9845_v16 }
 0x46c   :  { %2475 = vmatpush1.msra.mxu0 %v10166_v63  ;;  %5293 = vmatpush3.msra.mxu1 %v7883_v0  ;;  %v2131_v11 = vmul.f32 %v5760_v53, %v2130_v49  ;;  %v10168_v0 = vld [vmem:[#allocation97_spill] sm:$0xff]  ;;  %v8316_v53 = vld [vmem:[%s9524_s4] ss:$0 sm:$0xff] }
 0x46d   :  { %2476 = vmatprep.subr.mxu0 %v7887_v57  ;;  %5294 = vmatprep.subr.mxu1 %v9845_v16  ;;  %v8205_v57 = vld [vmem:[#allocation3 + $0x160] sm:$0xff] }
 0x46e   :  { %2477 = vmatpush1.msra.mxu0 %v7891_v36  ;;  %2510 = vmatprep.mubr.f32.mxu0 %v9845_v16  ;;  %v8185_v45 = vadd.f32 %v2132_v41, %v2131_v11  ;;  %v8199_v36 = vld [vmem:[#allocation3 + $0x178] sm:$0xff] }
 0x46f   :  { %5295 = vmatpush3.msra.mxu1 %v7897_v3  ;;  %5296 = vmatprep.mubr.msk.f32.mxu1 %vm6359_vm1, %v9845_v16  ;;  %v10167_v3 = vld [vmem:[#allocation96_spill] sm:$0xff] }
 0x470   :  { %4387 = vst [vmem:[%s9529_s9 + $0x10] sm:$0xff] %v8185_v45  ;;  %2511 = vmatmul.mubr.f32.vlgmr.msra.gmra.mxu0 %v8185_v45  ;;  %5297 = vmatmul.mubr.f32.vlgmr.msra.gmra.mxu1 %v8185_v45 }
 0x471   :  { %2617 = vmatprep.subr.mxu0 %v7908_v44  ;;  %5299 = vmatprep.subr.mxu1 %v9845_v16  ;;  %v10169_v44 = vld [vmem:[#allocation98_spill] sm:$0xff] }
 0x472   :  { %2618 = vmatpush1.msra.mxu0 %v7912_v46  ;;  %5300 = vmatpush3.msra.mxu1 %v8199_v36  ;;  %v8217_v46 = vld [vmem:[#allocation3 + $0x130] sm:$0xff] }
 0x473   :  { %2619 = vmatprep.subr.mxu0 %v7916_v15  ;;  %5301 = vmatprep.subr.mxu1 %v9845_v16  ;;  %v10170_v15 = vld [vmem:[#allocation99_spill] sm:$0xff] }
 0x474   :  { %2620 = vmatpush1.msra.mxu0 %v10167_v3  ;;  %5302 = vmatpush3.msra.mxu1 %v8205_v57 }
 0x475   :  { %2621 = vmatprep.subr.mxu0 %v7924_v8  ;;  %5303 = vmatprep.subr.mxu1 %v9845_v16  ;;  %v8223_v8 = vld [vmem:[#allocation3 + $0x118] sm:$0xff] }
 0x476   :  { %2622 = vmatpush1.msra.mxu0 %v10168_v0  ;;  %5304 = vmatpush3.msra.mxu1 %v8211_v25  ;;  %v10184_v0 = vld [vmem:[#allocation25_spill] sm:$0xff] }
 0x477   :  { %2623 = vmatprep.subr.mxu0 %v7932_v23  ;;  %5305 = vmatprep.subr.mxu1 %v9845_v16  ;;  %v10171_v23 = vld [vmem:[#allocation100_spill] sm:$0xff] }
 0x478   :  { %2624 = vmatpush1.msra.mxu0 %v10169_v44  ;;  %5306 = vmatpush3.msra.mxu1 %v8217_v46 }
 0x479   :  { %2625 = vmatprep.subr.mxu0 %v7940_v1  ;;  %5307 = vmatprep.subr.mxu1 %v9845_v16  ;;  %v10172_v1 = vld [vmem:[#allocation101_spill] sm:$0xff] }
 0x47a   :  { %2626 = vmatpush1.msra.mxu0 %v10170_v15  ;;  %5308 = vmatpush3.msra.mxu1 %v8223_v8 }
 0x47b   :  { %2627 = vmatprep.subr.mxu0 %v7948_v12  ;;  %5309 = vmatprep.subr.mxu1 %v9845_v16  ;;  %v10173_v12 = vld [vmem:[#allocation102_spill] sm:$0xff] }
 0x47c   :  { %2628 = vmatpush1.msra.mxu0 %v10171_v23  ;;  %5310 = vmatpush3.msra.mxu1 %v8229_v13 }
 0x47d   :  { %2629 = vmatprep.subr.mxu0 %v7956_v2  ;;  %5311 = vmatprep.subr.mxu1 %v9845_v16  ;;  %v10174_v2 = vld [vmem:[#allocation103_spill] sm:$0xff] }
 0x47e   :  { %2630 = vmatpush1.msra.mxu0 %v10172_v1  ;;  %5312 = vmatpush3.msra.mxu1 %v8235_v6 }
 0x47f   :  { %2631 = vmatprep.subr.mxu0 %v7964_v35  ;;  %5313 = vmatprep.subr.mxu1 %v9845_v16  ;;  %v10175_v35 = vld [vmem:[#allocation104_spill] sm:$0xff] }
 0x480   :  { %2632 = vmatpush1.msra.mxu0 %v10173_v12  ;;  %5314 = vmatpush3.msra.mxu1 %v8241_v27 }
 0x481   :  { %2633 = vmatprep.subr.mxu0 %v7972_v26  ;;  %5315 = vmatprep.subr.mxu1 %v9845_v16  ;;  %v10177_v26 = vld [vmem:[#allocation106_spill] sm:$0xff] }
 0x482   :  { %2634 = vmatpush1.msra.mxu0 %v10174_v2  ;;  %5316 = vmatpush3.msra.mxu1 %v8247_v24 }
 0x483   :  { %2635 = vmatprep.subr.mxu0 %v7980_v28  ;;  %5317 = vmatprep.subr.mxu1 %v9845_v16  ;;  %v10179_v28 = vld [vmem:[#allocation10_spill] sm:$0xff] }
 0x484   :  { %2636 = vmatpush1.msra.mxu0 %v10175_v35  ;;  %5318 = vmatpush3.msra.mxu1 %v8253_v34 }
 0x485   :  { %2637 = vmatprep.subr.mxu0 %v10176_v4  ;;  %5319 = vmatprep.subr.mxu1 %v9845_v16  ;;  %v8327_v4 = vld [vmem:[#allocation5 + $0x168] sm:$0xff] }
 0x486   :  { %2638 = vmatpush1.msra.mxu0 %v10177_v26  ;;  %5320 = vmatpush3.msra.mxu1 %v8259_v22  ;;  %v8330_v26 = vld [vmem:[#allocation5 + $0x178] sm:$0xff] }
 0x487   :  { %2639 = vmatprep.subr.mxu0 %v10178_v40  ;;  %5321 = vmatprep.subr.mxu1 %v9845_v16  ;;  %v8333_v40 = vld [vmem:[#allocation5 + $0x158] sm:$0xff] }
 0x488   :  { %2640 = vmatpush1.msra.mxu0 %v10179_v28  ;;  %5322 = vmatpush3.msra.mxu1 %v8265_v38  ;;  %v8340_v28 = vld [vmem:[#allocation5 + $0x160] sm:$0xff] }
 0x489   :  { %2641 = vmatprep.subr.mxu0 %v10180_v29  ;;  %5323 = vmatprep.subr.mxu1 %v9845_v16 }
 0x48a   :  { %2642 = vmatpush1.msra.mxu0 %v10181_v52  ;;  %5324 = vmatpush3.msra.mxu1 %v8271_v42  ;;  %v8343_v52 = vld [vmem:[#allocation5 + $0x140] sm:$0xff] }
 0x48b   :  { %2643 = vmatprep.subr.mxu0 %v8274_v7  ;;  %5325 = vmatprep.subr.mxu1 %v9845_v16 }
 0x48c   :  { %2644 = vmatpush1.msra.mxu0 %v8278_v19  ;;  %5326 = vmatpush3.msra.mxu1 %v8281_v17 }
 0x48d   :  { %2645 = vmatprep.subr.mxu0 %v8284_v9  ;;  %5327 = vmatprep.subr.mxu1 %v9845_v16 }
 0x48e   :  { %2646 = vmatpush1.msra.mxu0 %v8288_v21  ;;  %5328 = vmatpush3.msra.mxu1 %v8291_v33 }
 0x48f   :  { %2647 = vmatprep.subr.mxu0 %v8294_v37  ;;  %5329 = vmatprep.subr.mxu1 %v9845_v16 }
 0x490   :  { %2648 = vmatpush1.msra.mxu0 %v8298_v39  ;;  %5330 = vmatpush3.msra.mxu1 %v8301_v60 }
 0x491   :  { %2681 = vmatprep.mubr.f32.mxu0 %v9845_v16  ;;  %5331 = vmatprep.mubr.msk.f32.mxu1 %vm6359_vm1, %v9845_v16 }
 0x492   :  { %2780 = vmatprep.subr.mxu0 %v8307_v61  ;;  %5334 = vmatprep.subr.mxu1 %v9845_v16 }
 0x4ed   :  { %v2208_v62 = vpop.f32.mrf.mxu0  ;;  %v2279_v31 = vpop.f32.mrf.mxu1 }
 0x4ee   :  { %v2283_v18 = vadd.f32 %v2208_v62, %v10182_v10  ;;  %v2297_v54 = vadd.f32 %v8316_v53, %v2279_v31  ;;  %v8347_v62 = vld [vmem:[#allocation5 + $0x138] sm:$0xff]  ;;  %v8350_v31 = vld [vmem:[#allocation5 + $0x148] sm:$0xff] }
 0x4ef   :  { %v5228_v55 = vpop.f32.mrf.mxu1  ;;  %v2210_v56 = vpop.f32.mrf.mxu0  ;;  %v8353_v10 = vld [vmem:[#allocation5 + $0x128] sm:$0xff] }
 0x4f0   :  { %v4388_v20 = vmul.f32 -1.442695, %v2283_v18  ;;  %v2290_v58 = vadd.f32 %v2210_v56, %v10183_v43  ;;  %v8357_v18 = vld [vmem:[#allocation5 + $0x120] sm:$0xff]  ;;  %v8360_v55 = vld [vmem:[#allocation5 + $0x130] sm:$0xff] }
 0x4f1   :  { %v8363_v56 = vld [vmem:[#allocation5 + $0x110] sm:$0xff] }
 0x4f2   :  { %5761 = vpow2.f32 %v4388_v20  ;;  %v4389_v32 = vmul.f32 -1.442695, %v2290_v58  ;;  %v8368_v58 = vld [vmem:[#allocation5 + $0x108] sm:$0xff] }
 0x4f4   :  { %5763 = vpow2.f32 %v4389_v32  ;;  %v8371_v32 = vld [vmem:[#allocation5 + $0x118] sm:$0xff] }
 0x4ff   :  { %v5762_v48 = vpop.eup %5761 }
 0x500   :  { %v2287_v50 = vadd.f32 1.0, %v5762_v48 }
 0x501   :  { %v5764_v51 = vpop.eup %5763 }
 0x502   :  { %5765 = vrcp.f32 %v2287_v50  ;;  %v2294_v49 = vadd.f32 1.0, %v5764_v51  ;;  %v8376_v51 = vld [vmem:[#allocation5 + $0xf8] sm:$0xff] }
 0x504   :  { %5767 = vrcp.f32 %v2294_v49 }
 0x50e   :  { %v8319_v63 = vpop.f32.mrf.mxu1  ;;  %v2371_v29 = vpop.f32.mrf.mxu0 }
 0x50f   :  { %v5766_v11 = vpop.eup %5765  ;;  %v2372_v43 = vadd.f32 %v2371_v29, %v7275_v30  ;;  %v8404_v29 = vld [vmem:[#allocation5 + $0xd0] sm:$0xff] }
 0x510   :  { %v2298_v41 = vmul.f32 %v5766_v11, %v2297_v54  ;;  %v5263_v3 = vpop.f32.mrf.mxu1  ;;  %v2373_v20 = vpop.f32.mrf.mxu0  ;;  %v8380_v54 = vld [vmem:[#allocation5 + $0xf0] sm:$0xff]  ;;  %v8383_v11 = vld [vmem:[#allocation5 + $0x100] sm:$0xff] }
 0x511   :  { %v5768_v15 = vpop.eup %5767  ;;  %v8386_v3 = vld [vmem:[#allocation5 + $0xe0] sm:$0xff] }
 0x512   :  { %v2299_v44 = vadd.f32 %v2298_v41, %v10184_v0  ;;  %v2301_v23 = vsub.f32 1.0, %v5768_v15  ;;  %v2303_v2 = vmul.f32 %v5768_v15, %v8036_v59  ;;  %v8337_v59 = vld [vmem:[#allocation5 + $0x150] sm:$0xff]  ;;  %v8393_v15 = vld [vmem:[#allocation5 + $0xe8] sm:$0xff] }
 0x514   :  { %5769 = vtanh.f32 %v2299_v44  ;;  %v8390_v44 = vld [vmem:[#allocation5 + $0xd8] sm:$0xff] }
 0x521   :  { %v5770_v1 = vpop.eup %5769 }
 0x522   :  { %v2302_v12 = vmul.f32 %v5770_v1, %v2301_v23  ;;  %v8396_v1 = vld [vmem:[#allocation5 + $0xc8] sm:$0xff] }
 0x524   :  { %v8323_v35 = vadd.f32 %v2303_v2, %v2302_v12  ;;  %v2374_v12 = vadd.f32 %v2373_v20, %v7293_v14  ;;  %v8401_v2 = vld [vmem:[#allocation5 + $0xc0] sm:$0xff]  ;;  %v8414_v20 = vld [vmem:[#allocation5 + $0xb8] sm:$0xff] }
 0x525   :  { %10187 = vst [vmem:[#allocation22_spill] sm:$0xff] %v8414_v20 }
 0x526   :  { %2682 = vmatmul.mubr.f32.vlgmr.msra.gmra.mxu0 %v8323_v35  ;;  %5332 = vmatmul.mubr.f32.vlgmr.msra.gmra.mxu1 %v8323_v35 }
 0x527   :  { %2781 = vmatpush1.msra.mxu0 %v8327_v4  ;;  %5335 = vmatpush3.msra.mxu1 %v8330_v26 }
 0x528   :  { %2782 = vmatprep.subr.mxu0 %v8333_v40  ;;  %5336 = vmatprep.subr.mxu1 %v9845_v16 }
 0x529   :  { %2783 = vmatpush1.msra.mxu0 %v8337_v59  ;;  %5337 = vmatpush3.msra.mxu1 %v8340_v28 }
 0x52a   :  { %2784 = vmatprep.subr.mxu0 %v8343_v52  ;;  %5338 = vmatprep.subr.mxu1 %v9845_v16 }
 0x52b   :  { %2785 = vmatpush1.msra.mxu0 %v8347_v62  ;;  %5339 = vmatpush3.msra.mxu1 %v8350_v31 }
 0x52c   :  { %2786 = vmatprep.subr.mxu0 %v8353_v10  ;;  %5340 = vmatprep.subr.mxu1 %v9845_v16 }
 0x52d   :  { %2787 = vmatpush1.msra.mxu0 %v8357_v18  ;;  %5341 = vmatpush3.msra.mxu1 %v8360_v55 }
 0x52e   :  { %2788 = vmatprep.subr.mxu0 %v8363_v56  ;;  %5342 = vmatprep.subr.mxu1 %v9845_v16 }
 0x52f   :  { %2789 = vmatpush1.msra.mxu0 %v8368_v58  ;;  %5343 = vmatpush3.msra.mxu1 %v8371_v32 }
 0x530   :  { %v2512_v48 = vpop.f32.mrf.mxu0  ;;  %v8374_v50 = vpop.f32.mrf.mxu1  ;;  %2790 = vmatprep.subr.mxu0 %v8376_v51  ;;  %5344 = vmatprep.subr.mxu1 %v9845_v16 }
 0x531   :  { %v2587_v49 = vadd.f32 %v2512_v48, %v2372_v43  ;;  %2791 = vmatpush1.msra.mxu0 %v8380_v54  ;;  %5345 = vmatpush3.msra.mxu1 %v8383_v11  ;;  %v8407_v43 = vld [vmem:[#allocation5 + $0xb0] sm:$0xff] }
 0x532   :  { %v5298_v41 = vpop.f32.mrf.mxu1  ;;  %2792 = vmatprep.subr.mxu0 %v8386_v3  ;;  %5346 = vmatprep.subr.mxu1 %v9845_v16  ;;  %v2514_v23 = vpop.f32.mrf.mxu0  ;;  %10185 = vst [vmem:[#allocation12_spill] sm:$0xff] %v8407_v43 }
 0x533   :  { %v4390_v0 = vmul.f32 -1.442695, %v2587_v49  ;;  %2793 = vmatpush1.msra.mxu0 %v8390_v44  ;;  %5347 = vmatpush3.msra.mxu1 %v8393_v15  ;;  %v2594_v48 = vadd.f32 %v2514_v23, %v2374_v12  ;;  %v8411_v49 = vld [vmem:[#allocation5 + $0xa8] sm:$0xff]  ;;  %v8417_v41 = vld [vmem:[#allocation5 + $0x98] sm:$0xff]  ;;  %v8427_v23 = vld [vmem:[#allocation5 + $0x80] sm:$0xff] }
 0x534   :  { %2794 = vmatprep.subr.mxu0 %v8396_v1  ;;  %5348 = vmatprep.subr.mxu1 %v9845_v16  ;;  %10186 = vst [vmem:[#allocation13_spill] sm:$0xff] %v8411_v49  ;;  %10188 = vst [vmem:[#allocation29_spill] sm:$0xff] %v8417_v41 }
 0x535   :  { %5771 = vpow2.f32 %v4390_v0  ;;  %2795 = vmatpush1.msra.mxu0 %v8401_v2  ;;  %5349 = vmatpush3.msra.mxu1 %v8404_v29  ;;  %v8421_v0 = vld [vmem:[#allocation5 + $0x90] sm:$0xff]  ;;  %10191 = vst [vmem:[#allocation32_spill] sm:$0xff] %v8427_v23  ;;  %v4391_v12 = vmul.f32 -1.442695, %v2594_v48 }
 0x536   :  { %2796 = vmatprep.subr.mxu0 %v8407_v43  ;;  %5350 = vmatprep.subr.mxu1 %v9845_v16  ;;  %10189 = vst [vmem:[#allocation30_spill] sm:$0xff] %v8421_v0  ;;  %v8424_v43 = vld [vmem:[#allocation5 + $0xa0] sm:$0xff]  ;;  %v8447_v48 = vld [vmem:[#allocation5 + $0x50] sm:$0xff] }
 0x537   :  { %2797 = vmatpush1.msra.mxu0 %v8411_v49  ;;  %5351 = vmatpush3.msra.mxu1 %v8414_v20  ;;  %10190 = vst [vmem:[#allocation31_spill] sm:$0xff] %v8424_v43  ;;  %v8431_v20 = vld [vmem:[#allocation5 + $0x78] sm:$0xff]  ;;  %10197 = vst [vmem:[#allocation38_spill] sm:$0xff] %v8447_v48  ;;  %5773 = vpow2.f32 %v4391_v12 }
 0x538   :  { %2798 = vmatprep.subr.mxu0 %v8417_v41  ;;  %5352 = vmatprep.subr.mxu1 %v9845_v16  ;;  %10192 = vst [vmem:[#allocation33_spill] sm:$0xff] %v8431_v20  ;;  %v8434_v41 = vld [vmem:[#allocation5 + $0x88] sm:$0xff]  ;;  %v8544_v49 = vld [vmem:[#allocation7 + $0xf8] sm:$0xff] }
 0x539   :  { %2799 = vmatpush1.msra.mxu0 %v8421_v0  ;;  %5353 = vmatpush3.msra.mxu1 %v8424_v43  ;;  %10193 = vst [vmem:[#allocation34_spill] sm:$0xff] %v8434_v41  ;;  %v8437_v0 = vld [vmem:[#allocation5 + $0x68] sm:$0xff]  ;;  %v8441_v43 = vld [vmem:[#allocation5 + $0x60] sm:$0xff]  ;;  %10224 = vst [vmem:[#allocation64_spill] sm:$0xff] %v8544_v49 }
 0x53a   :  { %2800 = vmatprep.subr.mxu0 %v8427_v23  ;;  %5354 = vmatprep.subr.mxu1 %v9845_v16  ;;  %10194 = vst [vmem:[#allocation35_spill] sm:$0xff] %v8437_v0  ;;  %10195 = vst [vmem:[#allocation36_spill] sm:$0xff] %v8441_v43  ;;  %v8444_v23 = vld [vmem:[#allocation5 + $0x70] sm:$0xff] }
 0x53b   :  { %2801 = vmatpush1.msra.mxu0 %v8431_v20  ;;  %5355 = vmatpush3.msra.mxu1 %v8434_v41  ;;  %10196 = vst [vmem:[#allocation37_spill] sm:$0xff] %v8444_v23  ;;  %v8451_v41 = vld [vmem:[#allocation5 + $0x48] sm:$0xff]  ;;  %v8471_v20 = vld [vmem:[#allocation5 + $0x18] sm:$0xff] }
 0x53c   :  { %2802 = vmatprep.subr.mxu0 %v8437_v0  ;;  %5356 = vmatprep.subr.mxu1 %v9845_v16  ;;  %10198 = vst [vmem:[#allocation39_spill] sm:$0xff] %v8451_v41  ;;  %v8454_v0 = vld [vmem:[#allocation5 + $0x58] sm:$0xff]  ;;  %10204 = vst [vmem:[#allocation45_spill] sm:$0xff] %v8471_v20 }
 0x53d   :  { %2803 = vmatpush1.msra.mxu0 %v8441_v43  ;;  %5357 = vmatpush3.msra.mxu1 %v8444_v23  ;;  %10199 = vst [vmem:[#allocation40_spill] sm:$0xff] %v8454_v0  ;;  %v8457_v43 = vld [vmem:[#allocation5 + $0x38] sm:$0xff]  ;;  %v8461_v23 = vld [vmem:[#allocation5 + $0x30] sm:$0xff] }
 0x53e   :  { %2804 = vmatprep.subr.mxu0 %v8447_v48  ;;  %5358 = vmatprep.subr.mxu1 %v9845_v16  ;;  %10200 = vst [vmem:[#allocation41_spill] sm:$0xff] %v8457_v43  ;;  %10201 = vst [vmem:[#allocation42_spill] sm:$0xff] %v8461_v23  ;;  %v8464_v48 = vld [vmem:[#allocation5 + $0x40] sm:$0xff] }
 0x53f   :  { %2805 = vmatpush1.msra.mxu0 %v8451_v41  ;;  %5359 = vmatpush3.msra.mxu1 %v8454_v0  ;;  %10202 = vst [vmem:[#allocation43_spill] sm:$0xff] %v8464_v48  ;;  %v8467_v41 = vld [vmem:[#allocation5 + $0x20] sm:$0xff] }
 0x540   :  { %2806 = vmatprep.subr.mxu0 %v8457_v43  ;;  %5360 = vmatprep.subr.mxu1 %v9845_v16  ;;  %10203 = vst [vmem:[#allocation44_spill] sm:$0xff] %v8467_v41  ;;  %v8474_v43 = vld [vmem:[#allocation5 + $0x28] sm:$0xff] }
 0x541   :  { %2807 = vmatpush1.msra.mxu0 %v8461_v23  ;;  %5361 = vmatpush3.msra.mxu1 %v8464_v48  ;;  %10205 = vst [vmem:[#allocation46_spill] sm:$0xff] %v8474_v43  ;;  %v8477_v23 = vld [vmem:[#allocation5 + $0x8] sm:$0xff]  ;;  %v8481_v48 = vld [vmem:[#allocation5] sm:$0xff] }
 0x542   :  { %v5772_v12 = vpop.eup %5771  ;;  %2808 = vmatprep.subr.mxu0 %v8467_v41  ;;  %5362 = vmatprep.subr.mxu1 %v9845_v16  ;;  %10206 = vst [vmem:[#allocation47_spill] sm:$0xff] %v8477_v23  ;;  %10207 = vst [vmem:[#allocation48_spill] sm:$0xff] %v8481_v48  ;;  %v8526_v41 = vld [vmem:[#allocation7 + $0x120] sm:$0xff] }
 0x543   :  { %v2591_v0 = vadd.f32 1.0, %v5772_v12  ;;  %2809 = vmatpush1.msra.mxu0 %v8471_v20  ;;  %5363 = vmatpush3.msra.mxu1 %v8474_v43  ;;  %v8485_v12 = vld [vmem:[#allocation5 + $0x10] sm:$0xff]  ;;  %10219 = vst [vmem:[#allocation60_spill] sm:$0xff] %v8526_v41 }
 0x544   :  { %2810 = vmatprep.subr.mxu0 %v8477_v23  ;;  %5364 = vmatprep.subr.mxu1 %v9845_v16  ;;  %10208 = vst [vmem:[#allocation49_spill] sm:$0xff] %v8485_v12  ;;  %v8492_v23 = vld [vmem:[#allocation7 + $0x170] sm:$0xff]  ;;  %v5774_v20 = vpop.eup %5773 }
 0x545   :  { %5775 = vrcp.f32 %v2591_v0  ;;  %2811 = vmatpush1.msra.mxu0 %v8481_v48  ;;  %2844 = vmatprep.mubr.f32.mxu0 %v9845_v16  ;;  %10209 = vst [vmem:[#allocation50_spill] sm:$0xff] %v8492_v23  ;;  %v8496_v0 = vld [vmem:[#allocation7 + $0x168] sm:$0xff]  ;;  %v8499_v48 = vld [vmem:[#allocation7 + $0x178] sm:$0xff]  ;;  %v8506_v43 = vld [vmem:[#allocation7 + $0x150] sm:$0xff] }
 0x546   :  { %5365 = vmatpush3.msra.mxu1 %v8485_v12  ;;  %5366 = vmatprep.mubr.msk.f32.mxu1 %vm6359_vm1, %v9845_v16  ;;  %10210 = vst [vmem:[#allocation51_spill] sm:$0xff] %v8496_v0  ;;  %10211 = vst [vmem:[#allocation53_spill] sm:$0xff] %v8499_v48  ;;  %v8502_v12 = vld [vmem:[#allocation7 + $0x158] sm:$0xff] }
 0x547   :  { %2845 = vmatmul.mubr.f32.vlgmr.msra.gmra.mxu0 %v8323_v35  ;;  %5367 = vmatmul.mubr.f32.vlgmr.msra.gmra.mxu1 %v8323_v35  ;;  %10212 = vst [vmem:[#allocation52_spill] sm:$0xff] %v8502_v12  ;;  %10213 = vst [vmem:[#allocation54_spill] sm:$0xff] %v8506_v43 }
 0x548   :  { %2921 = vmatprep.subr.mxu0 %v8492_v23  ;;  %5369 = vmatprep.subr.mxu1 %v9845_v16  ;;  %v8509_v23 = vld [vmem:[#allocation7 + $0x160] sm:$0xff] }
 0x549   :  { %2922 = vmatpush1.msra.mxu0 %v8496_v0  ;;  %5370 = vmatpush3.msra.mxu1 %v8499_v48  ;;  %10214 = vst [vmem:[#allocation56_spill] sm:$0xff] %v8509_v23  ;;  %v8512_v0 = vld [vmem:[#allocation7 + $0x140] sm:$0xff]  ;;  %v8516_v48 = vld [vmem:[#allocation7 + $0x138] sm:$0xff] }
 0x54a   :  { %2923 = vmatprep.subr.mxu0 %v8502_v12  ;;  %5371 = vmatprep.subr.mxu1 %v9845_v16  ;;  %10215 = vst [vmem:[#allocation55_spill] sm:$0xff] %v8512_v0  ;;  %10216 = vst [vmem:[#allocation57_spill] sm:$0xff] %v8516_v48  ;;  %v8519_v12 = vld [vmem:[#allocation7 + $0x148] sm:$0xff] }
 0x54b   :  { %2924 = vmatpush1.msra.mxu0 %v8506_v43  ;;  %5372 = vmatpush3.msra.mxu1 %v8509_v23  ;;  %10217 = vst [vmem:[#allocation59_spill] sm:$0xff] %v8519_v12  ;;  %v8522_v43 = vld [vmem:[#allocation7 + $0x128] sm:$0xff]  ;;  %v2598_v23 = vadd.f32 1.0, %v5774_v20  ;;  %v8541_v20 = vld [vmem:[#allocation7 + $0x118] sm:$0xff] }
 0x54c   :  { %2925 = vmatprep.subr.mxu0 %v8512_v0  ;;  %5373 = vmatprep.subr.mxu1 %v9845_v16  ;;  %10218 = vst [vmem:[#allocation58_spill] sm:$0xff] %v8522_v43  ;;  %v8529_v0 = vld [vmem:[#allocation7 + $0x130] sm:$0xff]  ;;  %10223 = vst [vmem:[#allocation65_spill] sm:$0xff] %v8541_v20 }
 0x54d   :  { %2926 = vmatpush1.msra.mxu0 %v8516_v48  ;;  %5374 = vmatpush3.msra.mxu1 %v8519_v12  ;;  %10220 = vst [vmem:[#allocation62_spill] sm:$0xff] %v8529_v0  ;;  %v8532_v48 = vld [vmem:[#allocation7 + $0x110] sm:$0xff]  ;;  %v8538_v12 = vld [vmem:[#allocation7 + $0x108] sm:$0xff]  ;;  %5777 = vrcp.f32 %v2598_v23 }
 0x54e   :  { %2927 = vmatprep.subr.mxu0 %v8522_v43  ;;  %5375 = vmatprep.subr.mxu1 %v9845_v16  ;;  %10221 = vst [vmem:[#allocation61_spill] sm:$0xff] %v8532_v48  ;;  %v2601_v43 = vadd.f32 %v8132_v47, %v8374_v50  ;;  %10222 = vst [vmem:[#allocation63_spill] sm:$0xff] %v8538_v12  ;;  %v8550_v47 = vld [vmem:[#allocation7 + $0xf0] sm:$0xff]  ;;  %v8553_v50 = vld [vmem:[#allocation7 + $0x100] sm:$0xff] }
 0x54f   :  { %2928 = vmatpush1.msra.mxu0 %v8526_v41  ;;  %5376 = vmatpush3.msra.mxu1 %v8529_v0  ;;  %10225 = vst [vmem:[#allocation66_spill] sm:$0xff] %v8553_v50  ;;  %v8573_v23 = vld [vmem:[#allocation7 + $0xd0] sm:$0xff] }
 0x550   :  { %2929 = vmatprep.subr.mxu0 %v8532_v48  ;;  %5377 = vmatprep.subr.mxu1 %v9845_v16  ;;  %v2443_v48 = vadd.f32 %v8319_v63, %v7367_v5  ;;  %v8563_v63 = vld [vmem:[#allocation7 + $0xe8] sm:$0xff]  ;;  %10231 = vst [vmem:[#allocation72_spill] sm:$0xff] %v8573_v23 }
 0x551   :  { %2930 = vmatpush1.msra.mxu0 %v8538_v12  ;;  %5378 = vmatpush3.msra.mxu1 %v8541_v20  ;;  %v8556_v20 = vld [vmem:[#allocation7 + $0xe0] sm:$0xff]  ;;  %v8560_v12 = vld [vmem:[#allocation7 + $0xd8] sm:$0xff]  ;;  %10228 = vst [vmem:[#allocation69_spill] sm:$0xff] %v8563_v63 }
 0x552   :  { %v5776_v41 = vpop.eup %5775  ;;  %2931 = vmatprep.subr.mxu0 %v8544_v49  ;;  %5379 = vmatprep.subr.mxu1 %v9845_v16  ;;  %10226 = vst [vmem:[#allocation68_spill] sm:$0xff] %v8556_v20  ;;  %10227 = vst [vmem:[#allocation67_spill] sm:$0xff] %v8560_v12 }
 0x553   :  { %v2602_v0 = vmul.f32 %v5776_v41, %v2601_v43  ;;  %2932 = vmatpush1.msra.mxu0 %v8550_v47  ;;  %5380 = vmatpush3.msra.mxu1 %v8553_v50  ;;  %v8566_v43 = vld [vmem:[#allocation7 + $0xc8] sm:$0xff]  ;;  %v8570_v41 = vld [vmem:[#allocation7 + $0xc0] sm:$0xff]  ;;  %v8657_v50 = vld [vmem:[#allocation7 + $0x10] sm:$0xff] }
 0x554   :  { %2933 = vmatprep.subr.mxu0 %v8556_v20  ;;  %5381 = vmatprep.subr.mxu1 %v9845_v16  ;;  %10229 = vst [vmem:[#allocation71_spill] sm:$0xff] %v8566_v43  ;;  %10230 = vst [vmem:[#allocation70_spill] sm:$0xff] %v8570_v41 }
 0x555   :  { %v2603_v49 = vadd.f32 %v2602_v0, %v2443_v48  ;;  %2934 = vmatpush1.msra.mxu0 %v8560_v12  ;;  %5382 = vmatpush3.msra.mxu1 %v8563_v63  ;;  %v8576_v48 = vld [vmem:[#allocation7 + $0xb0] sm:$0xff]  ;;  %v8580_v0 = vld [vmem:[#allocation7 + $0xa8] sm:$0xff]  ;;  %v8636_v12 = vld [vmem:[#allocation7 + $0x20] sm:$0xff] }
 0x556   :  { %2935 = vmatprep.subr.mxu0 %v8566_v43  ;;  %5383 = vmatprep.subr.mxu1 %v9845_v16  ;;  %10232 = vst [vmem:[#allocation74_spill] sm:$0xff] %v8576_v48  ;;  %10233 = vst [vmem:[#allocation73_spill] sm:$0xff] %v8580_v0  ;;  %v8583_v43 = vld [vmem:[#allocation7 + $0xb8] sm:$0xff] }
 0x557   :  { %5779 = vtanh.f32 %v2603_v49  ;;  %2936 = vmatpush1.msra.mxu0 %v8570_v41  ;;  %5384 = vmatpush3.msra.mxu1 %v8573_v23  ;;  %10234 = vst [vmem:[#allocation75_spill] sm:$0xff] %v8583_v43  ;;  %v8586_v49 = vld [vmem:[#allocation7 + $0x98] sm:$0xff]  ;;  %v8590_v23 = vld [vmem:[#allocation7 + $0x90] sm:$0xff]  ;;  %v8596_v41 = vld [vmem:[#allocation7 + $0x80] sm:$0xff] }
 0x558   :  { %2937 = vmatprep.subr.mxu0 %v8576_v48  ;;  %5385 = vmatprep.subr.mxu1 %v9845_v16  ;;  %10235 = vst [vmem:[#allocation77_spill] sm:$0xff] %v8586_v49  ;;  %10236 = vst [vmem:[#allocation76_spill] sm:$0xff] %v8590_v23  ;;  %v8593_v48 = vld [vmem:[#allocation7 + $0xa0] sm:$0xff] }
 0x559   :  { %2938 = vmatpush1.msra.mxu0 %v8580_v0  ;;  %5386 = vmatpush3.msra.mxu1 %v8583_v43  ;;  %10237 = vst [vmem:[#allocation78_spill] sm:$0xff] %v8593_v48  ;;  %10238 = vst [vmem:[#allocation80_spill] sm:$0xff] %v8596_v41  ;;  %v8600_v43 = vld [vmem:[#allocation7 + $0x78] sm:$0xff]  ;;  %v8606_v0 = vld [vmem:[#allocation7 + $0x68] sm:$0xff] }
 0x55a   :  { %2939 = vmatprep.subr.mxu0 %v8586_v49  ;;  %5387 = vmatprep.subr.mxu1 %v9845_v16  ;;  %10239 = vst [vmem:[#allocation79_spill] sm:$0xff] %v8600_v43  ;;  %v8603_v49 = vld [vmem:[#allocation7 + $0x88] sm:$0xff]  ;;  %10241 = vst [vmem:[#allocation83_spill] sm:$0xff] %v8606_v0 }
 0x55b   :  { %2940 = vmatpush1.msra.mxu0 %v8590_v23  ;;  %5388 = vmatpush3.msra.mxu1 %v8593_v48  ;;  %10240 = vst [vmem:[#allocation81_spill] sm:$0xff] %v8603_v49  ;;  %v8610_v48 = vld [vmem:[#allocation7 + $0x60] sm:$0xff]  ;;  %v5778_v23 = vpop.eup %5777  ;;  %10250 = vst [vmem:[#allocation91_spill] sm:$0xff] %v8636_v12 }
 0x55c   :  { %2941 = vmatprep.subr.mxu0 %v8596_v41  ;;  %5389 = vmatprep.subr.mxu1 %v9845_v16  ;;  %10242 = vst [vmem:[#allocation82_spill] sm:$0xff] %v8610_v48  ;;  %v8613_v41 = vld [vmem:[#allocation7 + $0x70] sm:$0xff]  ;;  %v2605_v63 = vsub.f32 1.0, %v5778_v23  ;;  %v2607_v20 = vmul.f32 %v5778_v23, %v8185_v45  ;;  %v8684_v23 = vld [vmem:[#allocation3 + $0x140] sm:$0xff] }
 0x55d   :  { %2942 = vmatpush1.msra.mxu0 %v8600_v43  ;;  %5390 = vmatpush3.msra.mxu1 %v8603_v49  ;;  %10243 = vst [vmem:[#allocation84_spill] sm:$0xff] %v8613_v41  ;;  %v8616_v43 = vld [vmem:[#allocation7 + $0x50] sm:$0xff]  ;;  %v8620_v49 = vld [vmem:[#allocation7 + $0x48] sm:$0xff] }
 0x55e   :  { %2943 = vmatprep.subr.mxu0 %v8606_v0  ;;  %5391 = vmatprep.subr.mxu1 %v9845_v16  ;;  %10244 = vst [vmem:[#allocation86_spill] sm:$0xff] %v8616_v43  ;;  %10245 = vst [vmem:[#allocation85_spill] sm:$0xff] %v8620_v49  ;;  %v8623_v0 = vld [vmem:[#allocation7 + $0x58] sm:$0xff]  ;;  %v8668_v45 = vld [vmem:[#allocation3 + $0x170] sm:$0xff] }
 0x55f   :  { %2944 = vmatpush1.msra.mxu0 %v8610_v48  ;;  %5392 = vmatpush3.msra.mxu1 %v8613_v41  ;;  %10246 = vst [vmem:[#allocation87_spill] sm:$0xff] %v8623_v0  ;;  %v8626_v48 = vld [vmem:[#allocation7 + $0x38] sm:$0xff]  ;;  %v8630_v41 = vld [vmem:[#allocation7 + $0x30] sm:$0xff] }
 0x560   :  { %2945 = vmatprep.subr.mxu0 %v8616_v43  ;;  %5393 = vmatprep.subr.mxu1 %v9845_v16  ;;  %10247 = vst [vmem:[#allocation88_spill] sm:$0xff] %v8626_v48  ;;  %10248 = vst [vmem:[#allocation89_spill] sm:$0xff] %v8630_v41  ;;  %v8633_v43 = vld [vmem:[#allocation7 + $0x40] sm:$0xff] }
 0x561   :  { %2946 = vmatpush1.msra.mxu0 %v8620_v49  ;;  %5394 = vmatpush3.msra.mxu1 %v8623_v0  ;;  %10249 = vst [vmem:[#allocation90_spill] sm:$0xff] %v8633_v43  ;;  %v8640_v0 = vld [vmem:[#allocation7 + $0x18] sm:$0xff] }
 0x562   :  { %2947 = vmatprep.subr.mxu0 %v8626_v48  ;;  %5395 = vmatprep.subr.mxu1 %v9845_v16  ;;  %10251 = vst [vmem:[#allocation92_spill] sm:$0xff] %v8640_v0  ;;  %v8643_v48 = vld [vmem:[#allocation7 + $0x28] sm:$0xff] }
 0x563   :  { %2948 = vmatpush1.msra.mxu0 %v8630_v41  ;;  %5396 = vmatpush3.msra.mxu1 %v8633_v43  ;;  %v8647_v43 = vld [vmem:[#allocation7 + $0x8] sm:$0xff] }
 0x564   :  { %v5780_v49 = vpop.eup %5779  ;;  %2949 = vmatprep.subr.mxu0 %v8636_v12  ;;  %5397 = vmatprep.subr.mxu1 %v9845_v16  ;;  %v8651_v12 = vld [vmem:[#allocation7] sm:$0xff] }
 0x565   :  { %2950 = vmatpush1.msra.mxu0 %v8640_v0  ;;  %5398 = vmatpush3.msra.mxu1 %v8643_v48  ;;  %v2606_v41 = vmul.f32 %v5780_v49, %v2605_v63  ;;  %v8676_v63 = vld [vmem:[#allocation3 + $0x158] sm:$0xff] }
 0x566   :  { %2951 = vmatprep.subr.mxu0 %v8647_v43  ;;  %5399 = vmatprep.subr.mxu1 %v9845_v16  ;;  %v8688_v49 = vld [vmem:[#allocation3 + $0x138] sm:$0xff] }
 0x567   :  { %2952 = vmatpush1.msra.mxu0 %v8651_v12  ;;  %2985 = vmatprep.mubr.f32.mxu0 %v9845_v16  ;;  %v8655_v0 = vadd.f32 %v2607_v20, %v2606_v41  ;;  %v8672_v20 = vld [vmem:[#allocation3 + $0x168] sm:$0xff]  ;;  %v8680_v41 = vld [vmem:[#allocation3 + $0x150] sm:$0xff]  ;;  %10253 = vst [vmem:[#allocation94_spill] sm:$0xff] %v8688_v49 }
 0x568   :  { %5400 = vmatpush3.msra.mxu1 %v8657_v50  ;;  %5401 = vmatprep.mubr.msk.f32.mxu1 %vm6359_vm1, %v9845_v16  ;;  %10252 = vst [vmem:[#allocation93_spill] sm:$0xff] %v8680_v41 }
 0x569   :  { %4392 = vst [vmem:[%s9529_s9 + $0x18] sm:$0xff] %v8655_v0  ;;  %2986 = vmatmul.mubr.f32.vlgmr.msra.gmra.mxu0 %v8655_v0  ;;  %5402 = vmatmul.mubr.f32.vlgmr.msra.gmra.mxu1 %v8655_v0 }
 0x56a   :  { %3092 = vmatprep.subr.mxu0 %v8668_v45  ;;  %5404 = vmatprep.subr.mxu1 %v9845_v16 }
 0x56b   :  { %3093 = vmatpush1.msra.mxu0 %v8672_v20  ;;  %5405 = vmatpush3.msra.mxu1 %v8199_v36  ;;  %v8692_v36 = vld [vmem:[#allocation3 + $0x128] sm:$0xff] }
 0x56c   :  { %3094 = vmatprep.subr.mxu0 %v8676_v63  ;;  %5406 = vmatprep.subr.mxu1 %v9845_v16 }
 0x56d   :  { %3095 = vmatpush1.msra.mxu0 %v8680_v41  ;;  %5407 = vmatpush3.msra.mxu1 %v8205_v57  ;;  %v8696_v41 = vld [vmem:[#allocation3 + $0x120] sm:$0xff]  ;;  %v8700_v57 = vld [vmem:[#allocation3 + $0x110] sm:$0xff] }
 0x56e   :  { %3096 = vmatprep.subr.mxu0 %v8684_v23  ;;  %5408 = vmatprep.subr.mxu1 %v9845_v16  ;;  %10254 = vst [vmem:[#allocation95_spill] sm:$0xff] %v8696_v41 }
 0x56f   :  { %3097 = vmatpush1.msra.mxu0 %v8688_v49  ;;  %5409 = vmatpush3.msra.mxu1 %v8211_v25  ;;  %v8704_v49 = vld [vmem:[#allocation3 + $0x108] sm:$0xff]  ;;  %v8708_v25 = vld [vmem:[#allocation3 + $0xf8] sm:$0xff] }
 0x570   :  { %3098 = vmatprep.subr.mxu0 %v8692_v36  ;;  %5410 = vmatprep.subr.mxu1 %v9845_v16  ;;  %10255 = vst [vmem:[#allocation96_spill] sm:$0xff] %v8704_v49 }
 0x571   :  { %3099 = vmatpush1.msra.mxu0 %v8696_v41  ;;  %5411 = vmatpush3.msra.mxu1 %v8217_v46  ;;  %v8712_v41 = vld [vmem:[#allocation3 + $0xf0] sm:$0xff]  ;;  %v8716_v46 = vld [vmem:[#allocation3 + $0xe0] sm:$0xff] }
 0x572   :  { %3100 = vmatprep.subr.mxu0 %v8700_v57  ;;  %5412 = vmatprep.subr.mxu1 %v9845_v16  ;;  %10256 = vst [vmem:[#allocation97_spill] sm:$0xff] %v8712_v41 }
 0x573   :  { %3101 = vmatpush1.msra.mxu0 %v8704_v49  ;;  %5413 = vmatpush3.msra.mxu1 %v8223_v8  ;;  %v8720_v49 = vld [vmem:[#allocation3 + $0xd8] sm:$0xff]  ;;  %v8724_v8 = vld [vmem:[#allocation3 + $0xc8] sm:$0xff] }
 0x574   :  { %3102 = vmatprep.subr.mxu0 %v8708_v25  ;;  %5414 = vmatprep.subr.mxu1 %v9845_v16  ;;  %10257 = vst [vmem:[#allocation98_spill] sm:$0xff] %v8720_v49 }
 0x575   :  { %3103 = vmatpush1.msra.mxu0 %v8712_v41  ;;  %5415 = vmatpush3.msra.mxu1 %v8229_v13  ;;  %v8728_v41 = vld [vmem:[#allocation3 + $0xc0] sm:$0xff]  ;;  %v8732_v13 = vld [vmem:[#allocation3 + $0xb0] sm:$0xff] }
 0x576   :  { %3104 = vmatprep.subr.mxu0 %v8716_v46  ;;  %5416 = vmatprep.subr.mxu1 %v9845_v16  ;;  %10258 = vst [vmem:[#allocation99_spill] sm:$0xff] %v8728_v41 }
 0x577   :  { %3105 = vmatpush1.msra.mxu0 %v8720_v49  ;;  %5417 = vmatpush3.msra.mxu1 %v8235_v6  ;;  %v8736_v49 = vld [vmem:[#allocation3 + $0xa8] sm:$0xff]  ;;  %v8740_v6 = vld [vmem:[#allocation3 + $0x98] sm:$0xff] }
 0x578   :  { %3106 = vmatprep.subr.mxu0 %v8724_v8  ;;  %5418 = vmatprep.subr.mxu1 %v9845_v16  ;;  %10259 = vst [vmem:[#allocation100_spill] sm:$0xff] %v8736_v49 }
 0x579   :  { %3107 = vmatpush1.msra.mxu0 %v8728_v41  ;;  %5419 = vmatpush3.msra.mxu1 %v8241_v27  ;;  %v8744_v41 = vld [vmem:[#allocation3 + $0x90] sm:$0xff]  ;;  %v8748_v27 = vld [vmem:[#allocation3 + $0x80] sm:$0xff] }
 0x57a   :  { %3108 = vmatprep.subr.mxu0 %v8732_v13  ;;  %5420 = vmatprep.subr.mxu1 %v9845_v16  ;;  %10260 = vst [vmem:[#allocation101_spill] sm:$0xff] %v8744_v41  ;;  %10261 = vst [vmem:[#allocation102_spill] sm:$0xff] %v8748_v27 }
 0x57b   :  { %3109 = vmatpush1.msra.mxu0 %v8736_v49  ;;  %5421 = vmatpush3.msra.mxu1 %v8247_v24  ;;  %v8752_v49 = vld [vmem:[#allocation3 + $0x78] sm:$0xff]  ;;  %v8756_v24 = vld [vmem:[#allocation3 + $0x68] sm:$0xff] }
 0x57c   :  { %3110 = vmatprep.subr.mxu0 %v8740_v6  ;;  %5422 = vmatprep.subr.mxu1 %v9845_v16  ;;  %10262 = vst [vmem:[#allocation103_spill] sm:$0xff] %v8752_v49  ;;  %10263 = vst [vmem:[#allocation104_spill] sm:$0xff] %v8756_v24 }
 0x57d   :  { %3111 = vmatpush1.msra.mxu0 %v8744_v41  ;;  %5423 = vmatpush3.msra.mxu1 %v8253_v34  ;;  %v8760_v41 = vld [vmem:[#allocation3 + $0x60] sm:$0xff]  ;;  %v8764_v34 = vld [vmem:[#allocation3 + $0x50] sm:$0xff] }
 0x57e   :  { %3112 = vmatprep.subr.mxu0 %v8748_v27  ;;  %5424 = vmatprep.subr.mxu1 %v9845_v16  ;;  %10264 = vst [vmem:[#allocation105_spill] sm:$0xff] %v8760_v41  ;;  %10265 = vst [vmem:[#allocation106_spill] sm:$0xff] %v8764_v34 }
 0x57f   :  { %3113 = vmatpush1.msra.mxu0 %v8752_v49  ;;  %5425 = vmatpush3.msra.mxu1 %v8259_v22  ;;  %v8768_v49 = vld [vmem:[#allocation3 + $0x48] sm:$0xff] }
 0x580   :  { %3114 = vmatprep.subr.mxu0 %v8756_v24  ;;  %5426 = vmatprep.subr.mxu1 %v9845_v16  ;;  %10266 = vst [vmem:[#allocation107_spill] sm:$0xff] %v8768_v49 }
 0x581   :  { %3115 = vmatpush1.msra.mxu0 %v8760_v41  ;;  %5427 = vmatpush3.msra.mxu1 %v8265_v38 }
 0x582   :  { %3116 = vmatprep.subr.mxu0 %v8764_v34  ;;  %5428 = vmatprep.subr.mxu1 %v9845_v16 }
 0x583   :  { %3117 = vmatpush1.msra.mxu0 %v8768_v49  ;;  %5429 = vmatpush3.msra.mxu1 %v8271_v42  ;;  %v10267_v42 = vld [vmem:[#allocation16_spill] sm:$0xff] }
 0x584   :  { %3118 = vmatprep.subr.mxu0 %v8274_v7  ;;  %5430 = vmatprep.subr.mxu1 %v9845_v16 }
 0x585   :  { %3119 = vmatpush1.msra.mxu0 %v8278_v19  ;;  %5431 = vmatpush3.msra.mxu1 %v8281_v17 }
 0x586   :  { %3120 = vmatprep.subr.mxu0 %v8284_v9  ;;  %5432 = vmatprep.subr.mxu1 %v9845_v16 }
 0x587   :  { %3121 = vmatpush1.msra.mxu0 %v8288_v21  ;;  %5433 = vmatpush3.msra.mxu1 %v8291_v33  ;;  %v10268_v21 = vld [vmem:[#allocation17_spill] sm:$0xff] }
 0x588   :  { %3122 = vmatprep.subr.mxu0 %v8294_v37  ;;  %5434 = vmatprep.subr.mxu1 %v9845_v16 }
 0x589   :  { %3123 = vmatpush1.msra.mxu0 %v8298_v39  ;;  %5435 = vmatpush3.msra.mxu1 %v8301_v60 }
 0x58a   :  { %3156 = vmatprep.mubr.f32.mxu0 %v9845_v16  ;;  %5436 = vmatprep.mubr.msk.f32.mxu1 %vm6359_vm1, %v9845_v16 }
 0x58b   :  { %3255 = vmatprep.subr.mxu0 %v8307_v61  ;;  %5439 = vmatprep.subr.mxu1 %v9845_v16 }
 0x5e6   :  { %v2683_v22 = vpop.f32.mrf.mxu0  ;;  %v2754_v38 = vpop.f32.mrf.mxu1 }
 0x5e7   :  { %v2758_v7 = vadd.f32 %v2683_v22, %v10267_v42  ;;  %v2772_v61 = vadd.f32 %v8316_v53, %v2754_v38  ;;  %v10269_v42 = vld [vmem:[#allocation24_spill] sm:$0xff]  ;;  %v10287_v38 = vld [vmem:[#allocation43_spill] sm:$0xff] }
 0x5e8   :  { %v5333_v19 = vpop.f32.mrf.mxu1  ;;  %v2685_v9 = vpop.f32.mrf.mxu0 }
 0x5e9   :  { %v4393_v17 = vmul.f32 -1.442695, %v2758_v7  ;;  %v2765_v33 = vadd.f32 %v2685_v9, %v10268_v21 }
 0x5eb   :  { %5781 = vpow2.f32 %v4393_v17  ;;  %v4394_v37 = vmul.f32 -1.442695, %v2765_v33 }
 0x5ed   :  { %5783 = vpow2.f32 %v4394_v37 }
 0x5f8   :  { %v5782_v39 = vpop.eup %5781 }
 0x5f9   :  { %v2762_v60 = vadd.f32 1.0, %v5782_v39 }
 0x5fa   :  { %v5784_v49 = vpop.eup %5783 }
 0x5fb   :  { %5785 = vrcp.f32 %v2762_v60  ;;  %v2769_v34 = vadd.f32 1.0, %v5784_v49  ;;  %v10283_v49 = vld [vmem:[#allocation39_spill] sm:$0xff]  ;;  %v10288_v60 = vld [vmem:[#allocation44_spill] sm:$0xff] }
 0x5fd   :  { %5787 = vrcp.f32 %v2769_v34  ;;  %v10286_v34 = vld [vmem:[#allocation42_spill] sm:$0xff] }
 0x607   :  { %v8792_v41 = vpop.f32.mrf.mxu1  ;;  %v2846_v53 = vpop.f32.mrf.mxu0 }
 0x608   :  { %v5786_v24 = vpop.eup %5785 }
 0x609   :  { %v2773_v27 = vmul.f32 %v5786_v24, %v2772_v61  ;;  %v5368_v22 = vpop.f32.mrf.mxu1  ;;  %v10285_v24 = vld [vmem:[#allocation41_spill] sm:$0xff] }
 0x60a   :  { %v5788_v19 = vpop.eup %5787  ;;  %v10289_v22 = vld [vmem:[#allocation45_spill] sm:$0xff] }
 0x60b   :  { %v2774_v7 = vadd.f32 %v2773_v27, %v10269_v42  ;;  %v2776_v17 = vsub.f32 1.0, %v5788_v19  ;;  %v2778_v33 = vmul.f32 %v5788_v19, %v8323_v35  ;;  %v2848_v35 = vpop.f32.mrf.mxu0  ;;  %v10284_v27 = vld [vmem:[#allocation40_spill] sm:$0xff]  ;;  %v10290_v42 = vld [vmem:[#allocation46_spill] sm:$0xff] }
 0x60c   :  { %v10292_v19 = vld [vmem:[#allocation48_spill] sm:$0xff] }
 0x60d   :  { %5789 = vtanh.f32 %v2774_v7  ;;  %v10291_v7 = vld [vmem:[#allocation47_spill] sm:$0xff] }
 0x61a   :  { %v5790_v9 = vpop.eup %5789 }
 0x61b   :  { %v2777_v21 = vmul.f32 %v5790_v9, %v2776_v17  ;;  %v10293_v17 = vld [vmem:[#allocation49_spill] sm:$0xff]  ;;  %v10294_v9 = vld [vmem:[#allocation50_spill] sm:$0xff] }
 0x61d   :  { %v8796_v37 = vadd.f32 %v2778_v33, %v2777_v21  ;;  %v10295_v21 = vld [vmem:[#allocation51_spill] sm:$0xff]  ;;  %v10296_v33 = vld [vmem:[#allocation53_spill] sm:$0xff] }
 0x61f   :  { %3157 = vmatmul.mubr.f32.vlgmr.msra.gmra.mxu0 %v8796_v37  ;;  %5437 = vmatmul.mubr.f32.vlgmr.msra.gmra.mxu1 %v8796_v37 }
 0x620   :  { %3256 = vmatpush1.msra.mxu0 %v8327_v4  ;;  %5440 = vmatpush3.msra.mxu1 %v8330_v26  ;;  %v2847_v4 = vadd.f32 %v2846_v53, %v7275_v30  ;;  %v10297_v53 = vld [vmem:[#allocation52_spill] sm:$0xff] }
 0x621   :  { %3257 = vmatprep.subr.mxu0 %v8333_v40  ;;  %5441 = vmatprep.subr.mxu1 %v9845_v16 }
 0x622   :  { %3258 = vmatpush1.msra.mxu0 %v8337_v59  ;;  %5442 = vmatpush3.msra.mxu1 %v8340_v28 }
 0x623   :  { %3259 = vmatprep.subr.mxu0 %v8343_v52  ;;  %5443 = vmatprep.subr.mxu1 %v9845_v16 }
 0x624   :  { %3260 = vmatpush1.msra.mxu0 %v8347_v62  ;;  %5444 = vmatpush3.msra.mxu1 %v8350_v31  ;;  %v2849_v31 = vadd.f32 %v2848_v35, %v7293_v14  ;;  %v10298_v35 = vld [vmem:[#allocation54_spill] sm:$0xff] }
 0x625   :  { %3261 = vmatprep.subr.mxu0 %v8353_v10  ;;  %5445 = vmatprep.subr.mxu1 %v9845_v16  ;;  %v10270_v10 = vld [vmem:[#allocation12_spill] sm:$0xff] }
 0x626   :  { %3262 = vmatpush1.msra.mxu0 %v8357_v18  ;;  %5446 = vmatpush3.msra.mxu1 %v8360_v55  ;;  %v10271_v55 = vld [vmem:[#allocation13_spill] sm:$0xff] }
 0x627   :  { %3263 = vmatprep.subr.mxu0 %v8363_v56  ;;  %5447 = vmatprep.subr.mxu1 %v9845_v16  ;;  %v10272_v56 = vld [vmem:[#allocation22_spill] sm:$0xff] }
 0x628   :  { %3264 = vmatpush1.msra.mxu0 %v8368_v58  ;;  %5448 = vmatpush3.msra.mxu1 %v8371_v32  ;;  %v10273_v58 = vld [vmem:[#allocation29_spill] sm:$0xff]  ;;  %v10274_v32 = vld [vmem:[#allocation30_spill] sm:$0xff] }
 0x629   :  { %v2987_v26 = vpop.f32.mrf.mxu0  ;;  %v8819_v40 = vpop.f32.mrf.mxu1  ;;  %3265 = vmatprep.subr.mxu0 %v8376_v51  ;;  %5449 = vmatprep.subr.mxu1 %v9845_v16  ;;  %v10275_v51 = vld [vmem:[#allocation31_spill] sm:$0xff] }
 0x62a   :  { %v3062_v59 = vadd.f32 %v2987_v26, %v2847_v4  ;;  %3266 = vmatpush1.msra.mxu0 %v8380_v54  ;;  %5450 = vmatpush3.msra.mxu1 %v8383_v11  ;;  %v10276_v54 = vld [vmem:[#allocation32_spill] sm:$0xff] }
 0x62b   :  { %v5403_v28 = vpop.f32.mrf.mxu1  ;;  %3267 = vmatprep.subr.mxu0 %v8386_v3  ;;  %5451 = vmatprep.subr.mxu1 %v9845_v16  ;;  %v2989_v62 = vpop.f32.mrf.mxu0  ;;  %v10277_v3 = vld [vmem:[#allocation33_spill] sm:$0xff]  ;;  %v10299_v4 = vld [vmem:[#allocation56_spill] sm:$0xff] }
 0x62c   :  { %v4395_v52 = vmul.f32 -1.442695, %v3062_v59  ;;  %3268 = vmatpush1.msra.mxu0 %v8390_v44  ;;  %5452 = vmatpush3.msra.mxu1 %v8393_v15  ;;  %v3069_v18 = vadd.f32 %v2989_v62, %v2849_v31  ;;  %v10278_v44 = vld [vmem:[#allocation34_spill] sm:$0xff]  ;;  %v10279_v15 = vld [vmem:[#allocation35_spill] sm:$0xff]  ;;  %v10301_v28 = vld [vmem:[#allocation57_spill] sm:$0xff] }
 0x62d   :  { %3269 = vmatprep.subr.mxu0 %v8396_v1  ;;  %5453 = vmatprep.subr.mxu1 %v9845_v16  ;;  %v10280_v1 = vld [vmem:[#allocation36_spill] sm:$0xff]  ;;  %v10300_v59 = vld [vmem:[#allocation55_spill] sm:$0xff]  ;;  %v10303_v62 = vld [vmem:[#allocation58_spill] sm:$0xff] }
 0x62e   :  { %5791 = vpow2.f32 %v4395_v52  ;;  %3270 = vmatpush1.msra.mxu0 %v8401_v2  ;;  %5454 = vmatpush3.msra.mxu1 %v8404_v29  ;;  %v4396_v11 = vmul.f32 -1.442695, %v3069_v18  ;;  %v10281_v2 = vld [vmem:[#allocation37_spill] sm:$0xff]  ;;  %v10282_v29 = vld [vmem:[#allocation38_spill] sm:$0xff]  ;;  %v10302_v52 = vld [vmem:[#allocation59_spill] sm:$0xff] }
 0x62f   :  { %3271 = vmatprep.subr.mxu0 %v10270_v10  ;;  %5455 = vmatprep.subr.mxu1 %v9845_v16  ;;  %v10304_v10 = vld [vmem:[#allocation60_spill] sm:$0xff]  ;;  %v10305_v18 = vld [vmem:[#allocation62_spill] sm:$0xff] }
 0x630   :  { %3272 = vmatpush1.msra.mxu0 %v10271_v55  ;;  %5456 = vmatpush3.msra.mxu1 %v10272_v56  ;;  %5793 = vpow2.f32 %v4396_v11  ;;  %v10306_v55 = vld [vmem:[#allocation61_spill] sm:$0xff]  ;;  %v8892_v56 = vld [vmem:[%s9528_s8] ss:$0 sm:$0xff]  ;;  %v10309_v11 = vld [vmem:[#allocation64_spill] sm:$0xff] }
 0x631   :  { %3273 = vmatprep.subr.mxu0 %v10273_v58  ;;  %5457 = vmatprep.subr.mxu1 %v9845_v16  ;;  %v3076_v58 = vadd.f32 %v8892_v56, %v8819_v40 }
 0x632   :  { %3274 = vmatpush1.msra.mxu0 %v10274_v32  ;;  %5458 = vmatpush3.msra.mxu1 %v10275_v51  ;;  %v10307_v32 = vld [vmem:[#allocation63_spill] sm:$0xff]  ;;  %v10308_v51 = vld [vmem:[#allocation65_spill] sm:$0xff] }
 0x633   :  { %3275 = vmatprep.subr.mxu0 %v10276_v54  ;;  %5459 = vmatprep.subr.mxu1 %v9845_v16 }
 0x634   :  { %3276 = vmatpush1.msra.mxu0 %v10277_v3  ;;  %5460 = vmatpush3.msra.mxu1 %v10278_v44  ;;  %v2918_v3 = vadd.f32 %v8792_v41, %v7367_v5  ;;  %v10315_v41 = vld [vmem:[#allocation70_spill] sm:$0xff] }
 0x635   :  { %3277 = vmatprep.subr.mxu0 %v10279_v15  ;;  %5461 = vmatprep.subr.mxu1 %v9845_v16  ;;  %v10310_v15 = vld [vmem:[#allocation66_spill] sm:$0xff] }
 0x636   :  { %3278 = vmatpush1.msra.mxu0 %v10280_v1  ;;  %5462 = vmatpush3.msra.mxu1 %v10281_v2  ;;  %v10311_v1 = vld [vmem:[#allocation68_spill] sm:$0xff]  ;;  %v10312_v2 = vld [vmem:[#allocation67_spill] sm:$0xff] }
 0x637   :  { %3279 = vmatprep.subr.mxu0 %v10282_v29  ;;  %5463 = vmatprep.subr.mxu1 %v9845_v16  ;;  %v10313_v29 = vld [vmem:[#allocation69_spill] sm:$0xff] }
 0x638   :  { %3280 = vmatpush1.msra.mxu0 %v10283_v49  ;;  %5464 = vmatpush3.msra.mxu1 %v10284_v27  ;;  %v10314_v49 = vld [vmem:[#allocation71_spill] sm:$0xff]  ;;  %v10316_v27 = vld [vmem:[#allocation72_spill] sm:$0xff] }
 0x639   :  { %3281 = vmatprep.subr.mxu0 %v10285_v24  ;;  %5465 = vmatprep.subr.mxu1 %v9845_v16  ;;  %v10318_v24 = vld [vmem:[#allocation73_spill] sm:$0xff] }
 0x63a   :  { %3282 = vmatpush1.msra.mxu0 %v10286_v34  ;;  %5466 = vmatpush3.msra.mxu1 %v10287_v38  ;;  %v10319_v34 = vld [vmem:[#allocation75_spill] sm:$0xff]  ;;  %v10320_v38 = vld [vmem:[#allocation77_spill] sm:$0xff] }
 0x63b   :  { %v5792_v39 = vpop.eup %5791  ;;  %3283 = vmatprep.subr.mxu0 %v10288_v60  ;;  %5467 = vmatprep.subr.mxu1 %v9845_v16  ;;  %v10322_v60 = vld [vmem:[#allocation78_spill] sm:$0xff] }
 0x63c   :  { %v3066_v61 = vadd.f32 1.0, %v5792_v39  ;;  %3284 = vmatpush1.msra.mxu0 %v10289_v22  ;;  %5468 = vmatpush3.msra.mxu1 %v10290_v42  ;;  %v10321_v39 = vld [vmem:[#allocation76_spill] sm:$0xff]  ;;  %v10324_v22 = vld [vmem:[#allocation79_spill] sm:$0xff]  ;;  %v10325_v42 = vld [vmem:[#allocation81_spill] sm:$0xff] }
 0x63d   :  { %3285 = vmatprep.subr.mxu0 %v10291_v7  ;;  %5469 = vmatprep.subr.mxu1 %v9845_v16  ;;  %v5794_v26 = vpop.eup %5793  ;;  %v10326_v7 = vld [vmem:[#allocation83_spill] sm:$0xff] }
 0x63e   :  { %5795 = vrcp.f32 %v3066_v61  ;;  %3286 = vmatpush1.msra.mxu0 %v10292_v19  ;;  %3319 = vmatprep.mubr.f32.mxu0 %v9845_v16  ;;  %v3073_v31 = vadd.f32 1.0, %v5794_v26  ;;  %v10323_v61 = vld [vmem:[#allocation80_spill] sm:$0xff]  ;;  %v10327_v19 = vld [vmem:[#allocation82_spill] sm:$0xff] }
 0x63f   :  { %5470 = vmatpush3.msra.mxu1 %v10293_v17  ;;  %5471 = vmatprep.mubr.msk.f32.mxu1 %vm6359_vm1, %v9845_v16  ;;  %v10328_v17 = vld [vmem:[#allocation84_spill] sm:$0xff]  ;;  %v10334_v26 = vld [vmem:[#allocation90_spill] sm:$0xff] }
 0x640   :  { %3320 = vmatmul.mubr.f32.vlgmr.msra.gmra.mxu0 %v8796_v37  ;;  %5472 = vmatmul.mubr.f32.vlgmr.msra.gmra.mxu1 %v8796_v37  ;;  %5797 = vrcp.f32 %v3073_v31 }
 0x641   :  { %3396 = vmatprep.subr.mxu0 %v10294_v9  ;;  %5474 = vmatprep.subr.mxu1 %v9845_v16 }
 0x642   :  { %3397 = vmatpush1.msra.mxu0 %v10295_v21  ;;  %5475 = vmatpush3.msra.mxu1 %v10296_v33  ;;  %v10329_v21 = vld [vmem:[#allocation86_spill] sm:$0xff]  ;;  %v10330_v33 = vld [vmem:[#allocation85_spill] sm:$0xff] }
 0x643   :  { %3398 = vmatprep.subr.mxu0 %v10297_v53  ;;  %5476 = vmatprep.subr.mxu1 %v9845_v16  ;;  %v10331_v53 = vld [vmem:[#allocation87_spill] sm:$0xff] }
 0x644   :  { %3399 = vmatpush1.msra.mxu0 %v10298_v35  ;;  %5477 = vmatpush3.msra.mxu1 %v10299_v4  ;;  %v10332_v35 = vld [vmem:[#allocation88_spill] sm:$0xff]  ;;  %v10333_v4 = vld [vmem:[#allocation89_spill] sm:$0xff] }
 0x645   :  { %3400 = vmatprep.subr.mxu0 %v10300_v59  ;;  %5478 = vmatprep.subr.mxu1 %v9845_v16 }
 0x646   :  { %3401 = vmatpush1.msra.mxu0 %v10301_v28  ;;  %5479 = vmatpush3.msra.mxu1 %v10302_v52  ;;  %v10335_v52 = vld [vmem:[#allocation91_spill] sm:$0xff] }
 0x647   :  { %3402 = vmatprep.subr.mxu0 %v10303_v62  ;;  %5480 = vmatprep.subr.mxu1 %v9845_v16  ;;  %v10336_v62 = vld [vmem:[#allocation92_spill] sm:$0xff] }
 0x648   :  { %3403 = vmatpush1.msra.mxu0 %v10304_v10  ;;  %5481 = vmatpush3.msra.mxu1 %v10305_v18 }
 0x649   :  { %3404 = vmatprep.subr.mxu0 %v10306_v55  ;;  %5482 = vmatprep.subr.mxu1 %v9845_v16  ;;  %v10341_v55 = vld [vmem:[#allocation97_spill] sm:$0xff] }
 0x64a   :  { %3405 = vmatpush1.msra.mxu0 %v10307_v32  ;;  %5483 = vmatpush3.msra.mxu1 %v10308_v51  ;;  %v10343_v32 = vld [vmem:[#allocation99_spill] sm:$0xff]  ;;  %v10344_v51 = vld [vmem:[#allocation100_spill] sm:$0xff] }
 0x64b   :  { %v5796_v54 = vpop.eup %5795  ;;  %3406 = vmatprep.subr.mxu0 %v10309_v11  ;;  %5484 = vmatprep.subr.mxu1 %v9845_v16  ;;  %v10346_v11 = vld [vmem:[#allocation102_spill] sm:$0xff] }
 0x64c   :  { %v3077_v44 = vmul.f32 %v5796_v54, %v3076_v58  ;;  %3407 = vmatpush1.msra.mxu0 %v8550_v47  ;;  %5485 = vmatpush3.msra.mxu1 %v10310_v15  ;;  %v10317_v47 = vld [vmem:[#allocation74_spill] sm:$0xff]  ;;  %v10345_v54 = vld [vmem:[#allocation101_spill] sm:$0xff] }
 0x64d   :  { %3408 = vmatprep.subr.mxu0 %v10311_v1  ;;  %5486 = vmatprep.subr.mxu1 %v9845_v16  ;;  %v5798_v9 = vpop.eup %5797  ;;  %v10342_v58 = vld [vmem:[#allocation98_spill] sm:$0xff]  ;;  %v10349_v15 = vld [vmem:[#allocation105_spill] sm:$0xff] }
 0x64e   :  { %v3078_v40 = vadd.f32 %v3077_v44, %v2918_v3  ;;  %3409 = vmatpush1.msra.mxu0 %v10312_v2  ;;  %5487 = vmatpush3.msra.mxu1 %v10313_v29  ;;  %v3080_v59 = vsub.f32 1.0, %v5798_v9  ;;  %v3082_v10 = vmul.f32 %v5798_v9, %v8655_v0  ;;  %v6171_v0 = vld [vmem:[#allocation3 + $0x148] sm:$0xff]  ;;  %v10348_v44 = vld [vmem:[#allocation104_spill] sm:$0xff]  ;;  %v10350_v1 = vld [vmem:[#allocation106_spill] sm:$0xff] }
 0x64f   :  { %3410 = vmatprep.subr.mxu0 %v10314_v49  ;;  %5488 = vmatprep.subr.mxu1 %v9845_v16  ;;  %v10347_v3 = vld [vmem:[#allocation103_spill] sm:$0xff]  ;;  %v6181_v2 = vld [vmem:[#allocation3 + $0x58] sm:$0xff]  ;;  %v6183_v49 = vld [vmem:[#allocation3 + $0x30] sm:$0xff] }
 0x650   :  { %5799 = vtanh.f32 %v3078_v40  ;;  %3411 = vmatpush1.msra.mxu0 %v10315_v41  ;;  %5489 = vmatpush3.msra.mxu1 %v10316_v27  ;;  %v10351_v40 = vld [vmem:[#allocation107_spill] sm:$0xff]  ;;  %v6182_v29 = vld [vmem:[#allocation3 + $0x38] sm:$0xff]  ;;  %v6184_v41 = vld [vmem:[#allocation3 + $0x40] sm:$0xff] }
 0x651   :  { %3412 = vmatprep.subr.mxu0 %v10317_v47  ;;  %5490 = vmatprep.subr.mxu1 %v9845_v16  ;;  %v6185_v27 = vld [vmem:[#allocation3 + $0x20] sm:$0xff]  ;;  %v6186_v47 = vld [vmem:[#allocation3 + $0x18] sm:$0xff] }
 0x652   :  { %3413 = vmatpush1.msra.mxu0 %v10318_v24  ;;  %5491 = vmatpush3.msra.mxu1 %v10319_v34  ;;  %v6187_v24 = vld [vmem:[#allocation3 + $0x28] sm:$0xff] }
 0x653   :  { %3414 = vmatprep.subr.mxu0 %v10320_v38  ;;  %5492 = vmatprep.subr.mxu1 %v9845_v16  ;;  %v6188_v34 = vld [vmem:[#allocation3 + $0x8] sm:$0xff]  ;;  %v6189_v38 = vld [vmem:[#allocation3] sm:$0xff] }
 0x654   :  { %3415 = vmatpush1.msra.mxu0 %v10321_v39  ;;  %5493 = vmatpush3.msra.mxu1 %v10322_v60  ;;  %v6190_v39 = vld [vmem:[#allocation3 + $0x10] sm:$0xff] }
 0x655   :  { %3416 = vmatprep.subr.mxu0 %v10323_v61  ;;  %5494 = vmatprep.subr.mxu1 %v9845_v16  ;;  %v9001_v60 = vld [vmem:[#allocation5 + $0x170] sm:$0xff] }
 0x656   :  { %3417 = vmatpush1.msra.mxu0 %v10324_v22  ;;  %5495 = vmatpush3.msra.mxu1 %v10325_v42  ;;  %v10352_v42 = vld [vmem:[#allocation18_spill] sm:$0xff] }
 0x657   :  { %3418 = vmatprep.subr.mxu0 %v10326_v7  ;;  %5496 = vmatprep.subr.mxu1 %v9845_v16 }
 0x658   :  { %3419 = vmatpush1.msra.mxu0 %v10327_v19  ;;  %5497 = vmatpush3.msra.mxu1 %v10328_v17 }
 0x659   :  { %3420 = vmatprep.subr.mxu0 %v10329_v21  ;;  %5498 = vmatprep.subr.mxu1 %v9845_v16  ;;  %v10353_v21 = vld [vmem:[#allocation19_spill] sm:$0xff] }
 0x65a   :  { %3421 = vmatpush1.msra.mxu0 %v10330_v33  ;;  %5499 = vmatpush3.msra.mxu1 %v10331_v53 }
 0x65b   :  { %3422 = vmatprep.subr.mxu0 %v10332_v35  ;;  %5500 = vmatprep.subr.mxu1 %v9845_v16 }
 0x65c   :  { %3423 = vmatpush1.msra.mxu0 %v10333_v4  ;;  %5501 = vmatpush3.msra.mxu1 %v10334_v26 }
 0x65d   :  { %v5800_v28 = vpop.eup %5799  ;;  %3424 = vmatprep.subr.mxu0 %v10335_v52  ;;  %5502 = vmatprep.subr.mxu1 %v9845_v16 }
 0x65e   :  { %3425 = vmatpush1.msra.mxu0 %v10336_v62  ;;  %5503 = vmatpush3.msra.mxu1 %v8643_v48  ;;  %v3081_v31 = vmul.f32 %v5800_v28, %v3080_v59  ;;  %v10338_v48 = vld [vmem:[#allocation94_spill] sm:$0xff] }
 0x65f   :  { %3426 = vmatprep.subr.mxu0 %v8647_v43  ;;  %5504 = vmatprep.subr.mxu1 %v9845_v16  ;;  %v6170_v43 = vld [vmem:[#allocation3 + $0x160] sm:$0xff] }
 0x660   :  { %3427 = vmatpush1.msra.mxu0 %v8651_v12  ;;  %3460 = vmatprep.mubr.f32.mxu0 %v9845_v16  ;;  %v8945_v18 = vadd.f32 %v3082_v10, %v3081_v31  ;;  %v6169_v12 = vld [vmem:[#allocation3 + $0x178] sm:$0xff]  ;;  %v9010_v28 = vld [vmem:[%s9524_s4] ss:$0 sm:$0xff] }
 0x661   :  { %5505 = vmatpush3.msra.mxu1 %v8657_v50  ;;  %5506 = vmatprep.mubr.msk.f32.mxu1 %vm6359_vm1, %v9845_v16  ;;  %v10337_v50 = vld [vmem:[#allocation93_spill] sm:$0xff] }
 0x662   :  { %4397 = vst [vmem:[%s9529_s9 + $0x20] sm:$0xff] %v8945_v18  ;;  %3461 = vmatmul.mubr.f32.vlgmr.msra.gmra.mxu0 %v8945_v18  ;;  %5507 = vmatmul.mubr.f32.vlgmr.msra.gmra.mxu1 %v8945_v18 }
 0x663   :  { %3567 = vmatprep.subr.mxu0 %v8668_v45  ;;  %5509 = vmatprep.subr.mxu1 %v9845_v16  ;;  %v10339_v45 = vld [vmem:[#allocation95_spill] sm:$0xff] }
 0x664   :  { %3568 = vmatpush1.msra.mxu0 %v8672_v20  ;;  %5510 = vmatpush3.msra.mxu1 %v6169_v12  ;;  %v6172_v20 = vld [vmem:[#allocation3 + $0x130] sm:$0xff] }
 0x665   :  { %3569 = vmatprep.subr.mxu0 %v8676_v63  ;;  %5511 = vmatprep.subr.mxu1 %v9845_v16  ;;  %v10340_v63 = vld [vmem:[#allocation96_spill] sm:$0xff] }
 0x666   :  { %3570 = vmatpush1.msra.mxu0 %v10337_v50  ;;  %5512 = vmatpush3.msra.mxu1 %v6170_v43  ;;  %v10354_v50 = vld [vmem:[#allocation27_spill] sm:$0xff] }
 0x667   :  { %3571 = vmatprep.subr.mxu0 %v8684_v23  ;;  %5513 = vmatprep.subr.mxu1 %v9845_v16  ;;  %v6173_v23 = vld [vmem:[#allocation3 + $0x118] sm:$0xff] }
 0x668   :  { %3572 = vmatpush1.msra.mxu0 %v10338_v48  ;;  %5514 = vmatpush3.msra.mxu1 %v6171_v0 }
 0x669   :  { %3573 = vmatprep.subr.mxu0 %v8692_v36  ;;  %5515 = vmatprep.subr.mxu1 %v9845_v16  ;;  %v6174_v36 = vld [vmem:[#allocation3 + $0x100] sm:$0xff] }
 0x66a   :  { %3574 = vmatpush1.msra.mxu0 %v10339_v45  ;;  %5516 = vmatpush3.msra.mxu1 %v6172_v20 }
 0x66b   :  { %3575 = vmatprep.subr.mxu0 %v8700_v57  ;;  %5517 = vmatprep.subr.mxu1 %v9845_v16  ;;  %v6175_v57 = vld [vmem:[#allocation3 + $0xe8] sm:$0xff] }
 0x66c   :  { %3576 = vmatpush1.msra.mxu0 %v10340_v63  ;;  %5518 = vmatpush3.msra.mxu1 %v6173_v23 }
 0x66d   :  { %3577 = vmatprep.subr.mxu0 %v8708_v25  ;;  %5519 = vmatprep.subr.mxu1 %v9845_v16  ;;  %v6176_v25 = vld [vmem:[#allocation3 + $0xd0] sm:$0xff] }
 0x66e   :  { %3578 = vmatpush1.msra.mxu0 %v10341_v55  ;;  %5520 = vmatpush3.msra.mxu1 %v6174_v36  ;;  %v9021_v55 = vld [vmem:[#allocation5 + $0x168] sm:$0xff]  ;;  %v9024_v36 = vld [vmem:[#allocation5 + $0x178] sm:$0xff] }
 0x66f   :  { %3579 = vmatprep.subr.mxu0 %v8716_v46  ;;  %5521 = vmatprep.subr.mxu1 %v9845_v16  ;;  %v6177_v46 = vld [vmem:[#allocation3 + $0xb8] sm:$0xff] }
 0x670   :  { %3580 = vmatpush1.msra.mxu0 %v10342_v58  ;;  %5522 = vmatpush3.msra.mxu1 %v6175_v57  ;;  %v9027_v58 = vld [vmem:[#allocation5 + $0x158] sm:$0xff]  ;;  %v9034_v57 = vld [vmem:[#allocation5 + $0x160] sm:$0xff] }
 0x671   :  { %3581 = vmatprep.subr.mxu0 %v8724_v8  ;;  %5523 = vmatprep.subr.mxu1 %v9845_v16  ;;  %v6178_v8 = vld [vmem:[#allocation3 + $0xa0] sm:$0xff] }
 0x672   :  { %3582 = vmatpush1.msra.mxu0 %v10343_v32  ;;  %5524 = vmatpush3.msra.mxu1 %v6176_v25  ;;  %v9037_v25 = vld [vmem:[#allocation5 + $0x140] sm:$0xff] }
 0x673   :  { %3583 = vmatprep.subr.mxu0 %v8732_v13  ;;  %5525 = vmatprep.subr.mxu1 %v9845_v16  ;;  %v6179_v13 = vld [vmem:[#allocation3 + $0x88] sm:$0xff] }
 0x674   :  { %3584 = vmatpush1.msra.mxu0 %v10344_v51  ;;  %5526 = vmatpush3.msra.mxu1 %v6177_v46  ;;  %v9041_v51 = vld [vmem:[#allocation5 + $0x138] sm:$0xff]  ;;  %v9044_v46 = vld [vmem:[#allocation5 + $0x148] sm:$0xff] }
 0x675   :  { %3585 = vmatprep.subr.mxu0 %v8740_v6  ;;  %5527 = vmatprep.subr.mxu1 %v9845_v16  ;;  %v6180_v6 = vld [vmem:[#allocation3 + $0x70] sm:$0xff] }
 0x676   :  { %3586 = vmatpush1.msra.mxu0 %v10345_v54  ;;  %5528 = vmatpush3.msra.mxu1 %v6178_v8  ;;  %v9047_v54 = vld [vmem:[#allocation5 + $0x128] sm:$0xff]  ;;  %v9051_v8 = vld [vmem:[#allocation5 + $0x120] sm:$0xff] }
 0x677   :  { %3587 = vmatprep.subr.mxu0 %v10346_v11  ;;  %5529 = vmatprep.subr.mxu1 %v9845_v16  ;;  %v9054_v11 = vld [vmem:[#allocation5 + $0x130] sm:$0xff] }
 0x678   :  { %3588 = vmatpush1.msra.mxu0 %v10347_v3  ;;  %5530 = vmatpush3.msra.mxu1 %v6179_v13  ;;  %v9057_v13 = vld [vmem:[#allocation5 + $0x110] sm:$0xff] }
 0x679   :  { %3589 = vmatprep.subr.mxu0 %v10348_v44  ;;  %5531 = vmatprep.subr.mxu1 %v9845_v16 }
 0x67a   :  { %3590 = vmatpush1.msra.mxu0 %v10349_v15  ;;  %5532 = vmatpush3.msra.mxu1 %v6180_v6  ;;  %v9062_v15 = vld [vmem:[#allocation5 + $0x108] sm:$0xff]  ;;  %v9065_v6 = vld [vmem:[#allocation5 + $0x118] sm:$0xff] }
 0x67b   :  { %3591 = vmatprep.subr.mxu0 %v10350_v1  ;;  %5533 = vmatprep.subr.mxu1 %v9845_v16 }
 0x67c   :  { %3592 = vmatpush1.msra.mxu0 %v10351_v40  ;;  %5534 = vmatpush3.msra.mxu1 %v6181_v2  ;;  %v9070_v2 = vld [vmem:[#allocation5 + $0xf8] sm:$0xff] }
 0x67d   :  { %3593 = vmatprep.subr.mxu0 %v6182_v29  ;;  %5535 = vmatprep.subr.mxu1 %v9845_v16 }
 0x67e   :  { %3594 = vmatpush1.msra.mxu0 %v6183_v49  ;;  %5536 = vmatpush3.msra.mxu1 %v6184_v41  ;;  %v9074_v49 = vld [vmem:[#allocation5 + $0xf0] sm:$0xff]  ;;  %v9077_v41 = vld [vmem:[#allocation5 + $0x100] sm:$0xff] }
 0x67f   :  { %3595 = vmatprep.subr.mxu0 %v6185_v27  ;;  %5537 = vmatprep.subr.mxu1 %v9845_v16 }
 0x680   :  { %3596 = vmatpush1.msra.mxu0 %v6186_v47  ;;  %5538 = vmatpush3.msra.mxu1 %v6187_v24  ;;  %v9080_v47 = vld [vmem:[#allocation5 + $0xe0] sm:$0xff] }
 0x681   :  { %3597 = vmatprep.subr.mxu0 %v6188_v34  ;;  %5539 = vmatprep.subr.mxu1 %v9845_v16  ;;  %v9084_v34 = vld [vmem:[#allocation5 + $0xd8] sm:$0xff] }
 0x682   :  { %3598 = vmatpush1.msra.mxu0 %v6189_v38  ;;  %5540 = vmatpush3.msra.mxu1 %v6190_v39  ;;  %v9087_v38 = vld [vmem:[#allocation5 + $0xe8] sm:$0xff] }
 0x683   :  { %3631 = vmatprep.mubr.f32.mxu0 %v9845_v16  ;;  %5541 = vmatprep.mubr.msk.f32.mxu1 %vm6359_vm1, %v9845_v16 }
 0x684   :  { %3730 = vmatprep.subr.mxu0 %v9001_v60  ;;  %5544 = vmatprep.subr.mxu1 %v9845_v16 }
 0x6df   :  { %v3158_v61 = vpop.f32.mrf.mxu0  ;;  %v3229_v22 = vpop.f32.mrf.mxu1 }
 0x6e0   :  { %v3233_v7 = vadd.f32 %v3158_v61, %v10352_v42  ;;  %v3247_v52 = vadd.f32 %v9010_v28, %v3229_v22  ;;  %v9090_v61 = vld [vmem:[#allocation5 + $0xc8] sm:$0xff]  ;;  %v9095_v42 = vld [vmem:[#allocation5 + $0xc0] sm:$0xff] }
 0x6e1   :  { %v5438_v19 = vpop.f32.mrf.mxu1  ;;  %v3160_v9 = vpop.f32.mrf.mxu0 }
 0x6e2   :  { %v4398_v17 = vmul.f32 -1.442695, %v3233_v7  ;;  %v3240_v33 = vadd.f32 %v3160_v9, %v10353_v21  ;;  %v9098_v7 = vld [vmem:[#allocation5 + $0xd0] sm:$0xff]  ;;  %v9105_v9 = vld [vmem:[#allocation5 + $0xa8] sm:$0xff]  ;;  %v9108_v21 = vld [vmem:[#allocation5 + $0xb8] sm:$0xff] }
 0x6e3   :  { %v9101_v19 = vld [vmem:[#allocation5 + $0xb0] sm:$0xff] }
 0x6e4   :  { %5801 = vpow2.f32 %v4398_v17  ;;  %v4399_v53 = vmul.f32 -1.442695, %v3240_v33  ;;  %v9111_v33 = vld [vmem:[#allocation5 + $0x98] sm:$0xff] }
 0x6e6   :  { %5803 = vpow2.f32 %v4399_v53  ;;  %v9115_v53 = vld [vmem:[#allocation5 + $0x90] sm:$0xff] }
 0x6f1   :  { %v5802_v35 = vpop.eup %5801 }
 0x6f2   :  { %v3237_v4 = vadd.f32 1.0, %v5802_v35  ;;  %v9118_v35 = vld [vmem:[#allocation5 + $0xa0] sm:$0xff] }
 0x6f3   :  { %v5804_v26 = vpop.eup %5803 }
 0x6f4   :  { %5805 = vrcp.f32 %v3237_v4  ;;  %v3244_v59 = vadd.f32 1.0, %v5804_v26  ;;  %v9121_v4 = vld [vmem:[#allocation5 + $0x80] sm:$0xff] }
 0x6f6   :  { %5807 = vrcp.f32 %v3244_v59  ;;  %v9125_v59 = vld [vmem:[#allocation5 + $0x78] sm:$0xff] }
 0x700   :  { %v9013_v62 = vpop.f32.mrf.mxu1  ;;  %v3321_v32 = vpop.f32.mrf.mxu0 }
 0x701   :  { %v5806_v31 = vpop.eup %5805  ;;  %v3322_v44 = vadd.f32 %v3321_v32, %v7275_v30  ;;  %v9161_v32 = vld [vmem:[#allocation5 + $0x20] sm:$0xff] }
 0x702   :  { %v3248_v10 = vmul.f32 %v5806_v31, %v3247_v52  ;;  %v5473_v12 = vpop.f32.mrf.mxu1  ;;  %v3323_v3 = vpop.f32.mrf.mxu0  ;;  %v9128_v52 = vld [vmem:[#allocation5 + $0x88] sm:$0xff]  ;;  %v9206_v30 = vld [vmem:[#allocation7 + $0x140] sm:$0xff] }
 0x703   :  { %v5808_v48 = vpop.eup %5807  ;;  %v3324_v22 = vadd.f32 %v3323_v3, %v7293_v14  ;;  %v9131_v31 = vld [vmem:[#allocation5 + $0x68] sm:$0xff]  ;;  %v9138_v12 = vld [vmem:[#allocation5 + $0x70] sm:$0xff]  ;;  %10361 = vst [vmem:[#allocation16_spill] sm:$0xff] %v9206_v30 }
 0x704   :  { %v3249_v43 = vadd.f32 %v3248_v10, %v10354_v50  ;;  %v3251_v0 = vsub.f32 1.0, %v5808_v48  ;;  %v3253_v63 = vmul.f32 %v5808_v48, %v8796_v37  ;;  %v9031_v37 = vld [vmem:[#allocation5 + $0x150] sm:$0xff]  ;;  %v9135_v10 = vld [vmem:[#allocation5 + $0x60] sm:$0xff]  ;;  %v9148_v48 = vld [vmem:[#allocation5 + $0x58] sm:$0xff] }
 0x705   :  { %v9141_v50 = vld [vmem:[#allocation5 + $0x50] sm:$0xff] }
 0x706   :  { %5809 = vtanh.f32 %v3249_v43  ;;  %v9145_v43 = vld [vmem:[#allocation5 + $0x48] sm:$0xff] }
 0x713   :  { %v5810_v45 = vpop.eup %5809 }
 0x714   :  { %v3252_v20 = vmul.f32 %v5810_v45, %v3251_v0  ;;  %v9151_v0 = vld [vmem:[#allocation5 + $0x38] sm:$0xff]  ;;  %v9155_v45 = vld [vmem:[#allocation5 + $0x30] sm:$0xff] }
 0x716   :  { %v9017_v23 = vadd.f32 %v3253_v63, %v3252_v20  ;;  %v9158_v20 = vld [vmem:[#allocation5 + $0x40] sm:$0xff] }
 0x718   :  { %10355 = vst [vmem:[#allocation10_spill] sm:$0xff] %v9017_v23  ;;  %3632 = vmatmul.mubr.f32.vlgmr.msra.gmra.mxu0 %v9017_v23  ;;  %5542 = vmatmul.mubr.f32.vlgmr.msra.gmra.mxu1 %v9017_v23 }
 0x719   :  { %3731 = vmatpush1.msra.mxu0 %v9021_v55  ;;  %5545 = vmatpush3.msra.mxu1 %v9024_v36 }
 0x71a   :  { %3732 = vmatprep.subr.mxu0 %v9027_v58  ;;  %5546 = vmatprep.subr.mxu1 %v9845_v16 }
 0x71b   :  { %3733 = vmatpush1.msra.mxu0 %v9031_v37  ;;  %5547 = vmatpush3.msra.mxu1 %v9034_v57 }
 0x71c   :  { %3734 = vmatprep.subr.mxu0 %v9037_v25  ;;  %5548 = vmatprep.subr.mxu1 %v9845_v16 }
 0x71d   :  { %3735 = vmatpush1.msra.mxu0 %v9041_v51  ;;  %5549 = vmatpush3.msra.mxu1 %v9044_v46 }
 0x71e   :  { %3736 = vmatprep.subr.mxu0 %v9047_v54  ;;  %5550 = vmatprep.subr.mxu1 %v9845_v16 }
 0x71f   :  { %3737 = vmatpush1.msra.mxu0 %v9051_v8  ;;  %5551 = vmatpush3.msra.mxu1 %v9054_v11 }
 0x720   :  { %3738 = vmatprep.subr.mxu0 %v9057_v13  ;;  %5552 = vmatprep.subr.mxu1 %v9845_v16 }
 0x721   :  { %3739 = vmatpush1.msra.mxu0 %v9062_v15  ;;  %5553 = vmatpush3.msra.mxu1 %v9065_v6 }
 0x722   :  { %v3462_v1 = vpop.f32.mrf.mxu0  ;;  %v9068_v40 = vpop.f32.mrf.mxu1  ;;  %3740 = vmatprep.subr.mxu0 %v9070_v2  ;;  %5554 = vmatprep.subr.mxu1 %v9845_v16 }
 0x723   :  { %v3537_v29 = vadd.f32 %v3462_v1, %v3322_v44  ;;  %3741 = vmatpush1.msra.mxu0 %v9074_v49  ;;  %5555 = vmatpush3.msra.mxu1 %v9077_v41  ;;  %v9165_v44 = vld [vmem:[#allocation5 + $0x18] sm:$0xff]  ;;  %v9168_v1 = vld [vmem:[#allocation5 + $0x28] sm:$0xff] }
 0x724   :  { %v5508_v27 = vpop.f32.mrf.mxu1  ;;  %3742 = vmatprep.subr.mxu0 %v9080_v47  ;;  %5556 = vmatprep.subr.mxu1 %v9845_v16  ;;  %v3464_v39 = vpop.f32.mrf.mxu0 }
 0x725   :  { %v4400_v24 = vmul.f32 -1.442695, %v3537_v29  ;;  %3743 = vmatpush1.msra.mxu0 %v9084_v34  ;;  %5557 = vmatpush3.msra.mxu1 %v9087_v38  ;;  %v3544_v17 = vadd.f32 %v3464_v39, %v3324_v22  ;;  %v9171_v29 = vld [vmem:[#allocation5 + $0x8] sm:$0xff]  ;;  %v9175_v27 = vld [vmem:[#allocation5] sm:$0xff]  ;;  %v9186_v39 = vld [vmem:[#allocation7 + $0x170] sm:$0xff] }
 0x726   :  { %3744 = vmatprep.subr.mxu0 %v9090_v61  ;;  %5558 = vmatprep.subr.mxu1 %v9845_v16  ;;  %v9190_v22 = vld [vmem:[#allocation7 + $0x168] sm:$0xff] }
 0x727   :  { %5811 = vpow2.f32 %v4400_v24  ;;  %3745 = vmatpush1.msra.mxu0 %v9095_v42  ;;  %5559 = vmatpush3.msra.mxu1 %v9098_v7  ;;  %v4401_v26 = vmul.f32 -1.442695, %v3544_v17  ;;  %v9179_v24 = vld [vmem:[#allocation5 + $0x10] sm:$0xff]  ;;  %10356 = vst [vmem:[#allocation11_spill] sm:$0xff] %v9190_v22  ;;  %v9193_v17 = vld [vmem:[#allocation7 + $0x178] sm:$0xff] }
 0x728   :  { %3746 = vmatprep.subr.mxu0 %v9101_v19  ;;  %5560 = vmatprep.subr.mxu1 %v9845_v16  ;;  %10357 = vst [vmem:[#allocation23_spill] sm:$0xff] %v9193_v17 }
 0x729   :  { %3747 = vmatpush1.msra.mxu0 %v9105_v9  ;;  %5561 = vmatpush3.msra.mxu1 %v9108_v21  ;;  %5813 = vpow2.f32 %v4401_v26  ;;  %v9196_v26 = vld [vmem:[#allocation7 + $0x158] sm:$0xff] }
 0x72a   :  { %3748 = vmatprep.subr.mxu0 %v9111_v33  ;;  %5562 = vmatprep.subr.mxu1 %v9845_v16  ;;  %10358 = vst [vmem:[#allocation14_spill] sm:$0xff] %v9196_v26 }
 0x72b   :  { %3749 = vmatpush1.msra.mxu0 %v9115_v53  ;;  %5563 = vmatpush3.msra.mxu1 %v9118_v35 }
 0x72c   :  { %3750 = vmatprep.subr.mxu0 %v9121_v4  ;;  %5564 = vmatprep.subr.mxu1 %v9845_v16 }
 0x72d   :  { %3751 = vmatpush1.msra.mxu0 %v9125_v59  ;;  %5565 = vmatpush3.msra.mxu1 %v9128_v52 }
 0x72e   :  { %3752 = vmatprep.subr.mxu0 %v9131_v31  ;;  %5566 = vmatprep.subr.mxu1 %v9845_v16 }
 0x72f   :  { %3753 = vmatpush1.msra.mxu0 %v9135_v10  ;;  %5567 = vmatpush3.msra.mxu1 %v9138_v12 }
 0x730   :  { %3754 = vmatprep.subr.mxu0 %v9141_v50  ;;  %5568 = vmatprep.subr.mxu1 %v9845_v16 }
 0x731   :  { %3755 = vmatpush1.msra.mxu0 %v9145_v43  ;;  %5569 = vmatpush3.msra.mxu1 %v9148_v48 }
 0x732   :  { %3756 = vmatprep.subr.mxu0 %v9151_v0  ;;  %5570 = vmatprep.subr.mxu1 %v9845_v16 }
 0x733   :  { %3757 = vmatpush1.msra.mxu0 %v9155_v45  ;;  %5571 = vmatpush3.msra.mxu1 %v9158_v20 }
 0x734   :  { %v5812_v63 = vpop.eup %5811  ;;  %3758 = vmatprep.subr.mxu0 %v9161_v32  ;;  %5572 = vmatprep.subr.mxu1 %v9845_v16 }
 0x735   :  { %v3541_v3 = vadd.f32 1.0, %v5812_v63  ;;  %3759 = vmatpush1.msra.mxu0 %v9165_v44  ;;  %5573 = vmatpush3.msra.mxu1 %v9168_v1  ;;  %v9200_v63 = vld [vmem:[#allocation7 + $0x150] sm:$0xff] }
 0x736   :  { %3760 = vmatprep.subr.mxu0 %v9171_v29  ;;  %5574 = vmatprep.subr.mxu1 %v9845_v16  ;;  %10359 = vst [vmem:[#allocation15_spill] sm:$0xff] %v9200_v63  ;;  %v5814_v14 = vpop.eup %5813 }
 0x737   :  { %5815 = vrcp.f32 %v3541_v3  ;;  %3761 = vmatpush1.msra.mxu0 %v9175_v27  ;;  %3794 = vmatprep.mubr.f32.mxu0 %v9845_v16  ;;  %v9203_v3 = vld [vmem:[#allocation7 + $0x160] sm:$0xff] }
 0x738   :  { %5575 = vmatpush3.msra.mxu1 %v9179_v24  ;;  %5576 = vmatprep.mubr.msk.f32.mxu1 %vm6359_vm1, %v9845_v16  ;;  %10360 = vst [vmem:[#allocation25_spill] sm:$0xff] %v9203_v3 }
 0x739   :  { %3795 = vmatmul.mubr.f32.vlgmr.msra.gmra.mxu0 %v9017_v23  ;;  %5577 = vmatmul.mubr.f32.vlgmr.msra.gmra.mxu1 %v9017_v23  ;;  %v9238_v23 = vld [vmem:[#allocation7 + $0xf8] sm:$0xff] }
 0x73a   :  { %3871 = vmatprep.subr.mxu0 %v9186_v39  ;;  %5579 = vmatprep.subr.mxu1 %v9845_v16  ;;  %10370 = vst [vmem:[#allocation32_spill] sm:$0xff] %v9238_v23 }
 0x73b   :  { %3872 = vmatpush1.msra.mxu0 %v9190_v22  ;;  %5580 = vmatpush3.msra.mxu1 %v9193_v17  ;;  %v9210_v17 = vld [vmem:[#allocation7 + $0x138] sm:$0xff]  ;;  %v9220_v22 = vld [vmem:[#allocation7 + $0x120] sm:$0xff] }
 0x73c   :  { %3873 = vmatprep.subr.mxu0 %v9196_v26  ;;  %5581 = vmatprep.subr.mxu1 %v9845_v16  ;;  %10362 = vst [vmem:[#allocation17_spill] sm:$0xff] %v9210_v17  ;;  %v9213_v26 = vld [vmem:[#allocation7 + $0x148] sm:$0xff]  ;;  %10365 = vst [vmem:[#allocation13_spill] sm:$0xff] %v9220_v22 }
 0x73d   :  { %3874 = vmatpush1.msra.mxu0 %v9200_v63  ;;  %5582 = vmatpush3.msra.mxu1 %v9203_v3  ;;  %10363 = vst [vmem:[#allocation24_spill] sm:$0xff] %v9213_v26  ;;  %v9216_v63 = vld [vmem:[#allocation7 + $0x128] sm:$0xff]  ;;  %v3548_v3 = vadd.f32 1.0, %v5814_v14  ;;  %v9235_v14 = vld [vmem:[#allocation7 + $0x118] sm:$0xff] }
 0x73e   :  { %3875 = vmatprep.subr.mxu0 %v9206_v30  ;;  %5583 = vmatprep.subr.mxu1 %v9845_v16  ;;  %10364 = vst [vmem:[#allocation12_spill] sm:$0xff] %v9216_v63  ;;  %v9223_v30 = vld [vmem:[#allocation7 + $0x130] sm:$0xff]  ;;  %10369 = vst [vmem:[#allocation31_spill] sm:$0xff] %v9235_v14 }
 0x73f   :  { %3876 = vmatpush1.msra.mxu0 %v9210_v17  ;;  %5584 = vmatpush3.msra.mxu1 %v9213_v26  ;;  %10366 = vst [vmem:[#allocation22_spill] sm:$0xff] %v9223_v30  ;;  %v9226_v17 = vld [vmem:[#allocation7 + $0x110] sm:$0xff]  ;;  %v9232_v26 = vld [vmem:[#allocation7 + $0x108] sm:$0xff]  ;;  %5817 = vrcp.f32 %v3548_v3 }
 0x740   :  { %3877 = vmatprep.subr.mxu0 %v9216_v63  ;;  %5585 = vmatprep.subr.mxu1 %v9845_v16  ;;  %10367 = vst [vmem:[#allocation29_spill] sm:$0xff] %v9226_v17  ;;  %v3551_v63 = vadd.f32 %v8892_v56, %v9068_v40  ;;  %10368 = vst [vmem:[#allocation30_spill] sm:$0xff] %v9232_v26  ;;  %v9244_v56 = vld [vmem:[#allocation7 + $0xf0] sm:$0xff]  ;;  %v9247_v40 = vld [vmem:[#allocation7 + $0x100] sm:$0xff] }
 0x741   :  { %3878 = vmatpush1.msra.mxu0 %v9220_v22  ;;  %5586 = vmatpush3.msra.mxu1 %v9223_v30  ;;  %v9274_v3 = vld [vmem:[#allocation7 + $0xa8] sm:$0xff] }
 0x742   :  { %3879 = vmatprep.subr.mxu0 %v9226_v17  ;;  %5587 = vmatprep.subr.mxu1 %v9845_v16  ;;  %v3393_v17 = vadd.f32 %v9013_v62, %v7367_v5  ;;  %v9257_v62 = vld [vmem:[#allocation7 + $0xe8] sm:$0xff]  ;;  %10378 = vst [vmem:[#allocation40_spill] sm:$0xff] %v9274_v3  ;;  %v9277_v5 = vld [vmem:[#allocation7 + $0xb8] sm:$0xff] }
 0x743   :  { %3880 = vmatpush1.msra.mxu0 %v9232_v26  ;;  %5588 = vmatpush3.msra.mxu1 %v9235_v14  ;;  %v9250_v14 = vld [vmem:[#allocation7 + $0xe0] sm:$0xff]  ;;  %v9254_v26 = vld [vmem:[#allocation7 + $0xd8] sm:$0xff]  ;;  %10373 = vst [vmem:[#allocation35_spill] sm:$0xff] %v9257_v62  ;;  %10379 = vst [vmem:[#allocation41_spill] sm:$0xff] %v9277_v5 }
 0x744   :  { %v5816_v22 = vpop.eup %5815  ;;  %3881 = vmatprep.subr.mxu0 %v9238_v23  ;;  %5589 = vmatprep.subr.mxu1 %v9845_v16  ;;  %10371 = vst [vmem:[#allocation33_spill] sm:$0xff] %v9250_v14  ;;  %10372 = vst [vmem:[#allocation34_spill] sm:$0xff] %v9254_v26 }
 0x745   :  { %v3552_v30 = vmul.f32 %v5816_v22, %v3551_v63  ;;  %3882 = vmatpush1.msra.mxu0 %v9244_v56  ;;  %5590 = vmatpush3.msra.mxu1 %v9247_v40  ;;  %v9260_v22 = vld [vmem:[#allocation7 + $0xc8] sm:$0xff]  ;;  %v9264_v63 = vld [vmem:[#allocation7 + $0xc0] sm:$0xff] }
 0x746   :  { %3883 = vmatprep.subr.mxu0 %v9250_v14  ;;  %5591 = vmatprep.subr.mxu1 %v9845_v16  ;;  %10374 = vst [vmem:[#allocation36_spill] sm:$0xff] %v9260_v22  ;;  %10375 = vst [vmem:[#allocation37_spill] sm:$0xff] %v9264_v63  ;;  %v9351_v14 = vld [vmem:[#allocation7 + $0x10] sm:$0xff] }
 0x747   :  { %v3553_v23 = vadd.f32 %v3552_v30, %v3393_v17  ;;  %3884 = vmatpush1.msra.mxu0 %v9254_v26  ;;  %5592 = vmatpush3.msra.mxu1 %v9257_v62  ;;  %v9267_v30 = vld [vmem:[#allocation7 + $0xd0] sm:$0xff]  ;;  %v9330_v62 = vld [vmem:[#allocation7 + $0x20] sm:$0xff] }
 0x748   :  { %3885 = vmatprep.subr.mxu0 %v9260_v22  ;;  %5593 = vmatprep.subr.mxu1 %v9845_v16  ;;  %10376 = vst [vmem:[#allocation38_spill] sm:$0xff] %v9267_v30  ;;  %v9270_v17 = vld [vmem:[#allocation7 + $0xb0] sm:$0xff]  ;;  %10395 = vst [vmem:[#allocation57_spill] sm:$0xff] %v9330_v62 }
 0x749   :  { %5819 = vtanh.f32 %v3553_v23  ;;  %3886 = vmatpush1.msra.mxu0 %v9264_v63  ;;  %5594 = vmatpush3.msra.mxu1 %v9267_v30  ;;  %10377 = vst [vmem:[#allocation39_spill] sm:$0xff] %v9270_v17  ;;  %v9280_v23 = vld [vmem:[#allocation7 + $0x98] sm:$0xff]  ;;  %v9284_v30 = vld [vmem:[#allocation7 + $0x90] sm:$0xff]  ;;  %v9290_v63 = vld [vmem:[#allocation7 + $0x80] sm:$0xff] }
 0x74a   :  { %3887 = vmatprep.subr.mxu0 %v9270_v17  ;;  %5595 = vmatprep.subr.mxu1 %v9845_v16  ;;  %10380 = vst [vmem:[#allocation42_spill] sm:$0xff] %v9280_v23  ;;  %10381 = vst [vmem:[#allocation43_spill] sm:$0xff] %v9284_v30  ;;  %v9287_v17 = vld [vmem:[#allocation7 + $0xa0] sm:$0xff] }
 0x74b   :  { %3888 = vmatpush1.msra.mxu0 %v9274_v3  ;;  %5596 = vmatpush3.msra.mxu1 %v9277_v5  ;;  %10382 = vst [vmem:[#allocation44_spill] sm:$0xff] %v9287_v17  ;;  %10383 = vst [vmem:[#allocation45_spill] sm:$0xff] %v9290_v63  ;;  %v9294_v5 = vld [vmem:[#allocation7 + $0x78] sm:$0xff]  ;;  %v9300_v3 = vld [vmem:[#allocation7 + $0x68] sm:$0xff] }
 0x74c   :  { %3889 = vmatprep.subr.mxu0 %v9280_v23  ;;  %5597 = vmatprep.subr.mxu1 %v9845_v16  ;;  %10384 = vst [vmem:[#allocation46_spill] sm:$0xff] %v9294_v5  ;;  %v9297_v23 = vld [vmem:[#allocation7 + $0x88] sm:$0xff]  ;;  %10386 = vst [vmem:[#allocation48_spill] sm:$0xff] %v9300_v3 }
 0x74d   :  { %3890 = vmatpush1.msra.mxu0 %v9284_v30  ;;  %5598 = vmatpush3.msra.mxu1 %v9287_v17  ;;  %10385 = vst [vmem:[#allocation47_spill] sm:$0xff] %v9297_v23  ;;  %v9304_v17 = vld [vmem:[#allocation7 + $0x60] sm:$0xff]  ;;  %v5818_v30 = vpop.eup %5817 }
 0x74e   :  { %3891 = vmatprep.subr.mxu0 %v9290_v63  ;;  %5599 = vmatprep.subr.mxu1 %v9845_v16  ;;  %10387 = vst [vmem:[#allocation49_spill] sm:$0xff] %v9304_v17  ;;  %v9307_v63 = vld [vmem:[#allocation7 + $0x70] sm:$0xff]  ;;  %v3555_v22 = vsub.f32 1.0, %v5818_v30  ;;  %v3557_v26 = vmul.f32 %v5818_v30, %v8945_v18  ;;  %v10419_v30 = vld [vmem:[#allocation35_spill] sm:$0xff] }
 0x74f   :  { %3892 = vmatpush1.msra.mxu0 %v9294_v5  ;;  %5600 = vmatpush3.msra.mxu1 %v9297_v23  ;;  %10388 = vst [vmem:[#allocation50_spill] sm:$0xff] %v9307_v63  ;;  %v9310_v5 = vld [vmem:[#allocation7 + $0x50] sm:$0xff]  ;;  %v9314_v23 = vld [vmem:[#allocation7 + $0x48] sm:$0xff] }
 0x750   :  { %3893 = vmatprep.subr.mxu0 %v9300_v3  ;;  %5601 = vmatprep.subr.mxu1 %v9845_v16  ;;  %10389 = vst [vmem:[#allocation51_spill] sm:$0xff] %v9310_v5  ;;  %10390 = vst [vmem:[#allocation53_spill] sm:$0xff] %v9314_v23  ;;  %v9317_v3 = vld [vmem:[#allocation7 + $0x58] sm:$0xff] }
 0x751   :  { %3894 = vmatpush1.msra.mxu0 %v9304_v17  ;;  %5602 = vmatpush3.msra.mxu1 %v9307_v63  ;;  %10391 = vst [vmem:[#allocation52_spill] sm:$0xff] %v9317_v3  ;;  %v9320_v17 = vld [vmem:[#allocation7 + $0x38] sm:$0xff]  ;;  %v9324_v63 = vld [vmem:[#allocation7 + $0x30] sm:$0xff] }
 0x752   :  { %3895 = vmatprep.subr.mxu0 %v9310_v5  ;;  %5603 = vmatprep.subr.mxu1 %v9845_v16  ;;  %10392 = vst [vmem:[#allocation54_spill] sm:$0xff] %v9320_v17  ;;  %10393 = vst [vmem:[#allocation56_spill] sm:$0xff] %v9324_v63  ;;  %v9327_v5 = vld [vmem:[#allocation7 + $0x40] sm:$0xff] }
 0x753   :  { %3896 = vmatpush1.msra.mxu0 %v9314_v23  ;;  %5604 = vmatpush3.msra.mxu1 %v9317_v3  ;;  %10394 = vst [vmem:[#allocation55_spill] sm:$0xff] %v9327_v5  ;;  %v9334_v3 = vld [vmem:[#allocation7 + $0x18] sm:$0xff] }
 0x754   :  { %3897 = vmatprep.subr.mxu0 %v9320_v17  ;;  %5605 = vmatprep.subr.mxu1 %v9845_v16  ;;  %10396 = vst [vmem:[#allocation59_spill] sm:$0xff] %v9334_v3  ;;  %v9337_v17 = vld [vmem:[#allocation7 + $0x28] sm:$0xff] }
 0x755   :  { %3898 = vmatpush1.msra.mxu0 %v9324_v63  ;;  %5606 = vmatpush3.msra.mxu1 %v9327_v5  ;;  %v9341_v5 = vld [vmem:[#allocation7 + $0x8] sm:$0xff] }
 0x756   :  { %v5820_v23 = vpop.eup %5819  ;;  %3899 = vmatprep.subr.mxu0 %v9330_v62  ;;  %5607 = vmatprep.subr.mxu1 %v9845_v16  ;;  %v9345_v62 = vld [vmem:[#allocation7] sm:$0xff] }
 0x757   :  { %3900 = vmatpush1.msra.mxu0 %v9334_v3  ;;  %5608 = vmatpush3.msra.mxu1 %v9337_v17  ;;  %v3556_v63 = vmul.f32 %v5820_v23, %v3555_v22 }
 0x758   :  { %3901 = vmatprep.subr.mxu0 %v9341_v5  ;;  %5609 = vmatprep.subr.mxu1 %v9845_v16 }
 0x759   :  { %3902 = vmatpush1.msra.mxu0 %v9345_v62  ;;  %3935 = vmatprep.mubr.f32.mxu0 %v9845_v16  ;;  %v9349_v3 = vadd.f32 %v3557_v26, %v3556_v63  ;;  %v10417_v26 = vld [vmem:[#allocation33_spill] sm:$0xff]  ;;  %v10418_v63 = vld [vmem:[#allocation34_spill] sm:$0xff] }
 0x75a   :  { %5610 = vmatpush3.msra.mxu1 %v9351_v14  ;;  %5611 = vmatprep.mubr.msk.f32.mxu1 %vm6359_vm1, %v9845_v16 }
 0x75b   :  { %4402 = vst [vmem:[%s9529_s9 + $0x28] sm:$0xff] %v9349_v3  ;;  %3936 = vmatmul.mubr.f32.vlgmr.msra.gmra.mxu0 %v9349_v3  ;;  %5612 = vmatmul.mubr.f32.vlgmr.msra.gmra.mxu1 %v9349_v3 }
 0x75c   :  { %4036 = vmatprep.subr.mxu0 %v9001_v60  ;;  %5614 = vmatprep.subr.mxu1 %v9845_v16 }
 0x75d   :  { %4037 = vmatpush1.msra.mxu0 %v9021_v55  ;;  %5615 = vmatpush3.msra.mxu1 %v9024_v36  ;;  %v10397_v55 = vld [vmem:[#allocation20_spill] sm:$0xff] }
 0x75e   :  { %4038 = vmatprep.subr.mxu0 %v9027_v58  ;;  %5616 = vmatprep.subr.mxu1 %v9845_v16 }
 0x75f   :  { %4039 = vmatpush1.msra.mxu0 %v9031_v37  ;;  %5617 = vmatpush3.msra.mxu1 %v9034_v57 }
 0x760   :  { %4040 = vmatprep.subr.mxu0 %v9037_v25  ;;  %5618 = vmatprep.subr.mxu1 %v9845_v16  ;;  %v10398_v25 = vld [vmem:[#allocation21_spill] sm:$0xff] }
 0x761   :  { %4041 = vmatpush1.msra.mxu0 %v9041_v51  ;;  %5619 = vmatpush3.msra.mxu1 %v9044_v46 }
 0x762   :  { %4042 = vmatprep.subr.mxu0 %v9047_v54  ;;  %5620 = vmatprep.subr.mxu1 %v9845_v16 }
 0x763   :  { %4043 = vmatpush1.msra.mxu0 %v9051_v8  ;;  %5621 = vmatpush3.msra.mxu1 %v9054_v11 }
 0x764   :  { %4044 = vmatprep.subr.mxu0 %v9057_v13  ;;  %5622 = vmatprep.subr.mxu1 %v9845_v16 }
 0x765   :  { %4045 = vmatpush1.msra.mxu0 %v9062_v15  ;;  %5623 = vmatpush3.msra.mxu1 %v9065_v6 }
 0x766   :  { %4046 = vmatprep.subr.mxu0 %v9070_v2  ;;  %5624 = vmatprep.subr.mxu1 %v9845_v16 }
 0x767   :  { %4047 = vmatpush1.msra.mxu0 %v9074_v49  ;;  %5625 = vmatpush3.msra.mxu1 %v9077_v41 }
 0x768   :  { %4048 = vmatprep.subr.mxu0 %v9080_v47  ;;  %5626 = vmatprep.subr.mxu1 %v9845_v16  ;;  %v10399_v47 = vld [vmem:[#allocation26_spill] sm:$0xff] }
 0x769   :  { %4049 = vmatpush1.msra.mxu0 %v9084_v34  ;;  %5627 = vmatpush3.msra.mxu1 %v9087_v38 }
 0x76a   :  { %4050 = vmatprep.subr.mxu0 %v9090_v61  ;;  %5628 = vmatprep.subr.mxu1 %v9845_v16 }
 0x76b   :  { %4051 = vmatpush1.msra.mxu0 %v9095_v42  ;;  %5629 = vmatpush3.msra.mxu1 %v9098_v7 }
 0x76c   :  { %4052 = vmatprep.subr.mxu0 %v9101_v19  ;;  %5630 = vmatprep.subr.mxu1 %v9845_v16  ;;  %v10400_v19 = vld [vmem:[#allocation10_spill] sm:$0xff] }
 0x76d   :  { %4053 = vmatpush1.msra.mxu0 %v9105_v9  ;;  %5631 = vmatpush3.msra.mxu1 %v9108_v21 }
 0x76e   :  { %4054 = vmatprep.subr.mxu0 %v9111_v33  ;;  %5632 = vmatprep.subr.mxu1 %v9845_v16  ;;  %v10401_v33 = vld [vmem:[#allocation11_spill] sm:$0xff] }
 0x76f   :  { %4055 = vmatpush1.msra.mxu0 %v9115_v53  ;;  %5633 = vmatpush3.msra.mxu1 %v9118_v35  ;;  %v10403_v53 = vld [vmem:[#allocation14_spill] sm:$0xff]  ;;  %v10404_v35 = vld [vmem:[#allocation15_spill] sm:$0xff] }
 0x770   :  { %4056 = vmatprep.subr.mxu0 %v9121_v4  ;;  %5634 = vmatprep.subr.mxu1 %v9845_v16  ;;  %v10405_v4 = vld [vmem:[#allocation25_spill] sm:$0xff] }
 0x771   :  { %4057 = vmatpush1.msra.mxu0 %v9125_v59  ;;  %5635 = vmatpush3.msra.mxu1 %v9128_v52  ;;  %v10406_v52 = vld [vmem:[#allocation16_spill] sm:$0xff] }
 0x772   :  { %4058 = vmatprep.subr.mxu0 %v9131_v31  ;;  %5636 = vmatprep.subr.mxu1 %v9845_v16  ;;  %v10407_v31 = vld [vmem:[#allocation17_spill] sm:$0xff] }
 0x773   :  { %4059 = vmatpush1.msra.mxu0 %v9135_v10  ;;  %5637 = vmatpush3.msra.mxu1 %v9138_v12  ;;  %v10408_v10 = vld [vmem:[#allocation24_spill] sm:$0xff] }
 0x774   :  { %4060 = vmatprep.subr.mxu0 %v9141_v50  ;;  %5638 = vmatprep.subr.mxu1 %v9845_v16  ;;  %v10409_v12 = vld [vmem:[#allocation12_spill] sm:$0xff]  ;;  %v10410_v50 = vld [vmem:[#allocation13_spill] sm:$0xff] }
 0x775   :  { %4061 = vmatpush1.msra.mxu0 %v9145_v43  ;;  %5639 = vmatpush3.msra.mxu1 %v9148_v48  ;;  %v10411_v43 = vld [vmem:[#allocation22_spill] sm:$0xff] }
 0x776   :  { %4062 = vmatprep.subr.mxu0 %v9151_v0  ;;  %5640 = vmatprep.subr.mxu1 %v9845_v16  ;;  %v10412_v0 = vld [vmem:[#allocation29_spill] sm:$0xff] }
 0x777   :  { %4063 = vmatpush1.msra.mxu0 %v9155_v45  ;;  %5641 = vmatpush3.msra.mxu1 %v9158_v20  ;;  %v10413_v45 = vld [vmem:[#allocation108_spill] sm:$0xff] }
 0x778   :  { %4064 = vmatprep.subr.mxu0 %v9161_v32  ;;  %5642 = vmatprep.subr.mxu1 %v9845_v16  ;;  %v10414_v32 = vld [vmem:[#allocation30_spill] sm:$0xff] }
 0x779   :  { %4065 = vmatpush1.msra.mxu0 %v9165_v44  ;;  %5643 = vmatpush3.msra.mxu1 %v9168_v1  ;;  %v10415_v44 = vld [vmem:[#allocation31_spill] sm:$0xff] }
 0x77a   :  { %4066 = vmatprep.subr.mxu0 %v9171_v29  ;;  %5644 = vmatprep.subr.mxu1 %v9845_v16 }
 0x77b   :  { %4067 = vmatpush1.msra.mxu0 %v9175_v27  ;;  %4100 = vmatprep.mubr.f32.mxu0 %v9845_v16  ;;  %v10416_v27 = vld [vmem:[#allocation32_spill] sm:$0xff] }
 0x77c   :  { %5645 = vmatpush3.msra.mxu1 %v9179_v24  ;;  %5646 = vmatprep.mubr.msk.f32.mxu1 %vm6359_vm1, %v9845_v16 }
 0x77d   :  { %4177 = vmatprep.subr.mxu0 %v9186_v39  ;;  %5649 = vmatprep.subr.mxu1 %v9845_v16 }
 0x7d8   :  { %v3633_v18 = vpop.f32.mrf.mxu0  ;;  %v3704_v60 = vpop.f32.mrf.mxu1 }
 0x7d9   :  { %v3708_v36 = vadd.f32 %v3633_v18, %v10397_v55  ;;  %v3722_v15 = vadd.f32 %v9010_v28, %v3704_v60  ;;  %v10402_v28 = vld [vmem:[#allocation23_spill] sm:$0xff]  ;;  %v10420_v18 = vld [vmem:[#allocation36_spill] sm:$0xff]  ;;  %v10421_v60 = vld [vmem:[#allocation109_spill] sm:$0xff] }
 0x7da   :  { %v5543_v58 = vpop.f32.mrf.mxu1  ;;  %v3635_v57 = vpop.f32.mrf.mxu0 }
 0x7db   :  { %v4403_v37 = vmul.f32 -1.442695, %v3708_v36  ;;  %v3715_v51 = vadd.f32 %v3635_v57, %v10398_v25  ;;  %v10424_v36 = vld [vmem:[#allocation39_spill] sm:$0xff]  ;;  %v10426_v57 = vld [vmem:[#allocation41_spill] sm:$0xff]  ;;  %v10427_v25 = vld [vmem:[#allocation42_spill] sm:$0xff] }
 0x7dd   :  { %5821 = vpow2.f32 %v4403_v37  ;;  %v4404_v46 = vmul.f32 -1.442695, %v3715_v51  ;;  %v10425_v37 = vld [vmem:[#allocation40_spill] sm:$0xff]  ;;  %v10428_v51 = vld [vmem:[#allocation43_spill] sm:$0xff] }
 0x7df   :  { %5823 = vpow2.f32 %v4404_v46  ;;  %v10429_v46 = vld [vmem:[#allocation44_spill] sm:$0xff] }
 0x7ea   :  { %v5822_v54 = vpop.eup %5821 }
 0x7eb   :  { %v3712_v8 = vadd.f32 1.0, %v5822_v54  ;;  %v10430_v54 = vld [vmem:[#allocation45_spill] sm:$0xff] }
 0x7ec   :  { %v5824_v11 = vpop.eup %5823 }
 0x7ed   :  { %5825 = vrcp.f32 %v3712_v8  ;;  %v3719_v13 = vadd.f32 1.0, %v5824_v11  ;;  %v10431_v11 = vld [vmem:[#allocation46_spill] sm:$0xff] }
 0x7ef   :  { %5827 = vrcp.f32 %v3719_v13  ;;  %v10432_v13 = vld [vmem:[#allocation47_spill] sm:$0xff] }
 0x7f9   :  { %v9434_v6 = vpop.f32.mrf.mxu1  ;;  %v3796_v59 = vpop.f32.mrf.mxu0 }
 0x7fa   :  { %v5826_v2 = vpop.eup %5825  ;;  %v3797_v20 = vadd.f32 %v3796_v59, %v10413_v45 }
 0x7fb   :  { %v3723_v49 = vmul.f32 %v5826_v2, %v3722_v15  ;;  %v5578_v41 = vpop.f32.mrf.mxu1  ;;  %v3798_v48 = vpop.f32.mrf.mxu0  ;;  %v10433_v15 = vld [vmem:[#allocation48_spill] sm:$0xff]  ;;  %v10434_v2 = vld [vmem:[#allocation49_spill] sm:$0xff] }
 0x7fc   :  { %v5828_v38 = vpop.eup %5827  ;;  %v3799_v55 = vadd.f32 %v3798_v48, %v10421_v60  ;;  %v10436_v41 = vld [vmem:[#allocation51_spill] sm:$0xff] }
 0x7fd   :  { %v3724_v34 = vadd.f32 %v3723_v49, %v10399_v47  ;;  %v3726_v61 = vsub.f32 1.0, %v5828_v38  ;;  %v3728_v9 = vmul.f32 %v5828_v38, %v10400_v19  ;;  %v10435_v49 = vld [vmem:[#allocation50_spill] sm:$0xff]  ;;  %v10437_v47 = vld [vmem:[#allocation53_spill] sm:$0xff] }
 0x7fe   :  { %v10439_v38 = vld [vmem:[#allocation54_spill] sm:$0xff]  ;;  %v10442_v19 = vld [vmem:[#allocation57_spill] sm:$0xff] }
 0x7ff   :  { %5829 = vtanh.f32 %v3724_v34  ;;  %v10438_v34 = vld [vmem:[#allocation52_spill] sm:$0xff] }
 0x80c   :  { %v5830_v42 = vpop.eup %5829 }
 0x80d   :  { %v3727_v7 = vmul.f32 %v5830_v42, %v3726_v61  ;;  %v10440_v61 = vld [vmem:[#allocation56_spill] sm:$0xff]  ;;  %v10441_v42 = vld [vmem:[#allocation55_spill] sm:$0xff] }
 0x80f   :  { %v3729_v21 = vadd.f32 %v3728_v9, %v3727_v7 }
 0x811   :  { %4101 = vmatmul.mubr.f32.vlgmr.msra.gmra.mxu0 %v3729_v21  ;;  %5647 = vmatmul.mubr.f32.vlgmr.msra.gmra.mxu1 %v3729_v21  ;;  %v10443_v21 = vld [vmem:[#allocation59_spill] sm:$0xff] }
 0x812   :  { %4178 = vmatpush1.msra.mxu0 %v10401_v33  ;;  %5650 = vmatpush3.msra.mxu1 %v10402_v28 }
 0x813   :  { %4179 = vmatprep.subr.mxu0 %v10403_v53  ;;  %5651 = vmatprep.subr.mxu1 %v9845_v16 }
 0x814   :  { %4180 = vmatpush1.msra.mxu0 %v10404_v35  ;;  %5652 = vmatpush3.msra.mxu1 %v10405_v4  ;;  %v10444_v35 = vld [vmem:[#allocation28_spill] sm:$0xff] }
 0x815   :  { %4181 = vmatprep.subr.mxu0 %v10406_v52  ;;  %5653 = vmatprep.subr.mxu1 %v9845_v16  ;;  %v3868_v4 = vadd.f32 %v9434_v6, %v10444_v35 }
 0x816   :  { %4182 = vmatpush1.msra.mxu0 %v10407_v31  ;;  %5654 = vmatpush3.msra.mxu1 %v10408_v10 }
 0x817   :  { %4183 = vmatprep.subr.mxu0 %v10409_v12  ;;  %5655 = vmatprep.subr.mxu1 %v9845_v16 }
 0x818   :  { %4184 = vmatpush1.msra.mxu0 %v10410_v50  ;;  %5656 = vmatpush3.msra.mxu1 %v10411_v43 }
 0x819   :  { %4185 = vmatprep.subr.mxu0 %v10412_v0  ;;  %5657 = vmatprep.subr.mxu1 %v9845_v16 }
 0x81a   :  { %4186 = vmatpush1.msra.mxu0 %v10414_v32  ;;  %5658 = vmatpush3.msra.mxu1 %v10415_v44 }
 0x81b   :  { %v3937_v1 = vpop.f32.mrf.mxu0  ;;  %v4008_v29 = vpop.f32.mrf.mxu1  ;;  %4187 = vmatprep.subr.mxu0 %v10416_v27  ;;  %5659 = vmatprep.subr.mxu1 %v9845_v16 }
 0x81c   :  { %v4012_v24 = vadd.f32 %v3937_v1, %v3797_v20  ;;  %4188 = vmatpush1.msra.mxu0 %v9244_v56  ;;  %5660 = vmatpush3.msra.mxu1 %v9247_v40  ;;  %v10422_v56 = vld [vmem:[#allocation37_spill] sm:$0xff]  ;;  %v10423_v40 = vld [vmem:[#allocation38_spill] sm:$0xff] }
 0x81d   :  { %v5613_v39 = vpop.f32.mrf.mxu1  ;;  %4189 = vmatprep.subr.mxu0 %v10417_v26  ;;  %5661 = vmatprep.subr.mxu1 %v9845_v16  ;;  %v3939_v23 = vpop.f32.mrf.mxu0 }
 0x81e   :  { %v4405_v22 = vmul.f32 -1.442695, %v4012_v24  ;;  %4190 = vmatpush1.msra.mxu0 %v10418_v63  ;;  %5662 = vmatpush3.msra.mxu1 %v10419_v30  ;;  %v4019_v58 = vadd.f32 %v3939_v23, %v3799_v55 }
 0x81f   :  { %4191 = vmatprep.subr.mxu0 %v10420_v18  ;;  %5663 = vmatprep.subr.mxu1 %v9845_v16 }
 0x820   :  { %5831 = vpow2.f32 %v4405_v22  ;;  %4192 = vmatpush1.msra.mxu0 %v10422_v56  ;;  %5664 = vmatpush3.msra.mxu1 %v10423_v40  ;;  %v4406_v8 = vmul.f32 -1.442695, %v4019_v58 }
 0x821   :  { %4193 = vmatprep.subr.mxu0 %v10424_v36  ;;  %5665 = vmatprep.subr.mxu1 %v9845_v16 }
 0x822   :  { %4194 = vmatpush1.msra.mxu0 %v10425_v37  ;;  %5666 = vmatpush3.msra.mxu1 %v10426_v57  ;;  %5833 = vpow2.f32 %v4406_v8 }
 0x823   :  { %4195 = vmatprep.subr.mxu0 %v10427_v25  ;;  %5667 = vmatprep.subr.mxu1 %v9845_v16 }
 0x824   :  { %4196 = vmatpush1.msra.mxu0 %v10428_v51  ;;  %5668 = vmatpush3.msra.mxu1 %v10429_v46 }
 0x825   :  { %4197 = vmatprep.subr.mxu0 %v10430_v54  ;;  %5669 = vmatprep.subr.mxu1 %v9845_v16 }
 0x826   :  { %4198 = vmatpush1.msra.mxu0 %v10431_v11  ;;  %5670 = vmatpush3.msra.mxu1 %v10432_v13 }
 0x827   :  { %4199 = vmatprep.subr.mxu0 %v10433_v15  ;;  %5671 = vmatprep.subr.mxu1 %v9845_v16 }
 0x828   :  { %4200 = vmatpush1.msra.mxu0 %v10434_v2  ;;  %5672 = vmatpush3.msra.mxu1 %v10435_v49 }
 0x829   :  { %4201 = vmatprep.subr.mxu0 %v10436_v41  ;;  %5673 = vmatprep.subr.mxu1 %v9845_v16 }
 0x82a   :  { %4202 = vmatpush1.msra.mxu0 %v10437_v47  ;;  %5674 = vmatpush3.msra.mxu1 %v10438_v34 }
 0x82b   :  { %4203 = vmatprep.subr.mxu0 %v10439_v38  ;;  %5675 = vmatprep.subr.mxu1 %v9845_v16 }
 0x82c   :  { %4204 = vmatpush1.msra.mxu0 %v10440_v61  ;;  %5676 = vmatpush3.msra.mxu1 %v10441_v42 }
 0x82d   :  { %v5832_v7 = vpop.eup %5831  ;;  %4205 = vmatprep.subr.mxu0 %v10442_v19  ;;  %5677 = vmatprep.subr.mxu1 %v9845_v16 }
 0x82e   :  { %v4016_v9 = vadd.f32 1.0, %v5832_v7  ;;  %4206 = vmatpush1.msra.mxu0 %v10443_v21  ;;  %5678 = vmatpush3.msra.mxu1 %v9337_v17  ;;  %v6288_v17 = vld [vmem:[%s9528_s8] ss:$0 sm:$0xff] }
 0x82f   :  { %4207 = vmatprep.subr.mxu0 %v9341_v5  ;;  %5679 = vmatprep.subr.mxu1 %v9845_v16  ;;  %v5834_v33 = vpop.eup %5833  ;;  %v4026_v53 = vadd.f32 %v6288_v17, %v4008_v29 }
 0x830   :  { %5835 = vrcp.f32 %v4016_v9  ;;  %4208 = vmatpush1.msra.mxu0 %v9345_v62  ;;  %4241 = vmatprep.mubr.f32.mxu0 %v9845_v16  ;;  %v4023_v28 = vadd.f32 1.0, %v5834_v33 }
 0x831   :  { %5680 = vmatpush3.msra.mxu1 %v9351_v14  ;;  %5681 = vmatprep.mubr.msk.f32.mxu1 %vm6359_vm1, %v9845_v16 }
 0x832   :  { %5837 = vrcp.f32 %v4023_v28 }
 0x83d   :  { %v5836_v5 = vpop.eup %5835 }
 0x83e   :  { %v4027_v59 = vmul.f32 %v5836_v5, %v4026_v53 }
 0x83f   :  { %v5838_v52 = vpop.eup %5837 }
 0x840   :  { %v4028_v62 = vadd.f32 %v4027_v59, %v3868_v4  ;;  %v4030_v14 = vsub.f32 1.0, %v5838_v52  ;;  %v4032_v16 = vmul.f32 %v5838_v52, %v9349_v3 }
 0x842   :  { %5839 = vtanh.f32 %v4028_v62 }
 0x84f   :  { %v5840_v31 = vpop.eup %5839 }
 0x850   :  { %v4031_v10 = vmul.f32 %v5840_v31, %v4030_v14 }
 0x852   :  { %v4033_v12 = vadd.f32 %v4032_v16, %v4031_v10 }
 0x854   :  { %4407 = vst [vmem:[%s9529_s9 + $0x30] sm:$0xff] %v4033_v12  ;;  %4242 = vmatmul.mubr.f32.vlgmr.msra.gmra.mxu0 %v4033_v12  ;;  %5682 = vmatmul.mubr.f32.vlgmr.msra.gmra.mxu1 %v4033_v12 }
 0x8d1   :  { %v4173_v50 = vpop.f32.mrf.mxu1  ;;  %v4102_v6 = vpop.f32.mrf.mxu0 }
 0x8d2   :  { %v4103_v0 = vadd.f32 %v4102_v6, %v10413_v45  ;;  %v4174_v45 = vadd.f32 %v4173_v50, %v10444_v35 }
 0x8d3   :  { %v5648_v43 = vpop.f32.mrf.mxu1  ;;  %v4104_v48 = vpop.f32.mrf.mxu0 }
 0x8d4   :  { %v4105_v3 = vadd.f32 %v4104_v48, %v10421_v60 }
 0x914   :  { %v4243_v20 = vpop.f32.mrf.mxu0  ;;  %v4314_v32 = vpop.f32.mrf.mxu1 }
 0x915   :  { %v4318_v44 = vadd.f32 %v4243_v20, %v4103_v0  ;;  %v4332_v23 = vadd.f32 %v6288_v17, %v4314_v32 }
 0x916   :  { %v5683_v1 = vpop.f32.mrf.mxu1  ;;  %v4245_v27 = vpop.f32.mrf.mxu0 }
 0x917   :  { %v4408_v29 = vmul.f32 -1.442695, %v4318_v44  ;;  %v4325_v24 = vadd.f32 %v4245_v27, %v4105_v3 }
 0x919   :  { %5841 = vpow2.f32 %v4408_v29  ;;  %v4409_v39 = vmul.f32 -1.442695, %v4325_v24 }
 0x91b   :  { %5843 = vpow2.f32 %v4409_v39 }
 0x926   :  { %v5842_v26 = vpop.eup %5841 }
 0x927   :  { %v4322_v22 = vadd.f32 1.0, %v5842_v26 }
 0x928   :  { %v5844_v63 = vpop.eup %5843 }
 0x929   :  { %5845 = vrcp.f32 %v4322_v22  ;;  %v4329_v30 = vadd.f32 1.0, %v5844_v63 }
 0x92b   :  { %5847 = vrcp.f32 %v4329_v30 }
 0x936   :  { %v5846_v18 = vpop.eup %5845 }
 0x937   :  { %v4333_v55 = vmul.f32 %v5846_v18, %v4332_v23 }
 0x938   :  { %v5848_v40 = vpop.eup %5847 }
 0x939   :  { %v4334_v56 = vadd.f32 %v4333_v55, %v4174_v45  ;;  %v4336_v36 = vsub.f32 1.0, %v5848_v40  ;;  %v4338_v37 = vmul.f32 %v5848_v40, %v4033_v12 }
 0x93b   :  { %5849 = vtanh.f32 %v4334_v56 }
 0x948   :  { %v5850_v60 = vpop.eup %5849 }
 0x949   :  { %v4337_v58 = vmul.f32 %v5850_v60, %v4336_v36 }
 0x94b   :  { %v4339_v57 = vadd.f32 %v4338_v37, %v4337_v58 }
 0x94d   :  { %4340 = vst [vmem:[%s9529_s9 + $0x38] sm:$0xff] %v4339_v57 }
 0x94e   :  { %4345 = vsyncpa [#allocation4], 1 }
 0x94f   :  { %4346 = vsyncpa [#allocation6], 1 }

</bundles_post_ra>
